<compile_context>
chip_gen: v6e
topology: v6e:2x2x1
jax: 0.10.0
libtpu: 0.0.40
codegen_flags: <defaults>
</compile_context>

<pallas_src>
import jax
import jax.numpy as jnp
from jax.experimental import pallas as pl
from jax.experimental.pallas import tpu as pltpu


# ----------------------------- Pallas kernel ------------------------------- #

def _make_kernel(T, S, D, H, tq, *, is_first, causal, eps=1e-5):
    hd = D // H
    f32 = jnp.float32
    bf16 = jnp.bfloat16

    def layer_norm(x, g, b):
        mu = jnp.mean(x, axis=-1, keepdims=True)
        xc = x - mu
        var = jnp.mean(xc * xc, axis=-1, keepdims=True)
        return xc * jax.lax.rsqrt(var + eps) * g + b

    def split_heads(x2d):
        # (rows, D) -> (H, rows, hd): H tile-aligned lane slices (one pass over
        # rows*D elements total) feeding a single H-batched dot_general.
        return jnp.stack([x2d[:, h * hd:(h + 1) * hd] for h in range(H)], axis=0)

    def merge_heads(x3d):
        # (H, rows, hd) -> (rows, D): pack contexts back onto the lane axis so
        # the output projection runs as one K=D matmul (full MXU width).
        return jnp.concatenate([x3d[h] for h in range(H)], axis=-1)

    def batched_qk(q3, k3):
        # (H, Tq, hd) x (H, Sk, hd) -> (H, Tq, Sk); H batched, f32 accumulation.
        return jax.lax.dot_general(q3, k3, (((2,), (2,)), ((0,), (0,))),
                                   preferred_element_type=f32)

    def batched_pv(p3, v3):
        # (H, Tq, Sk) x (H, Sk, hd) -> (H, Tq, hd)
        return jax.lax.dot_general(p3, v3, (((2,), (1,)), ((0,), (0,))),
                                   preferred_element_type=f32)

    def softmax_lastdim(s):
        m = jnp.max(s, axis=-1, keepdims=True)
        e = jnp.exp(s - m)
        denom = jnp.sum(e, axis=-1, keepdims=True)
        return e * pl.reciprocal(denom, approx=True)

    def attention(q2d, k3, v3, wo, mask):
        # q2d: (tq, D) already scaled (scale folded into wq); k3/v3: (H, Sk, hd)
        q3 = split_heads(q2d).astype(bf16)
        s = batched_qk(q3, k3)                                   # (H, tq, Sk)
        if mask is not None:
            s = jnp.where(mask, jnp.float32(-1e30), s)
        p = softmax_lastdim(s)
        ctx = merge_heads(batched_pv(p.astype(bf16), v3))        # (tq, D) f32
        out = jnp.dot(ctx.astype(bf16), wo, preferred_element_type=f32)
        return out, p

    def kernel(x_ref, enc_ref,
               ln1g, ln1b, wq1, wkv1, wo1,
               ln2g, ln2b, wq2, wkv2, wo2,
               ln3g, ln3b, w1, b1, w2, b2,
               out_ref, attn_ref,
               k1_sc, v1_sc, k2_sc, v2_sc):
        t = pl.program_id(1)

        # ---- once per batch element: compute & cache self/cross K, V -------
        @pl.when(t == 0)
        def _():
            xn_full = layer_norm(x_ref[...], ln1g[...], ln1b[...])          # (T, D)
            kv1 = jnp.dot(xn_full.astype(bf16), wkv1[...],
                          preferred_element_type=f32)                        # (T, 2D)
            kv2 = jnp.dot(enc_ref[...], wkv2[...],
                          preferred_element_type=f32)                        # (S, 2D)
            for h in range(H):
                ksl = slice(h * hd, (h + 1) * hd)
                vsl = slice(D + h * hd, D + (h + 1) * hd)
                k1_sc[h] = kv1[:, ksl].astype(bf16)
                v1_sc[h] = kv1[:, vsl].astype(bf16)
                k2_sc[h] = kv2[:, ksl].astype(bf16)
                v2_sc[h] = kv2[:, vsl].astype(bf16)

        row0 = pl.multiple_of(t * tq, tq)
        x_t = x_ref[pl.ds(row0, tq), :]                                      # (tq, D)

        # ---- self attention (pre-LN, in-kernel causal mask) -----------------
        xn = layer_norm(x_t, ln1g[...], ln1b[...])
        q = jnp.dot(xn.astype(bf16), wq1[...], preferred_element_type=f32)   # (tq, D)
        mask = None
        if causal:
            q_idx = jax.lax.broadcasted_iota(jnp.int32, (H, tq, T), 1) + row0
            k_idx = jax.lax.broadcasted_iota(jnp.int32, (H, tq, T), 2)
            mask = k_idx > q_idx
        sa, _ = attention(q, k1_sc[...], v1_sc[...], wo1[...], mask)
        resid = (xn + sa) if is_first else (x_t + sa)

        # ---- encoder-decoder attention --------------------------------------
        yn = layer_norm(resid, ln2g[...], ln2b[...])
        q2 = jnp.dot(yn.astype(bf16), wq2[...], preferred_element_type=f32)
        ca, p2 = attention(q2, k2_sc[...], v2_sc[...], wo2[...], None)
        attn_ref[...] = p2.astype(attn_ref.dtype)   # bf16 contiguous slab write
        resid = resid + ca

        # ---- FFN -------------------------------------------------------------
        zn = layer_norm(resid, ln3g[...], ln3b[...])
        hid = jnp.dot(zn.astype(bf16), w1[...], preferred_element_type=f32) + b1[...]
        hid = jnp.maximum(hid, 0.0)
        ff = jnp.dot(hid.astype(bf16), w2[...], preferred_element_type=f32) + b2[...]
        out_ref[...] = resid + ff

    return kernel


# ------------------------------- wrapper ----------------------------------- #

def transformer_decoder_block(x, enc, params, *, num_heads, is_first=False,
                              causal_mask=True, seq_tile=256):
    B, T, D = x.shape
    _, S, _ = enc.shape
    H = num_heads
    assert D % H == 0, "d_model must be divisible by num_heads"
    hd = D // H
    tq = T if T <= seq_tile else seq_tile
    assert T % tq == 0, "T must be divisible by the sequence tile"
    NT = T // tq

    kernel = _make_kernel(T, S, D, H, tq, is_first=is_first, causal=causal_mask)

    bf16 = jnp.bfloat16
    scale = hd ** -0.5
    # hd^-0.5 folded into the q-projection weights (one-time, weight-side);
    # K/V projections fused into a single (D, 2D) matmul operand.
    wq1 = (params["wq1"] * scale).astype(bf16)
    wkv1 = jnp.concatenate([params["wk1"], params["wv1"]], axis=1).astype(bf16)
    wo1 = params["wo1"].astype(bf16)
    wq2 = (params["wq2"] * scale).astype(bf16)
    wkv2 = jnp.concatenate([params["wk2"], params["wv2"]], axis=1).astype(bf16)
    wo2 = params["wo2"].astype(bf16)
    w1 = params["w1"].astype(bf16)
    w2 = params["w2"].astype(bf16)

    weight_list = [
        params["ln1_g"], params["ln1_b"], wq1, wkv1, wo1,
        params["ln2_g"], params["ln2_b"], wq2, wkv2, wo2,
        params["ln3_g"], params["ln3_b"], w1, params["b1"], w2, params["b2"],
    ]

    def wspec(arr):
        shape = arr.shape
        # constant index_map + single buffer: one DMA, one VMEM copy, no re-fetch
        return pl.BlockSpec(shape, lambda b, t: (0,) * len(shape),
                            pipeline_mode=pl.Buffered(1))

    # x/enc blocks change only once per NT grid steps: single-buffer them when
    # NT > 1 (halves their VMEM); keep double-buffering when every step is new.
    seq_mode = pl.Buffered(1) if NT > 1 else pl.Buffered(2)

    in_specs = [
        pl.BlockSpec((pl.Squeezed(), T, D), lambda b, t: (b, 0, 0),
                     pipeline_mode=seq_mode),                       # x (full seq, f32)
        pl.BlockSpec((pl.Squeezed(), S, D), lambda b, t: (b, 0, 0),
                     pipeline_mode=seq_mode),                       # encoder out (bf16)
    ]
    inputs = [x, enc.astype(bf16)]   # x stays f32 (residual stream precision)
    in_specs += [wspec(w) for w in weight_list]
    inputs += weight_list

    # VMEM budget: ~3/4 of per-core capacity, capped at 110 MiB
    # (~96 MiB on v5e/v6e's 128 MiB, ~48 MiB on v7x's 64 MiB).
    try:
        vmem_cap = int(pltpu.get_tpu_info().vmem_capacity_bytes)
    except Exception:
        vmem_cap = 64 * 1024 * 1024
    vmem_limit = min((vmem_cap * 3) // 4, 110 * 1024 * 1024)

    out, attn = pl.pallas_call(
        kernel,
        out_shape=(
            jax.ShapeDtypeStruct((B, T, D), jnp.float32),
            # largest HBM write in the kernel -> bf16 halves writeback traffic
            jax.ShapeDtypeStruct((B, H, T, S), jnp.bfloat16),
        ),
        grid_spec=pltpu.PrefetchScalarGridSpec(
            num_scalar_prefetch=0,
            grid=(B, NT),
            in_specs=in_specs,
            out_specs=[
                pl.BlockSpec((pl.Squeezed(), tq, D), lambda b, t: (b, t, 0)),
                pl.BlockSpec((pl.Squeezed(), H, tq, S), lambda b, t: (b, 0, t, 0)),
            ],
            scratch_shapes=[
                pltpu.VMEM((H, T, hd), bf16),   # self-attn K cache
                pltpu.VMEM((H, T, hd), bf16),   # self-attn V cache
                pltpu.VMEM((H, S, hd), bf16),   # cross-attn K cache
                pltpu.VMEM((H, S, hd), bf16),   # cross-attn V cache
            ],
        ),
        compiler_params=pltpu.CompilerParams(
            dimension_semantics=("parallel", "arbitrary"),
            vmem_limit_bytes=vmem_limit),
    )(*inputs)
    return out, attn


# ------------------------- deterministic parameters ------------------------ #

def init_params(key, d_model):
    import math
    D = d_model
    ks = jax.random.split(key, 12)

    def xavier(k, fan_in, fan_out, gain=1.0):
        bound = gain * math.sqrt(6.0 / (fan_in + fan_out))
        return jax.random.uniform(k, (fan_in, fan_out), jnp.float32, -bound, bound)

    def kaiming(k, fan_in, fan_out):
        bound = math.sqrt(6.0 / fan_in)  # relu gain
        return jax.random.uniform(k, (fan_in, fan_out), jnp.float32, -bound, bound)

    return {
        "ln1_g": jnp.ones((1, D), jnp.float32), "ln1_b": jnp.zeros((1, D), jnp.float32),
        "ln2_g": jnp.ones((1, D), jnp.float32), "ln2_b": jnp.zeros((1, D), jnp.float32),
        "ln3_g": jnp.ones((1, D), jnp.float32), "ln3_b": jnp.zeros((1, D), jnp.float32),
        "wq1": xavier(ks[0], D, D), "wk1": xavier(ks[1], D, D),
        "wv1": xavier(ks[2], D, D), "wo1": xavier(ks[3], D, D),
        "wq2": xavier(ks[4], D, D), "wk2": xavier(ks[5], D, D),
        "wv2": xavier(ks[6], D, D), "wo2": xavier(ks[7], D, D),
        "w1": kaiming(ks[8], D, 4 * D), "b1": jnp.zeros((1, 4 * D), jnp.float32),
        "w2": xavier(ks[9], 4 * D, D), "b2": jnp.zeros((1, D), jnp.float32),
    }


# ------------------------------ pure-JAX reference ------------------------- #

def reference(x, enc, mask_add, params, *, num_heads, is_first=False,
              causal_mask=True, eps=1e-5):
    def ln(v, g, b):
        mu = jnp.mean(v, -1, keepdims=True)
        var = jnp.mean((v - mu) ** 2, -1, keepdims=True)
        return (v - mu) * jax.lax.rsqrt(var + eps) * g + b

    def mha(q, k, v, wq, wk, wv, wo, mask):
        B, T, D = q.shape
        S = k.shape[1]
        H = num_heads
        hd = D // H
        qp = (q @ wq).reshape(B, T, H, hd).transpose(0, 2, 1, 3) * hd ** -0.5
        kp = (k @ wk).reshape(B, S, H, hd).transpose(0, 2, 1, 3)
        vp = (v @ wv).reshape(B, S, H, hd).transpose(0, 2, 1, 3)
        s = jnp.einsum("bhtd,bhsd->bhts", qp, kp)
        if mask is not None:
            s = s + mask
        p = jax.nn.softmax(s, axis=-1)
        o = jnp.einsum("bhts,bhsd->bhtd", p, vp).transpose(0, 2, 1, 3).reshape(B, T, D)
        return o @ wo, p

    x0 = x
    xn = ln(x0, params["ln1_g"], params["ln1_b"])
    sa, _ = mha(xn, xn, xn, params["wq1"], params["wk1"], params["wv1"],
                params["wo1"], mask_add if causal_mask else None)
    resid = (xn + sa) if is_first else (x0 + sa)

    yn = ln(resid, params["ln2_g"], params["ln2_b"])
    ca, probs = mha(yn, enc, enc, params["wq2"], params["wk2"], params["wv2"],
                    params["wo2"], None)
    resid = resid + ca

    zn = ln(resid, params["ln3_g"], params["ln3_b"])
    ff = jnp.maximum(zn @ params["w1"] + params["b1"], 0.0) @ params["w2"] + params["b2"]
    return resid + ff, probs


# ---------------------------------- main ----------------------------------- #

if __name__ == "__main__":
    # lane-aligned small demo: D and hd and S multiples of 128, T multiple of 8
    B, T, S, D, H = 2, 8, 128, 256, 2
    max_len = 16

    key = jax.random.PRNGKey(0)
    kx, kenc, kp = jax.random.split(key, 3)
    x = jax.random.normal(kx, (B, T, D), jnp.float32)
    enc = jax.random.normal(kenc, (B, S, D), jnp.float32)
    params = init_params(kp, D)

    out, dec_mask = transformer_decoder_block(
        x, enc, params, num_heads=H, is_first=False, causal_mask=True)
    out = jax.block_until_ready(out)
    dec_mask = jax.block_until_ready(dec_mask)

    # reference uses the same causal convention as the module:
    # triu(ones, diagonal=1)[:T, :T] masked (additive large-negative here)
    triu = jnp.triu(jnp.ones((max_len, max_len), jnp.bool_), k=1)[:T, :T]
    mask_add = jnp.where(triu, jnp.float32(-1e30), jnp.float32(0.0))
    ref_out, ref_attn = reference(x, enc, mask_add, params, num_heads=H,
                                  is_first=False, causal_mask=True)

    assert out.shape == (B, T, D) and dec_mask.shape == (B, H, T, S)
    assert bool(jnp.all(jnp.isfinite(out)))
    dec_mask_f32 = dec_mask.astype(jnp.float32)
    assert bool(jnp.all(jnp.isfinite(dec_mask_f32)))
    # bf16 matmul inputs / bf16 attn probs (f32 accumulation) -> looser tolerances
    assert jnp.allclose(out, ref_out, rtol=5e-2, atol=5e-2), "output mismatch"
    assert jnp.allclose(dec_mask_f32, ref_attn, rtol=2e-2, atol=2e-2), "attn mismatch"

    print("KERNEL_OK")
</pallas_src>

<mosaic_0001>
module attributes {stable_mosaic.version = 11 : i64} {
  func.func @kernel(%arg0: i32, %arg1: i32, %arg2: memref<1x8x256xf32, #tpu.memory_space<vmem>>, %arg3: memref<1x128x256xbf16, #tpu.memory_space<vmem>>, %arg4: memref<1x256xf32, #tpu.memory_space<vmem>>, %arg5: memref<1x256xf32, #tpu.memory_space<vmem>>, %arg6: memref<256x256xbf16, #tpu.memory_space<vmem>>, %arg7: memref<256x512xbf16, #tpu.memory_space<vmem>>, %arg8: memref<256x256xbf16, #tpu.memory_space<vmem>>, %arg9: memref<1x256xf32, #tpu.memory_space<vmem>>, %arg10: memref<1x256xf32, #tpu.memory_space<vmem>>, %arg11: memref<256x256xbf16, #tpu.memory_space<vmem>>, %arg12: memref<256x512xbf16, #tpu.memory_space<vmem>>, %arg13: memref<256x256xbf16, #tpu.memory_space<vmem>>, %arg14: memref<1x256xf32, #tpu.memory_space<vmem>>, %arg15: memref<1x256xf32, #tpu.memory_space<vmem>>, %arg16: memref<256x1024xbf16, #tpu.memory_space<vmem>>, %arg17: memref<1x1024xf32, #tpu.memory_space<vmem>>, %arg18: memref<1024x256xbf16, #tpu.memory_space<vmem>>, %arg19: memref<1x256xf32, #tpu.memory_space<vmem>>, %arg20: memref<1x8x256xf32, #tpu.memory_space<vmem>>, %arg21: memref<1x2x8x128xbf16, #tpu.memory_space<vmem>>, %arg22: memref<2x8x128xbf16, #tpu.memory_space<vmem>>, %arg23: memref<2x8x128xbf16, #tpu.memory_space<vmem>>, %arg24: memref<2x128x128xbf16, #tpu.memory_space<vmem>>, %arg25: memref<2x128x128xbf16, #tpu.memory_space<vmem>>) attributes {dimension_semantics = [#tpu.dimension_semantics<parallel>, #tpu.dimension_semantics<arbitrary>], iteration_bounds = array<i64: 2, 1>, scalar_prefetch = 0 : i64, scratch_operands = 4 : i64, tpu.core_type = #tpu.core_type<tc>, window_params = [{pipeline_mode = #tpu.pipeline_mode<double_buffered>, transform_indices = @transform_0, window_bounds = array<i64: 1, 8, 256>}, {pipeline_mode = #tpu.pipeline_mode<double_buffered>, transform_indices = @transform_1, window_bounds = array<i64: 1, 128, 256>}, {pipeline_mode = #tpu.pipeline_mode<synchronous>, transform_indices = @transform_2, window_bounds = array<i64: 1, 256>}, {pipeline_mode = #tpu.pipeline_mode<synchronous>, transform_indices = @transform_3, window_bounds = array<i64: 1, 256>}, {pipeline_mode = #tpu.pipeline_mode<synchronous>, transform_indices = @transform_4, window_bounds = array<i64: 256, 256>}, {pipeline_mode = #tpu.pipeline_mode<synchronous>, transform_indices = @transform_5, window_bounds = array<i64: 256, 512>}, {pipeline_mode = #tpu.pipeline_mode<synchronous>, transform_indices = @transform_6, window_bounds = array<i64: 256, 256>}, {pipeline_mode = #tpu.pipeline_mode<synchronous>, transform_indices = @transform_7, window_bounds = array<i64: 1, 256>}, {pipeline_mode = #tpu.pipeline_mode<synchronous>, transform_indices = @transform_8, window_bounds = array<i64: 1, 256>}, {pipeline_mode = #tpu.pipeline_mode<synchronous>, transform_indices = @transform_9, window_bounds = array<i64: 256, 256>}, {pipeline_mode = #tpu.pipeline_mode<synchronous>, transform_indices = @transform_10, window_bounds = array<i64: 256, 512>}, {pipeline_mode = #tpu.pipeline_mode<synchronous>, transform_indices = @transform_11, window_bounds = array<i64: 256, 256>}, {pipeline_mode = #tpu.pipeline_mode<synchronous>, transform_indices = @transform_12, window_bounds = array<i64: 1, 256>}, {pipeline_mode = #tpu.pipeline_mode<synchronous>, transform_indices = @transform_13, window_bounds = array<i64: 1, 256>}, {pipeline_mode = #tpu.pipeline_mode<synchronous>, transform_indices = @transform_14, window_bounds = array<i64: 256, 1024>}, {pipeline_mode = #tpu.pipeline_mode<synchronous>, transform_indices = @transform_15, window_bounds = array<i64: 1, 1024>}, {pipeline_mode = #tpu.pipeline_mode<synchronous>, transform_indices = @transform_16, window_bounds = array<i64: 1024, 256>}, {pipeline_mode = #tpu.pipeline_mode<synchronous>, transform_indices = @transform_17, window_bounds = array<i64: 1, 256>}, {transform_indices = @transform_18, window_bounds = array<i64: 1, 8, 256>}, {transform_indices = @transform_19, window_bounds = array<i64: 1, 2, 8, 128>}]} {
    %c0_i32 = arith.constant 0 : i32
    %0 = arith.cmpi eq, %arg1, %c0_i32 : i32
    %1 = arith.extui %0 : i1 to i32
    %c0_i32_0 = arith.constant 0 : i32
    %2 = arith.cmpi ne, %1, %c0_i32_0 : i32
    scf.if %2 {
      %c0_79 = arith.constant 0 : index
      %c0_80 = arith.constant 0 : index
      %c0_81 = arith.constant 0 : index
      %169 = vector.load %arg2[%c0_79, %c0_80, %c0_81] : memref<1x8x256xf32, #tpu.memory_space<vmem>>, vector<1x8x256xf32>
      %170 = vector.shape_cast %169 : vector<1x8x256xf32> to vector<8x256xf32>
      %c0_82 = arith.constant 0 : index
      %c0_83 = arith.constant 0 : index
      %171 = vector.load %arg4[%c0_82, %c0_83] : memref<1x256xf32, #tpu.memory_space<vmem>>, vector<1x256xf32>
      %c0_84 = arith.constant 0 : index
      %c0_85 = arith.constant 0 : index
      %172 = vector.load %arg5[%c0_84, %c0_85] : memref<1x256xf32, #tpu.memory_space<vmem>>, vector<1x256xf32>
      %cst_86 = arith.constant dense<0.000000e+00> : vector<8xf32>
      %173 = vector.multi_reduction <add>, %170, %cst_86 [1] : vector<8x256xf32> to vector<8xf32>
      %174 = vector.shape_cast %173 : vector<8xf32> to vector<8x1xf32>
      %cst_87 = arith.constant 2.560000e+02 : f32
      %175 = vector.broadcast %cst_87 : f32 to vector<8x1xf32>
      %176 = arith.divf %174, %175 : vector<8x1xf32>
      %177 = vector.broadcast %176 : vector<8x1xf32> to vector<8x256xf32>
      %178 = arith.subf %170, %177 : vector<8x256xf32>
      %179 = arith.mulf %178, %178 : vector<8x256xf32>
      %cst_88 = arith.constant dense<0.000000e+00> : vector<8xf32>
      %180 = vector.multi_reduction <add>, %179, %cst_88 [1] : vector<8x256xf32> to vector<8xf32>
      %181 = vector.shape_cast %180 : vector<8xf32> to vector<8x1xf32>
      %cst_89 = arith.constant 2.560000e+02 : f32
      %182 = vector.broadcast %cst_89 : f32 to vector<8x1xf32>
      %183 = arith.divf %181, %182 : vector<8x1xf32>
      %cst_90 = arith.constant 9.99999974E-6 : f32
      %184 = vector.broadcast %cst_90 : f32 to vector<8x1xf32>
      %185 = arith.addf %183, %184 : vector<8x1xf32>
      %186 = math.rsqrt %185 : vector<8x1xf32>
      %187 = vector.broadcast %186 : vector<8x1xf32> to vector<8x256xf32>
      %188 = arith.mulf %178, %187 : vector<8x256xf32>
      %189 = vector.broadcast %171 : vector<1x256xf32> to vector<8x256xf32>
      %190 = arith.mulf %188, %189 : vector<8x256xf32>
      %191 = vector.broadcast %172 : vector<1x256xf32> to vector<8x256xf32>
      %192 = arith.addf %190, %191 : vector<8x256xf32>
      %193 = arith.truncf %192 : vector<8x256xf32> to vector<8x256xbf16>
      %c0_91 = arith.constant 0 : index
      %c0_92 = arith.constant 0 : index
      %194 = vector.load %arg7[%c0_91, %c0_92] : memref<256x512xbf16, #tpu.memory_space<vmem>>, vector<256x512xbf16>
      %cst_93 = arith.constant dense<0.000000e+00> : vector<8x512xf32>
      %195 = tpu.matmul %193, %194, %cst_93 {dimension_numbers = #tpu.dot_dimension_numbers<[1], [0], [0], [1], [0, 0, 1, 1], [], []>} : vector<8x256xbf16>, vector<256x512xbf16>, vector<8x512xf32> -> vector<8x512xf32>
      %c0_94 = arith.constant 0 : index
      %c0_95 = arith.constant 0 : index
      %c0_96 = arith.constant 0 : index
      %196 = vector.load %arg3[%c0_94, %c0_95, %c0_96] : memref<1x128x256xbf16, #tpu.memory_space<vmem>>, vector<1x128x256xbf16>
      %197 = vector.shape_cast %196 : vector<1x128x256xbf16> to vector<128x256xbf16>
      %c0_97 = arith.constant 0 : index
      %c0_98 = arith.constant 0 : index
      %198 = vector.load %arg12[%c0_97, %c0_98] : memref<256x512xbf16, #tpu.memory_space<vmem>>, vector<256x512xbf16>
      %cst_99 = arith.constant dense<0.000000e+00> : vector<128x512xf32>
      %199 = tpu.matmul %197, %198, %cst_99 {dimension_numbers = #tpu.dot_dimension_numbers<[1], [0], [0], [1], [0, 0, 1, 1], [], []>} : vector<128x256xbf16>, vector<256x512xbf16>, vector<128x512xf32> -> vector<128x512xf32>
      %200 = vector.extract_strided_slice %195 {offsets = [0, 0], sizes = [8, 128], strides = [1, 1]} : vector<8x512xf32> to vector<8x128xf32>
      %201 = arith.truncf %200 : vector<8x128xf32> to vector<8x128xbf16>
      %c0_100 = arith.constant 0 : index
      %c0_101 = arith.constant 0 : index
      %c0_102 = arith.constant 0 : index
      %202 = vector.load %arg22[%c0_100, %c0_101, %c0_102] : memref<2x8x128xbf16, #tpu.memory_space<vmem>>, vector<1x8x128xbf16>
      %203 = vector.shape_cast %202 : vector<1x8x128xbf16> to vector<8x128xbf16>
      %204 = vector.shape_cast %201 : vector<8x128xbf16> to vector<1x8x128xbf16>
      tpu.vector_store %arg22[%c0_100, %c0_101, %c0_102], %204 {strides = array<i32>} : memref<2x8x128xbf16, #tpu.memory_space<vmem>>, vector<1x8x128xbf16>,
      %205 = vector.extract_strided_slice %195 {offsets = [0, 256], sizes = [8, 128], strides = [1, 1]} : vector<8x512xf32> to vector<8x128xf32>
      %206 = arith.truncf %205 : vector<8x128xf32> to vector<8x128xbf16>
      %c0_103 = arith.constant 0 : index
      %c0_104 = arith.constant 0 : index
      %c0_105 = arith.constant 0 : index
      %207 = vector.load %arg23[%c0_103, %c0_104, %c0_105] : memref<2x8x128xbf16, #tpu.memory_space<vmem>>, vector<1x8x128xbf16>
      %208 = vector.shape_cast %207 : vector<1x8x128xbf16> to vector<8x128xbf16>
      %209 = vector.shape_cast %206 : vector<8x128xbf16> to vector<1x8x128xbf16>
      tpu.vector_store %arg23[%c0_103, %c0_104, %c0_105], %209 {strides = array<i32>} : memref<2x8x128xbf16, #tpu.memory_space<vmem>>, vector<1x8x128xbf16>,
      %210 = vector.extract_strided_slice %199 {offsets = [0, 0], sizes = [128, 128], strides = [1, 1]} : vector<128x512xf32> to vector<128x128xf32>
      %211 = arith.truncf %210 : vector<128x128xf32> to vector<128x128xbf16>
      %c0_106 = arith.constant 0 : index
      %c0_107 = arith.constant 0 : index
      %c0_108 = arith.constant 0 : index
      %212 = vector.load %arg24[%c0_106, %c0_107, %c0_108] : memref<2x128x128xbf16, #tpu.memory_space<vmem>>, vector<1x128x128xbf16>
      %213 = vector.shape_cast %212 : vector<1x128x128xbf16> to vector<128x128xbf16>
      %214 = vector.shape_cast %211 : vector<128x128xbf16> to vector<1x128x128xbf16>
      tpu.vector_store %arg24[%c0_106, %c0_107, %c0_108], %214 {strides = array<i32>} : memref<2x128x128xbf16, #tpu.memory_space<vmem>>, vector<1x128x128xbf16>,
      %215 = vector.extract_strided_slice %199 {offsets = [0, 256], sizes = [128, 128], strides = [1, 1]} : vector<128x512xf32> to vector<128x128xf32>
      %216 = arith.truncf %215 : vector<128x128xf32> to vector<128x128xbf16>
      %c0_109 = arith.constant 0 : index
      %c0_110 = arith.constant 0 : index
      %c0_111 = arith.constant 0 : index
      %217 = vector.load %arg25[%c0_109, %c0_110, %c0_111] : memref<2x128x128xbf16, #tpu.memory_space<vmem>>, vector<1x128x128xbf16>
      %218 = vector.shape_cast %217 : vector<1x128x128xbf16> to vector<128x128xbf16>
      %219 = vector.shape_cast %216 : vector<128x128xbf16> to vector<1x128x128xbf16>
      tpu.vector_store %arg25[%c0_109, %c0_110, %c0_111], %219 {strides = array<i32>} : memref<2x128x128xbf16, #tpu.memory_space<vmem>>, vector<1x128x128xbf16>,
      %220 = vector.extract_strided_slice %195 {offsets = [0, 128], sizes = [8, 128], strides = [1, 1]} : vector<8x512xf32> to vector<8x128xf32>
      %221 = arith.truncf %220 : vector<8x128xf32> to vector<8x128xbf16>
      %c1 = arith.constant 1 : index
      %c0_112 = arith.constant 0 : index
      %c0_113 = arith.constant 0 : index
      %222 = vector.load %arg22[%c1, %c0_112, %c0_113] : memref<2x8x128xbf16, #tpu.memory_space<vmem>>, vector<1x8x128xbf16>
      %223 = vector.shape_cast %222 : vector<1x8x128xbf16> to vector<8x128xbf16>
      %224 = vector.shape_cast %221 : vector<8x128xbf16> to vector<1x8x128xbf16>
      tpu.vector_store %arg22[%c1, %c0_112, %c0_113], %224 {strides = array<i32>} : memref<2x8x128xbf16, #tpu.memory_space<vmem>>, vector<1x8x128xbf16>,
      %225 = vector.extract_strided_slice %195 {offsets = [0, 384], sizes = [8, 128], strides = [1, 1]} : vector<8x512xf32> to vector<8x128xf32>
      %226 = arith.truncf %225 : vector<8x128xf32> to vector<8x128xbf16>
      %c1_114 = arith.constant 1 : index
      %c0_115 = arith.constant 0 : index
      %c0_116 = arith.constant 0 : index
      %227 = vector.load %arg23[%c1_114, %c0_115, %c0_116] : memref<2x8x128xbf16, #tpu.memory_space<vmem>>, vector<1x8x128xbf16>
      %228 = vector.shape_cast %227 : vector<1x8x128xbf16> to vector<8x128xbf16>
      %229 = vector.shape_cast %226 : vector<8x128xbf16> to vector<1x8x128xbf16>
      tpu.vector_store %arg23[%c1_114, %c0_115, %c0_116], %229 {strides = array<i32>} : memref<2x8x128xbf16, #tpu.memory_space<vmem>>, vector<1x8x128xbf16>,
      %230 = vector.extract_strided_slice %199 {offsets = [0, 128], sizes = [128, 128], strides = [1, 1]} : vector<128x512xf32> to vector<128x128xf32>
      %231 = arith.truncf %230 : vector<128x128xf32> to vector<128x128xbf16>
      %c1_117 = arith.constant 1 : index
      %c0_118 = arith.constant 0 : index
      %c0_119 = arith.constant 0 : index
      %232 = vector.load %arg24[%c1_117, %c0_118, %c0_119] : memref<2x128x128xbf16, #tpu.memory_space<vmem>>, vector<1x128x128xbf16>
      %233 = vector.shape_cast %232 : vector<1x128x128xbf16> to vector<128x128xbf16>
      %234 = vector.shape_cast %231 : vector<128x128xbf16> to vector<1x128x128xbf16>
      tpu.vector_store %arg24[%c1_117, %c0_118, %c0_119], %234 {strides = array<i32>} : memref<2x128x128xbf16, #tpu.memory_space<vmem>>, vector<1x128x128xbf16>,
      %235 = vector.extract_strided_slice %199 {offsets = [0, 384], sizes = [128, 128], strides = [1, 1]} : vector<128x512xf32> to vector<128x128xf32>
      %236 = arith.truncf %235 : vector<128x128xf32> to vector<128x128xbf16>
      %c1_120 = arith.constant 1 : index
      %c0_121 = arith.constant 0 : index
      %c0_122 = arith.constant 0 : index
      %237 = vector.load %arg25[%c1_120, %c0_121, %c0_122] : memref<2x128x128xbf16, #tpu.memory_space<vmem>>, vector<1x128x128xbf16>
      %238 = vector.shape_cast %237 : vector<1x128x128xbf16> to vector<128x128xbf16>
      %239 = vector.shape_cast %236 : vector<128x128xbf16> to vector<1x128x128xbf16>
      tpu.vector_store %arg25[%c1_120, %c0_121, %c0_122], %239 {strides = array<i32>} : memref<2x128x128xbf16, #tpu.memory_space<vmem>>, vector<1x128x128xbf16>,
    } else {
    }
    %c8_i32 = arith.constant 8 : i32
    %3 = arith.muli %arg1, %c8_i32 : i32
    %4 = tpu.assume_multiple %3, 8 : i32
    %c0 = arith.constant 0 : index
    %5 = arith.index_cast %4 : i32 to index
    %c0_1 = arith.constant 0 : index
    %6 = vector.load %arg2[%c0, %5, %c0_1] : memref<1x8x256xf32, #tpu.memory_space<vmem>>, vector<1x8x256xf32>
    %7 = vector.shape_cast %6 : vector<1x8x256xf32> to vector<8x256xf32>
    %c0_2 = arith.constant 0 : index
    %c0_3 = arith.constant 0 : index
    %8 = vector.load %arg4[%c0_2, %c0_3] : memref<1x256xf32, #tpu.memory_space<vmem>>, vector<1x256xf32>
    %c0_4 = arith.constant 0 : index
    %c0_5 = arith.constant 0 : index
    %9 = vector.load %arg5[%c0_4, %c0_5] : memref<1x256xf32, #tpu.memory_space<vmem>>, vector<1x256xf32>
    %cst = arith.constant dense<0.000000e+00> : vector<8xf32>
    %10 = vector.multi_reduction <add>, %7, %cst [1] : vector<8x256xf32> to vector<8xf32>
    %11 = vector.shape_cast %10 : vector<8xf32> to vector<8x1xf32>
    %cst_6 = arith.constant 2.560000e+02 : f32
    %12 = vector.broadcast %cst_6 : f32 to vector<8x1xf32>
    %13 = arith.divf %11, %12 : vector<8x1xf32>
    %14 = vector.broadcast %13 : vector<8x1xf32> to vector<8x256xf32>
    %15 = arith.subf %7, %14 : vector<8x256xf32>
    %16 = arith.mulf %15, %15 : vector<8x256xf32>
    %cst_7 = arith.constant dense<0.000000e+00> : vector<8xf32>
    %17 = vector.multi_reduction <add>, %16, %cst_7 [1] : vector<8x256xf32> to vector<8xf32>
    %18 = vector.shape_cast %17 : vector<8xf32> to vector<8x1xf32>
    %cst_8 = arith.constant 2.560000e+02 : f32
    %19 = vector.broadcast %cst_8 : f32 to vector<8x1xf32>
    %20 = arith.divf %18, %19 : vector<8x1xf32>
    %cst_9 = arith.constant 9.99999974E-6 : f32
    %21 = vector.broadcast %cst_9 : f32 to vector<8x1xf32>
    %22 = arith.addf %20, %21 : vector<8x1xf32>
    %23 = math.rsqrt %22 : vector<8x1xf32>
    %24 = vector.broadcast %23 : vector<8x1xf32> to vector<8x256xf32>
    %25 = arith.mulf %15, %24 : vector<8x256xf32>
    %26 = vector.broadcast %8 : vector<1x256xf32> to vector<8x256xf32>
    %27 = arith.mulf %25, %26 : vector<8x256xf32>
    %28 = vector.broadcast %9 : vector<1x256xf32> to vector<8x256xf32>
    %29 = arith.addf %27, %28 : vector<8x256xf32>
    %30 = arith.truncf %29 : vector<8x256xf32> to vector<8x256xbf16>
    %c0_10 = arith.constant 0 : index
    %c0_11 = arith.constant 0 : index
    %31 = vector.load %arg6[%c0_10, %c0_11] : memref<256x256xbf16, #tpu.memory_space<vmem>>, vector<256x256xbf16>
    %cst_12 = arith.constant dense<0.000000e+00> : vector<8x256xf32>
    %32 = tpu.matmul %30, %31, %cst_12 {dimension_numbers = #tpu.dot_dimension_numbers<[1], [0], [0], [1], [0, 0, 1, 1], [], []>} : vector<8x256xbf16>, vector<256x256xbf16>, vector<8x256xf32> -> vector<8x256xf32>
    %33 = tpu.iota {dimensions = array<i32: 1>} : vector<2x8x8xi32>
    %34 = vector.broadcast %4 : i32 to vector<2x8x8xi32>
    %35 = arith.addi %33, %34 : vector<2x8x8xi32>
    %36 = tpu.iota {dimensions = array<i32: 2>} : vector<2x8x8xi32>
    %37 = arith.cmpi sgt, %36, %35 : vector<2x8x8xi32>
    %c0_13 = arith.constant 0 : index
    %c0_14 = arith.constant 0 : index
    %c0_15 = arith.constant 0 : index
    %38 = vector.load %arg22[%c0_13, %c0_14, %c0_15] : memref<2x8x128xbf16, #tpu.memory_space<vmem>>, vector<2x8x128xbf16>
    %c0_16 = arith.constant 0 : index
    %c0_17 = arith.constant 0 : index
    %c0_18 = arith.constant 0 : index
    %39 = vector.load %arg23[%c0_16, %c0_17, %c0_18] : memref<2x8x128xbf16, #tpu.memory_space<vmem>>, vector<2x8x128xbf16>
    %c0_19 = arith.constant 0 : index
    %c0_20 = arith.constant 0 : index
    %40 = vector.load %arg8[%c0_19, %c0_20] : memref<256x256xbf16, #tpu.memory_space<vmem>>, vector<256x256xbf16>
    %41 = vector.extract_strided_slice %32 {offsets = [0, 0], sizes = [8, 128], strides = [1, 1]} : vector<8x256xf32> to vector<8x128xf32>
    %42 = vector.extract_strided_slice %32 {offsets = [0, 128], sizes = [8, 128], strides = [1, 1]} : vector<8x256xf32> to vector<8x128xf32>
    %43 = vector.shape_cast %41 : vector<8x128xf32> to vector<1x8x128xf32>
    %44 = vector.shape_cast %42 : vector<8x128xf32> to vector<1x8x128xf32>
    %45 = tpu.concatenate %43, %44 in 0 : vector<1x8x128xf32>, vector<1x8x128xf32> -> vector<2x8x128xf32>
    %46 = arith.truncf %45 : vector<2x8x128xf32> to vector<2x8x128xbf16>
    %cst_21 = arith.constant dense<0.000000e+00> : vector<2x8x8xf32>
    %47 = tpu.matmul %46, %38, %cst_21 {dimension_numbers = #tpu.dot_dimension_numbers<[2], [2], [1], [1], [0, 0, 0, 1, 1, 1], [0], [0]>} : vector<2x8x128xbf16>, vector<2x8x128xbf16>, vector<2x8x8xf32> -> vector<2x8x8xf32>
    %cst_22 = arith.constant -1.000000e+30 : f32
    %48 = vector.broadcast %cst_22 : f32 to vector<2x8x8xf32>
    %49 = arith.select %37, %48, %47 : vector<2x8x8xi1>, vector<2x8x8xf32>
    %cst_23 = arith.constant dense<0xFF800000> : vector<2x8xf32>
    %50 = vector.multi_reduction <maximumf>, %49, %cst_23 [2] : vector<2x8x8xf32> to vector<2x8xf32>
    %51 = vector.shape_cast %50 : vector<2x8xf32> to vector<2x8x1xf32>
    %52 = vector.broadcast %51 : vector<2x8x1xf32> to vector<2x8x8xf32>
    %53 = arith.subf %49, %52 : vector<2x8x8xf32>
    %54 = math.exp %53 : vector<2x8x8xf32>
    %cst_24 = arith.constant dense<0.000000e+00> : vector<2x8xf32>
    %55 = vector.multi_reduction <add>, %54, %cst_24 [2] : vector<2x8x8xf32> to vector<2x8xf32>
    %56 = vector.shape_cast %55 : vector<2x8xf32> to vector<2x8x1xf32>
    %57 = tpu.reciprocal %56 {approx = true} : vector<2x8x1xf32> -> vector<2x8x1xf32>
    %58 = vector.broadcast %57 : vector<2x8x1xf32> to vector<2x8x8xf32>
    %59 = arith.mulf %54, %58 : vector<2x8x8xf32>
    %60 = arith.truncf %59 : vector<2x8x8xf32> to vector<2x8x8xbf16>
    %cst_25 = arith.constant dense<0.000000e+00> : vector<2x8x128xf32>
    %61 = tpu.matmul %60, %39, %cst_25 {dimension_numbers = #tpu.dot_dimension_numbers<[2], [1], [1], [2], [0, 0, 0, 1, 1, 2], [0], [0]>} : vector<2x8x8xbf16>, vector<2x8x128xbf16>, vector<2x8x128xf32> -> vector<2x8x128xf32>
    %62 = vector.extract_strided_slice %61 {offsets = [0, 0, 0], sizes = [1, 8, 128], strides = [1, 1, 1]} : vector<2x8x128xf32> to vector<1x8x128xf32>
    %63 = vector.shape_cast %62 : vector<1x8x128xf32> to vector<8x128xf32>
    %64 = vector.extract_strided_slice %61 {offsets = [1, 0, 0], sizes = [1, 8, 128], strides = [1, 1, 1]} : vector<2x8x128xf32> to vector<1x8x128xf32>
    %65 = vector.shape_cast %64 : vector<1x8x128xf32> to vector<8x128xf32>
    %66 = tpu.concatenate %63, %65 in 1 : vector<8x128xf32>, vector<8x128xf32> -> vector<8x256xf32>
    %67 = arith.truncf %66 : vector<8x256xf32> to vector<8x256xbf16>
    %cst_26 = arith.constant dense<0.000000e+00> : vector<8x256xf32>
    %68 = tpu.matmul %67, %40, %cst_26 {dimension_numbers = #tpu.dot_dimension_numbers<[1], [0], [0], [1], [0, 0, 1, 1], [], []>} : vector<8x256xbf16>, vector<256x256xbf16>, vector<8x256xf32> -> vector<8x256xf32>
    %69 = arith.addf %7, %68 : vector<8x256xf32>
    %c0_27 = arith.constant 0 : index
    %c0_28 = arith.constant 0 : index
    %70 = vector.load %arg9[%c0_27, %c0_28] : memref<1x256xf32, #tpu.memory_space<vmem>>, vector<1x256xf32>
    %c0_29 = arith.constant 0 : index
    %c0_30 = arith.constant 0 : index
    %71 = vector.load %arg10[%c0_29, %c0_30] : memref<1x256xf32, #tpu.memory_space<vmem>>, vector<1x256xf32>
    %cst_31 = arith.constant dense<0.000000e+00> : vector<8xf32>
    %72 = vector.multi_reduction <add>, %69, %cst_31 [1] : vector<8x256xf32> to vector<8xf32>
    %73 = vector.shape_cast %72 : vector<8xf32> to vector<8x1xf32>
    %cst_32 = arith.constant 2.560000e+02 : f32
    %74 = vector.broadcast %cst_32 : f32 to vector<8x1xf32>
    %75 = arith.divf %73, %74 : vector<8x1xf32>
    %76 = vector.broadcast %75 : vector<8x1xf32> to vector<8x256xf32>
    %77 = arith.subf %69, %76 : vector<8x256xf32>
    %78 = arith.mulf %77, %77 : vector<8x256xf32>
    %cst_33 = arith.constant dense<0.000000e+00> : vector<8xf32>
    %79 = vector.multi_reduction <add>, %78, %cst_33 [1] : vector<8x256xf32> to vector<8xf32>
    %80 = vector.shape_cast %79 : vector<8xf32> to vector<8x1xf32>
    %cst_34 = arith.constant 2.560000e+02 : f32
    %81 = vector.broadcast %cst_34 : f32 to vector<8x1xf32>
    %82 = arith.divf %80, %81 : vector<8x1xf32>
    %cst_35 = arith.constant 9.99999974E-6 : f32
    %83 = vector.broadcast %cst_35 : f32 to vector<8x1xf32>
    %84 = arith.addf %82, %83 : vector<8x1xf32>
    %85 = math.rsqrt %84 : vector<8x1xf32>
    %86 = vector.broadcast %85 : vector<8x1xf32> to vector<8x256xf32>
    %87 = arith.mulf %77, %86 : vector<8x256xf32>
    %88 = vector.broadcast %70 : vector<1x256xf32> to vector<8x256xf32>
    %89 = arith.mulf %87, %88 : vector<8x256xf32>
    %90 = vector.broadcast %71 : vector<1x256xf32> to vector<8x256xf32>
    %91 = arith.addf %89, %90 : vector<8x256xf32>
    %92 = arith.truncf %91 : vector<8x256xf32> to vector<8x256xbf16>
    %c0_36 = arith.constant 0 : index
    %c0_37 = arith.constant 0 : index
    %93 = vector.load %arg11[%c0_36, %c0_37] : memref<256x256xbf16, #tpu.memory_space<vmem>>, vector<256x256xbf16>
    %cst_38 = arith.constant dense<0.000000e+00> : vector<8x256xf32>
    %94 = tpu.matmul %92, %93, %cst_38 {dimension_numbers = #tpu.dot_dimension_numbers<[1], [0], [0], [1], [0, 0, 1, 1], [], []>} : vector<8x256xbf16>, vector<256x256xbf16>, vector<8x256xf32> -> vector<8x256xf32>
    %c0_39 = arith.constant 0 : index
    %c0_40 = arith.constant 0 : index
    %c0_41 = arith.constant 0 : index
    %95 = vector.load %arg24[%c0_39, %c0_40, %c0_41] : memref<2x128x128xbf16, #tpu.memory_space<vmem>>, vector<2x128x128xbf16>
    %c0_42 = arith.constant 0 : index
    %c0_43 = arith.constant 0 : index
    %c0_44 = arith.constant 0 : index
    %96 = vector.load %arg25[%c0_42, %c0_43, %c0_44] : memref<2x128x128xbf16, #tpu.memory_space<vmem>>, vector<2x128x128xbf16>
    %c0_45 = arith.constant 0 : index
    %c0_46 = arith.constant 0 : index
    %97 = vector.load %arg13[%c0_45, %c0_46] : memref<256x256xbf16, #tpu.memory_space<vmem>>, vector<256x256xbf16>
    %98 = vector.extract_strided_slice %94 {offsets = [0, 0], sizes = [8, 128], strides = [1, 1]} : vector<8x256xf32> to vector<8x128xf32>
    %99 = vector.extract_strided_slice %94 {offsets = [0, 128], sizes = [8, 128], strides = [1, 1]} : vector<8x256xf32> to vector<8x128xf32>
    %100 = vector.shape_cast %98 : vector<8x128xf32> to vector<1x8x128xf32>
    %101 = vector.shape_cast %99 : vector<8x128xf32> to vector<1x8x128xf32>
    %102 = tpu.concatenate %100, %101 in 0 : vector<1x8x128xf32>, vector<1x8x128xf32> -> vector<2x8x128xf32>
    %103 = arith.truncf %102 : vector<2x8x128xf32> to vector<2x8x128xbf16>
    %cst_47 = arith.constant dense<0.000000e+00> : vector<2x8x128xf32>
    %104 = tpu.matmul %103, %95, %cst_47 {dimension_numbers = #tpu.dot_dimension_numbers<[2], [2], [1], [1], [0, 0, 0, 1, 1, 1], [0], [0]>} : vector<2x8x128xbf16>, vector<2x128x128xbf16>, vector<2x8x128xf32> -> vector<2x8x128xf32>
    %cst_48 = arith.constant dense<0xFF800000> : vector<2x8xf32>
    %105 = vector.multi_reduction <maximumf>, %104, %cst_48 [2] : vector<2x8x128xf32> to vector<2x8xf32>
    %106 = vector.shape_cast %105 : vector<2x8xf32> to vector<2x8x1xf32>
    %107 = vector.broadcast %106 : vector<2x8x1xf32> to vector<2x8x128xf32>
    %108 = arith.subf %104, %107 : vector<2x8x128xf32>
    %109 = math.exp %108 : vector<2x8x128xf32>
    %cst_49 = arith.constant dense<0.000000e+00> : vector<2x8xf32>
    %110 = vector.multi_reduction <add>, %109, %cst_49 [2] : vector<2x8x128xf32> to vector<2x8xf32>
    %111 = vector.shape_cast %110 : vector<2x8xf32> to vector<2x8x1xf32>
    %112 = tpu.reciprocal %111 {approx = true} : vector<2x8x1xf32> -> vector<2x8x1xf32>
    %113 = vector.broadcast %112 : vector<2x8x1xf32> to vector<2x8x128xf32>
    %114 = arith.mulf %109, %113 : vector<2x8x128xf32>
    %115 = arith.truncf %114 : vector<2x8x128xf32> to vector<2x8x128xbf16>
    %cst_50 = arith.constant dense<0.000000e+00> : vector<2x8x128xf32>
    %116 = tpu.matmul %115, %96, %cst_50 {dimension_numbers = #tpu.dot_dimension_numbers<[2], [1], [1], [2], [0, 0, 0, 1, 1, 2], [0], [0]>} : vector<2x8x128xbf16>, vector<2x128x128xbf16>, vector<2x8x128xf32> -> vector<2x8x128xf32>
    %117 = vector.extract_strided_slice %116 {offsets = [0, 0, 0], sizes = [1, 8, 128], strides = [1, 1, 1]} : vector<2x8x128xf32> to vector<1x8x128xf32>
    %118 = vector.shape_cast %117 : vector<1x8x128xf32> to vector<8x128xf32>
    %119 = vector.extract_strided_slice %116 {offsets = [1, 0, 0], sizes = [1, 8, 128], strides = [1, 1, 1]} : vector<2x8x128xf32> to vector<1x8x128xf32>
    %120 = vector.shape_cast %119 : vector<1x8x128xf32> to vector<8x128xf32>
    %121 = tpu.concatenate %118, %120 in 1 : vector<8x128xf32>, vector<8x128xf32> -> vector<8x256xf32>
    %122 = arith.truncf %121 : vector<8x256xf32> to vector<8x256xbf16>
    %cst_51 = arith.constant dense<0.000000e+00> : vector<8x256xf32>
    %123 = tpu.matmul %122, %97, %cst_51 {dimension_numbers = #tpu.dot_dimension_numbers<[1], [0], [0], [1], [0, 0, 1, 1], [], []>} : vector<8x256xbf16>, vector<256x256xbf16>, vector<8x256xf32> -> vector<8x256xf32>
    %124 = arith.truncf %114 : vector<2x8x128xf32> to vector<2x8x128xbf16>
    %c0_52 = arith.constant 0 : index
    %c0_53 = arith.constant 0 : index
    %c0_54 = arith.constant 0 : index
    %c0_55 = arith.constant 0 : index
    %125 = vector.load %arg21[%c0_52, %c0_53, %c0_54, %c0_55] : memref<1x2x8x128xbf16, #tpu.memory_space<vmem>>, vector<1x2x8x128xbf16>
    %126 = vector.shape_cast %125 : vector<1x2x8x128xbf16> to vector<2x8x128xbf16>
    %127 = vector.shape_cast %124 : vector<2x8x128xbf16> to vector<1x2x8x128xbf16>
    tpu.vector_store %arg21[%c0_52, %c0_53, %c0_54, %c0_55], %127 {strides = array<i32>} : memref<1x2x8x128xbf16, #tpu.memory_space<vmem>>, vector<1x2x8x128xbf16>,
    %128 = arith.addf %69, %123 : vector<8x256xf32>
    %c0_56 = arith.constant 0 : index
    %c0_57 = arith.constant 0 : index
    %129 = vector.load %arg14[%c0_56, %c0_57] : memref<1x256xf32, #tpu.memory_space<vmem>>, vector<1x256xf32>
    %c0_58 = arith.constant 0 : index
    %c0_59 = arith.constant 0 : index
    %130 = vector.load %arg15[%c0_58, %c0_59] : memref<1x256xf32, #tpu.memory_space<vmem>>, vector<1x256xf32>
    %cst_60 = arith.constant dense<0.000000e+00> : vector<8xf32>
    %131 = vector.multi_reduction <add>, %128, %cst_60 [1] : vector<8x256xf32> to vector<8xf32>
    %132 = vector.shape_cast %131 : vector<8xf32> to vector<8x1xf32>
    %cst_61 = arith.constant 2.560000e+02 : f32
    %133 = vector.broadcast %cst_61 : f32 to vector<8x1xf32>
    %134 = arith.divf %132, %133 : vector<8x1xf32>
    %135 = vector.broadcast %134 : vector<8x1xf32> to vector<8x256xf32>
    %136 = arith.subf %128, %135 : vector<8x256xf32>
    %137 = arith.mulf %136, %136 : vector<8x256xf32>
    %cst_62 = arith.constant dense<0.000000e+00> : vector<8xf32>
    %138 = vector.multi_reduction <add>, %137, %cst_62 [1] : vector<8x256xf32> to vector<8xf32>
    %139 = vector.shape_cast %138 : vector<8xf32> to vector<8x1xf32>
    %cst_63 = arith.constant 2.560000e+02 : f32
    %140 = vector.broadcast %cst_63 : f32 to vector<8x1xf32>
    %141 = arith.divf %139, %140 : vector<8x1xf32>
    %cst_64 = arith.constant 9.99999974E-6 : f32
    %142 = vector.broadcast %cst_64 : f32 to vector<8x1xf32>
    %143 = arith.addf %141, %142 : vector<8x1xf32>
    %144 = math.rsqrt %143 : vector<8x1xf32>
    %145 = vector.broadcast %144 : vector<8x1xf32> to vector<8x256xf32>
    %146 = arith.mulf %136, %145 : vector<8x256xf32>
    %147 = vector.broadcast %129 : vector<1x256xf32> to vector<8x256xf32>
    %148 = arith.mulf %146, %147 : vector<8x256xf32>
    %149 = vector.broadcast %130 : vector<1x256xf32> to vector<8x256xf32>
    %150 = arith.addf %148, %149 : vector<8x256xf32>
    %151 = arith.truncf %150 : vector<8x256xf32> to vector<8x256xbf16>
    %c0_65 = arith.constant 0 : index
    %c0_66 = arith.constant 0 : index
    %152 = vector.load %arg16[%c0_65, %c0_66] : memref<256x1024xbf16, #tpu.memory_space<vmem>>, vector<256x1024xbf16>
    %cst_67 = arith.constant dense<0.000000e+00> : vector<8x1024xf32>
    %153 = tpu.matmul %151, %152, %cst_67 {dimension_numbers = #tpu.dot_dimension_numbers<[1], [0], [0], [1], [0, 0, 1, 1], [], []>} : vector<8x256xbf16>, vector<256x1024xbf16>, vector<8x1024xf32> -> vector<8x1024xf32>
    %c0_68 = arith.constant 0 : index
    %c0_69 = arith.constant 0 : index
    %154 = vector.load %arg17[%c0_68, %c0_69] : memref<1x1024xf32, #tpu.memory_space<vmem>>, vector<1x1024xf32>
    %155 = vector.broadcast %154 : vector<1x1024xf32> to vector<8x1024xf32>
    %156 = arith.addf %153, %155 : vector<8x1024xf32>
    %cst_70 = arith.constant 0.000000e+00 : f32
    %157 = vector.broadcast %cst_70 : f32 to vector<8x1024xf32>
    %158 = arith.maximumf %156, %157 : vector<8x1024xf32>
    %159 = arith.truncf %158 : vector<8x1024xf32> to vector<8x1024xbf16>
    %c0_71 = arith.constant 0 : index
    %c0_72 = arith.constant 0 : index
    %160 = vector.load %arg18[%c0_71, %c0_72] : memref<1024x256xbf16, #tpu.memory_space<vmem>>, vector<1024x256xbf16>
    %cst_73 = arith.constant dense<0.000000e+00> : vector<8x256xf32>
    %161 = tpu.matmul %159, %160, %cst_73 {dimension_numbers = #tpu.dot_dimension_numbers<[1], [0], [0], [1], [0, 0, 1, 1], [], []>} : vector<8x1024xbf16>, vector<1024x256xbf16>, vector<8x256xf32> -> vector<8x256xf32>
    %c0_74 = arith.constant 0 : index
    %c0_75 = arith.constant 0 : index
    %162 = vector.load %arg19[%c0_74, %c0_75] : memref<1x256xf32, #tpu.memory_space<vmem>>, vector<1x256xf32>
    %163 = vector.broadcast %162 : vector<1x256xf32> to vector<8x256xf32>
    %164 = arith.addf %161, %163 : vector<8x256xf32>
    %165 = arith.addf %128, %164 : vector<8x256xf32>
    %c0_76 = arith.constant 0 : index
    %c0_77 = arith.constant 0 : index
    %c0_78 = arith.constant 0 : index
    %166 = vector.load %arg20[%c0_76, %c0_77, %c0_78] : memref<1x8x256xf32, #tpu.memory_space<vmem>>, vector<1x8x256xf32>
    %167 = vector.shape_cast %166 : vector<1x8x256xf32> to vector<8x256xf32>
    %168 = vector.shape_cast %165 : vector<8x256xf32> to vector<1x8x256xf32>
    tpu.vector_store %arg20[%c0_76, %c0_77, %c0_78], %168 {strides = array<i32>} : memref<1x8x256xf32, #tpu.memory_space<vmem>>, vector<1x8x256xf32>,
    return
  }
  func.func @transform_0(%arg0: i32, %arg1: i32) -> (i32, i32, i32) {
    %c0_i32 = arith.constant 0 : i32
    %c0_i32_0 = arith.constant 0 : i32
    %c0_i32_1 = arith.constant 0 : i32
    return %arg0, %c0_i32, %c0_i32_0 : i32, i32, i32
  }
  func.func @transform_1(%arg0: i32, %arg1: i32) -> (i32, i32, i32) {
    %c0_i32 = arith.constant 0 : i32
    %c0_i32_0 = arith.constant 0 : i32
    %c0_i32_1 = arith.constant 0 : i32
    return %arg0, %c0_i32, %c0_i32_0 : i32, i32, i32
  }
  func.func @transform_2(%arg0: i32, %arg1: i32) -> (i32, i32) {
    %c0_i32 = arith.constant 0 : i32
    %c0_i32_0 = arith.constant 0 : i32
    %c0_i32_1 = arith.constant 0 : i32
    return %c0_i32, %c0_i32_0 : i32, i32
  }
  func.func @transform_3(%arg0: i32, %arg1: i32) -> (i32, i32) {
    %c0_i32 = arith.constant 0 : i32
    %c0_i32_0 = arith.constant 0 : i32
    %c0_i32_1 = arith.constant 0 : i32
    return %c0_i32, %c0_i32_0 : i32, i32
  }
  func.func @transform_4(%arg0: i32, %arg1: i32) -> (i32, i32) {
    %c0_i32 = arith.constant 0 : i32
    %c0_i32_0 = arith.constant 0 : i32
    %c0_i32_1 = arith.constant 0 : i32
    return %c0_i32, %c0_i32_0 : i32, i32
  }
  func.func @transform_5(%arg0: i32, %arg1: i32) -> (i32, i32) {
    %c0_i32 = arith.constant 0 : i32
    %c0_i32_0 = arith.constant 0 : i32
    %c0_i32_1 = arith.constant 0 : i32
    return %c0_i32, %c0_i32_0 : i32, i32
  }
  func.func @transform_6(%arg0: i32, %arg1: i32) -> (i32, i32) {
    %c0_i32 = arith.constant 0 : i32
    %c0_i32_0 = arith.constant 0 : i32
    %c0_i32_1 = arith.constant 0 : i32
    return %c0_i32, %c0_i32_0 : i32, i32
  }
  func.func @transform_7(%arg0: i32, %arg1: i32) -> (i32, i32) {
    %c0_i32 = arith.constant 0 : i32
    %c0_i32_0 = arith.constant 0 : i32
    %c0_i32_1 = arith.constant 0 : i32
    return %c0_i32, %c0_i32_0 : i32, i32
  }
  func.func @transform_8(%arg0: i32, %arg1: i32) -> (i32, i32) {
    %c0_i32 = arith.constant 0 : i32
    %c0_i32_0 = arith.constant 0 : i32
    %c0_i32_1 = arith.constant 0 : i32
    return %c0_i32, %c0_i32_0 : i32, i32
  }
  func.func @transform_9(%arg0: i32, %arg1: i32) -> (i32, i32) {
    %c0_i32 = arith.constant 0 : i32
    %c0_i32_0 = arith.constant 0 : i32
    %c0_i32_1 = arith.constant 0 : i32
    return %c0_i32, %c0_i32_0 : i32, i32
  }
  func.func @transform_10(%arg0: i32, %arg1: i32) -> (i32, i32) {
    %c0_i32 = arith.constant 0 : i32
    %c0_i32_0 = arith.constant 0 : i32
    %c0_i32_1 = arith.constant 0 : i32
    return %c0_i32, %c0_i32_0 : i32, i32
  }
  func.func @transform_11(%arg0: i32, %arg1: i32) -> (i32, i32) {
    %c0_i32 = arith.constant 0 : i32
    %c0_i32_0 = arith.constant 0 : i32
    %c0_i32_1 = arith.constant 0 : i32
    return %c0_i32, %c0_i32_0 : i32, i32
  }
  func.func @transform_12(%arg0: i32, %arg1: i32) -> (i32, i32) {
    %c0_i32 = arith.constant 0 : i32
    %c0_i32_0 = arith.constant 0 : i32
    %c0_i32_1 = arith.constant 0 : i32
    return %c0_i32, %c0_i32_0 : i32, i32
  }
  func.func @transform_13(%arg0: i32, %arg1: i32) -> (i32, i32) {
    %c0_i32 = arith.constant 0 : i32
    %c0_i32_0 = arith.constant 0 : i32
    %c0_i32_1 = arith.constant 0 : i32
    return %c0_i32, %c0_i32_0 : i32, i32
  }
  func.func @transform_14(%arg0: i32, %arg1: i32) -> (i32, i32) {
    %c0_i32 = arith.constant 0 : i32
    %c0_i32_0 = arith.constant 0 : i32
    %c0_i32_1 = arith.constant 0 : i32
    return %c0_i32, %c0_i32_0 : i32, i32
  }
  func.func @transform_15(%arg0: i32, %arg1: i32) -> (i32, i32) {
    %c0_i32 = arith.constant 0 : i32
    %c0_i32_0 = arith.constant 0 : i32
    %c0_i32_1 = arith.constant 0 : i32
    return %c0_i32, %c0_i32_0 : i32, i32
  }
  func.func @transform_16(%arg0: i32, %arg1: i32) -> (i32, i32) {
    %c0_i32 = arith.constant 0 : i32
    %c0_i32_0 = arith.constant 0 : i32
    %c0_i32_1 = arith.constant 0 : i32
    return %c0_i32, %c0_i32_0 : i32, i32
  }
  func.func @transform_17(%arg0: i32, %arg1: i32) -> (i32, i32) {
    %c0_i32 = arith.constant 0 : i32
    %c0_i32_0 = arith.constant 0 : i32
    %c0_i32_1 = arith.constant 0 : i32
    return %c0_i32, %c0_i32_0 : i32, i32
  }
  func.func @transform_18(%arg0: i32, %arg1: i32) -> (i32, i32, i32) {
    %c0_i32 = arith.constant 0 : i32
    %c0_i32_0 = arith.constant 0 : i32
    return %arg0, %arg1, %c0_i32 : i32, i32, i32
  }
  func.func @transform_19(%arg0: i32, %arg1: i32) -> (i32, i32, i32, i32) {
    %c0_i32 = arith.constant 0 : i32
    %c0_i32_0 = arith.constant 0 : i32
    %c0_i32_1 = arith.constant 0 : i32
    return %arg0, %c0_i32, %arg1, %c0_i32_0 : i32, i32, i32, i32
  }
}

</mosaic_0001>

<bundles_post_ra>
// kernel: tpu_custom_call.1
= control target key start
LH: loop header
LB: loop body
LE: loop exit
PB: predicated region body
PF: predicated region fallthrough
CT: control target
= control target key end

     0   :  { %s9252_s0 = inlined_call_operand.hbm [shape: f32[2,8,256], index: 0, kind: input, shape index: {}]   ;;  %s9253_s1 = inlined_call_operand.hbm [shape: bf16[2,128,256], index: 1, kind: input, shape index: {}]   ;;  %s9254_s2 = inlined_call_operand.vmem [shape: f32[1,256], index: 2, kind: input, shape index: {}]   ;;  %s9255_s3 = inlined_call_operand.vmem [shape: f32[1,256], index: 3, kind: input, shape index: {}]   ;;  %s9256_s4 = inlined_call_operand.hbm [shape: bf16[256,256], index: 4, kind: input, shape index: {}]   ;;  %s9257_s5 = inlined_call_operand.hbm [shape: bf16[256,512], index: 5, kind: input, shape index: {}]   ;;  %s9258_s6 = inlined_call_operand.hbm [shape: bf16[256,256], index: 6, kind: input, shape index: {}]   ;;  %s9259_s7 = inlined_call_operand.vmem [shape: f32[1,256], index: 7, kind: input, shape index: {}]   ;;  %s9260_s8 = inlined_call_operand.vmem [shape: f32[1,256], index: 8, kind: input, shape index: {}]   ;;  %s9261_s9 = inlined_call_operand.hbm [shape: bf16[256,256], index: 9, kind: input, shape index: {}]   ;;  %s9262_s10 = inlined_call_operand.hbm [shape: bf16[256,512], index: 10, kind: input, shape index: {}]   ;;  %s9263_s11 = inlined_call_operand.hbm [shape: bf16[256,256], index: 11, kind: input, shape index: {}]   ;;  %s9264_s12 = inlined_call_operand.vmem [shape: f32[1,256], index: 12, kind: input, shape index: {}]   ;;  %s9265_s13 = inlined_call_operand.vmem [shape: f32[1,256], index: 13, kind: input, shape index: {}]   ;;  %s9266_s14 = inlined_call_operand.hbm [shape: bf16[256,1024], index: 14, kind: input, shape index: {}]   ;;  %s9267_s15 = inlined_call_operand.vmem [shape: f32[1,1024], index: 15, kind: input, shape index: {}]   ;;  %s9268_s16 = inlined_call_operand.hbm [shape: bf16[1024,256], index: 16, kind: input, shape index: {}]   ;;  %s9269_s17 = inlined_call_operand.vmem [shape: f32[1,256], index: 17, kind: input, shape index: {}]   ;;  %s9270_s18 = inlined_call_operand.hbm [shape: f32[2,8,256], index: 18, kind: output, shape index: {0}]   ;;  %s9271_s19 = inlined_call_operand.hbm [shape: bf16[2,2,8,128], index: 19, kind: output, shape index: {1}]  }
   0x1   :  { %9287 = sst [smem:[#allocation41_spill]] %s9252_s0 }
   0x2   :  { %9288 = sst [smem:[#allocation42_spill]] %s9253_s1 }
   0x3   :  { %9289 = sst [smem:[#allocation43_spill]] %s9254_s2 }
   0x4   :  { %9290 = sst [smem:[#allocation44_spill]] %s9255_s3 }
   0x5   :  { %9291 = sst [smem:[#allocation45_spill]] %s9256_s4 }
   0x6   :  { %9292 = sst [smem:[#allocation46_spill]] %s9257_s5 }
   0x7   :  { %9293 = sst [smem:[#allocation47_spill]] %s9258_s6 }
   0x8   :  { %9294 = sst [smem:[#allocation48_spill]] %s9261_s9 }
   0x9   :  { %9295 = sst [smem:[#allocation49_spill]] %s9262_s10 }
   0xa   :  { %9296 = sst [smem:[#allocation50_spill]] %s9263_s11 }
   0xb   :  { %9297 = sst [smem:[#allocation51_spill]] %s9266_s14 }
   0xc   :  { %9298 = sst [smem:[#allocation52_spill]] %s9268_s16 }
   0xd   :  { %9299 = sst [smem:[#allocation53_spill]] %s9269_s17 }
   0xe   :  { %9300 = sst [smem:[#allocation54_spill]] %s9270_s18 }
   0xf   :  { %9301 = sst [smem:[#allocation55_spill]] %s9271_s19 }
  0x10   :  { %25 = vsyncpa [#allocation7], 0 }
  0x11   :  { %27 = vsyncpa [#allocation7 + $0x1], 0 }
  0x12   :  { %28 = vsyncpa [#allocation10], 0 }
  0x13   :  { %30 = vsyncpa [#allocation10 + $0x1], 0 }
  0x14   :  { %31 = vsyncpa [#allocation13], 0 }
  0x15   :  { %32 = vsyncpa [#allocation16], 0 }
  0x16   :  { %33 = vsyncpa [#allocation19], 0 }
  0x17   :  { %34 = vsyncpa [#allocation22], 0 }
  0x18   :  { %35 = vsyncpa [#allocation8], 0 }
  0x19   :  { %37 = vsyncpa [#allocation8 + $0x1], 0 }
  0x1a   :  { %38 = vsyncpa [#allocation25], 0 }
  0x1b   :  { %40 = vsyncpa [#allocation25 + $0x1], 0  ;;  %s8710_s0 = smov 0   ;;  %s8712_s30 = smov 0  }
  0x1c   :  { %s8714_s20 = smov 0   ;;  %s8716_s21 = smov 0  }
  0x1d   :  { %s8718_s1 = smov 0   ;;  %s8720_s22 = smov 0  }
  0x1e LB: > { %9302 = sst [smem:[#allocation35_spill]] %s8566_s0  ;;  %s8741_s2 = sadd.s32 4294967295, %s8586_s22   ;;  %s8586_s22 = sphi %s8720_s22, %s46_s22   ;;  %s8582_s1 = sphi %s8718_s1, %s9345_s1   ;;  %s8578_s21 = sphi %s8716_s21, %s9344_s21   ;;  %s8574_s20 = sphi %s8714_s20, %s9340_s20   ;;  %s8570_s30 = sphi %s8712_s30, %s9343_s30   ;;  %s8566_s0 = sphi %s8710_s0, %s9342_s0  }
  0x1f   : > { %9303 = sst [smem:[#allocation36_spill]] %s8574_s20  ;;  %p6295_p0 = scmp.ge.s32.totalorder %s8586_s22, 1 }
  0x20   : > { %9304 = sst [smem:[#allocation37_spill]] %s8578_s21  ;;  %p79_p1 = scmp.eq.s32.totalorder %s8741_s2, 0 }
  0x21   : > { %p507_p2 = scmp.lt.s32.totalorder %s8586_s22, 3  ;;  %s8588_s24 = smov [#allocation11]  }
  0x22   : > { %s525_s25 = sshll.u32 %s8588_s24, 4  ;;  %s8589_s26 = smov [#allocation12]   ;;  %s526_s25 = int_to_ptr.vmem [resolvable:$true] %s525_s25 }
  0x23   : > { %p8746_p3 = pnand %p6295_p0, %p507_p2  ;;  %s538_s27 = sshll.u32 %s8589_s26, 4  ;;  %s539_s27 = int_to_ptr.vmem [resolvable:$true] %s538_s27 }
  0x24   : > { %s8199_s29 = scalar_lea.vmem %s526_s25, 4096  ;;  %p8207_p11 = scmp.lt.s32.totalorder %s526_s25, %s526_s25 }
  0x25   : > { %p7407_p4 = pneg %p8746_p3  ;;  %p8200_p8 = scmp.ne.s32.totalorder %s526_s25, %s8199_s29 }
  0x26   : > { %p8208_p12 = scmp.lt.s32.totalorder %s8199_s29, %s8199_s29 }
  0x27   : > { %p8755_p6 = pnand %p7407_p4, %p79_p1 }
  0x28   : > { %p8209_p13 = por %p8208_p12, %p8207_p11 }
  0x29   : > { %p8761_p7 = pneg %p8755_p6 }
  0x2b   : > { %p8202_p9 = pnand %p8200_p8, %p8761_p7 }
  0x2d   : > { %p8203_p10 = pneg %p8202_p9 }
  0x2f   : > { %p8210_p0 = pnand %p8209_p13, %p8203_p10 }
  0x31   : > { %8213 = shalt.err (!%p8210_p0)
}
  0x32   : > { %s9277_s24 = smov 128   ;;  %s9279_s26 = smov 8  }
  0x33   : > { %s9308_s4 = sld [smem:[#allocation45_spill]]  ;;  %s8225_s19 = scalar_lea.vmem %s539_s27, 8192 }
  0x34   : > { %p8226_p2 = scmp.ne.s32.totalorder %s539_s27, %s8225_s19  ;;  %p8233_p9 = scmp.lt.s32.totalorder %s539_s27, %s539_s27 }
  0x35   : > { %p8234_p10 = scmp.lt.s32.totalorder %s8225_s19, %s8225_s19 }
  0x36   : > { %p8228_p4 = pnand %p8226_p2, %p8761_p7 }
  0x37   : > { %p8235_p11 = por %p8234_p10, %p8233_p9 }
  0x38   : > { %p8229_p8 = pneg %p8228_p4 }
  0x39   : > { %7410 = dma.hbm_to_vmem [thread:$0]  (!%p8755_p6), %s9308_s4, 4096, %s526_s25, [#allocation10], %s9277_s24, %s9277_s24, %s9279_s26  }
  0x3a   : > { %p8236_p12 = pnand %p8235_p11, %p8229_p8 }
  0x3c   : > { %8239 = shalt.err (!%p8236_p12)
}
  0x3d   : > { %s9281_s29 = smov 256   ;;  %s9282_s21 = smov 16  }
  0x3e   : > { %s9309_s5 = sld [smem:[#allocation46_spill]]  ;;  %s8594_s25 = smov [#allocation15]  }
  0x3f   : > { %s570_s24 = sshll.u32 %s8594_s25, 4  ;;  %s8595_s26 = smov [#allocation18]   ;;  %s571_s24 = int_to_ptr.vmem [resolvable:$true] %s570_s24 }
  0x40   : > { %s596_s4 = sshll.u32 %s8595_s26, 4  ;;  %s8251_s19 = scalar_lea.vmem %s571_s24, 4096  ;;  %s597_s4 = int_to_ptr.vmem [resolvable:$true] %s596_s4 }
  0x41   : > { %p8252_p13 = scmp.ne.s32.totalorder %s571_s24, %s8251_s19  ;;  %p8259_p4 = scmp.lt.s32.totalorder %s571_s24, %s571_s24 }
  0x42   : > { %p8260_p8 = scmp.lt.s32.totalorder %s8251_s19, %s8251_s19 }
  0x43   : > { %p8254_p0 = pnand %p8252_p13, %p8761_p7 }
  0x44   : > { %7413 = dma.hbm_to_vmem [thread:$0]  (!%p8755_p6), %s9309_s5, 8192, %s539_s27, [#allocation13], %s9281_s29, %s9281_s29, %s9282_s21  }
  0x45   : > { %p8255_p2 = pneg %p8254_p0  ;;  %p8261_p9 = por %p8260_p8, %p8259_p4 }
  0x47   : > { %p8262_p10 = pnand %p8261_p9, %p8255_p2 }
  0x49   : > { %8265 = shalt.err (!%p8262_p10)
}
  0x4a   : > { %s9310_s17 = smov 8   ;;  %s9311_s27 = smov 128  }
  0x4b   : > { %s9312_s9 = sld [smem:[#allocation48_spill]]  ;;  %s8277_s26 = scalar_lea.vmem %s597_s4, 4096 }
  0x4c   : > { %p8278_p11 = scmp.ne.s32.totalorder %s597_s4, %s8277_s26  ;;  %p8285_p0 = scmp.lt.s32.totalorder %s597_s4, %s597_s4 }
  0x4d   : > { %p8286_p5 = scmp.lt.s32.totalorder %s8277_s26, %s8277_s26 }
  0x4e   : > { %p8280_p12 = pnand %p8278_p11, %p8761_p7 }
  0x4f   : > { %p8287_p4 = por %p8286_p5, %p8285_p0 }
  0x50   : > { %p8281_p13 = pneg %p8280_p12 }
  0x51   : > { %7419 = dma.hbm_to_vmem [thread:$0]  (!%p8755_p6), %s9312_s9, 4096, %s571_s24, [#allocation16], %s9311_s27, %s9311_s27, %s9310_s17  }
  0x52   : > { %p8288_p2 = pnand %p8287_p4, %p8281_p13 }
  0x54   : > { %8291 = shalt.err (!%p8288_p2)
}
  0x55   : > { %s9313_s11 = sld [smem:[#allocation50_spill]]  ;;  %s8596_s24 = smov [#allocation14]  }
  0x56   : > { %s551_s18 = sshll.u32 %s8596_s24, 4  ;;  %s8597_s25 = smov [#allocation17]   ;;  %s552_s18 = int_to_ptr.vmem [resolvable:$true] %s551_s18 }
  0x57   : > { %s583_s21 = sshll.u32 %s8597_s25, 4  ;;  %s8303_s26 = scalar_lea.vmem %s552_s18, 4096  ;;  %s584_s21 = int_to_ptr.vmem [resolvable:$true] %s583_s21 }
  0x58   : > { %p8304_p5 = scmp.ne.s32.totalorder %s552_s18, %s8303_s26  ;;  %p8311_p10 = scmp.lt.s32.totalorder %s552_s18, %s552_s18 }
  0x59   : > { %p8312_p11 = scmp.lt.s32.totalorder %s8303_s26, %s8303_s26 }
  0x5a   : > { %p8306_p8 = pnand %p8304_p5, %p8761_p7 }
  0x5b   : > { %7425 = dma.hbm_to_vmem [thread:$0]  (!%p8755_p6), %s9313_s11, 4096, %s597_s4, [#allocation19], %s9311_s27, %s9311_s27, %s9310_s17  }
  0x5c   : > { %p8307_p9 = pneg %p8306_p8  ;;  %p8313_p12 = por %p8312_p11, %p8311_p10 }
  0x5e   : > { %p8314_p13 = pnand %p8313_p12, %p8307_p9 }
  0x60   : > { %8317 = shalt.err (!%p8314_p13)
}
  0x61   : > { %s9314_s6 = sld [smem:[#allocation47_spill]]  ;;  %s8329_s19 = scalar_lea.vmem %s584_s21, 8192 }
  0x62   : > { %p8330_p0 = scmp.ne.s32.totalorder %s584_s21, %s8329_s19  ;;  %p8337_p5 = scmp.lt.s32.totalorder %s584_s21, %s584_s21 }
  0x63   : > { %p8338_p8 = scmp.lt.s32.totalorder %s8329_s19, %s8329_s19 }
  0x64   : > { %p8332_p4 = pnand %p8330_p0, %p8761_p7 }
  0x65   : > { %p8339_p10 = por %p8338_p8, %p8337_p5 }
  0x66   : > { %p8333_p2 = pneg %p8332_p4 }
  0x67   : > { %7416 = dma.hbm_to_vmem [thread:$0]  (!%p8755_p6), %s9314_s6, 4096, %s552_s18, [#allocation13], %s9311_s27, %s9311_s27, %s9310_s17  }
  0x68   : > { %p8340_p9 = pnand %p8339_p10, %p8333_p2 }
  0x6a   : > { %8343 = shalt.err (!%p8340_p9)
}
  0x6b   : > { %s9315_s24 = smov 16   ;;  %s9316_s25 = smov 256  }
  0x6c   : > { %s9317_s10 = sld [smem:[#allocation49_spill]]  ;;  %s8598_s18 = smov [#allocation20]  }
  0x6d   : > { %s615_s4 = sshll.u32 %s8598_s18, 4  ;;  %s616_s4 = int_to_ptr.vmem [resolvable:$true] %s615_s4 }
  0x6e   : > { %s8355_s29 = scalar_lea.vmem %s616_s4, 16384  ;;  %p8363_p0 = scmp.lt.s32.totalorder %s616_s4, %s616_s4 }
  0x6f   : > { %p8356_p11 = scmp.ne.s32.totalorder %s616_s4, %s8355_s29  ;;  %p8364_p4 = scmp.lt.s32.totalorder %s8355_s29, %s8355_s29 }
  0x71   : > { %p8358_p12 = pnand %p8356_p11, %p8761_p7  ;;  %p8365_p2 = por %p8364_p4, %p8363_p0 }
  0x72   : > { %7422 = dma.hbm_to_vmem [thread:$0]  (!%p8755_p6), %s9317_s10, 8192, %s584_s21, [#allocation16], %s9316_s25, %s9316_s25, %s9315_s24  }
  0x73   : > { %p8359_p13 = pneg %p8358_p12 }
  0x75   : > { %p8366_p5 = pnand %p8365_p2, %p8359_p13 }
  0x77   : > { %8369 = shalt.err (!%p8366_p5)
}
  0x78   : > { %s8599_s19 = smov 512   ;;  %s8600_s6 = smov 32  }
  0x79   : > { %s9318_s14 = sld [smem:[#allocation51_spill]]  ;;  %s8601_s24 = smov [#allocation21]  }
  0x7a   : > { %s631_s25 = sshll.u32 %s8601_s24, 4  ;;  %s632_s25 = int_to_ptr.vmem [resolvable:$true] %s631_s25 }
  0x7b   : > { %s8381_s26 = scalar_lea.vmem %s632_s25, 16384  ;;  %p8389_p11 = scmp.lt.s32.totalorder %s632_s25, %s632_s25 }
  0x7c   : > { %p8382_p8 = scmp.ne.s32.totalorder %s632_s25, %s8381_s26  ;;  %p8390_p12 = scmp.lt.s32.totalorder %s8381_s26, %s8381_s26 }
  0x7e   : > { %p8384_p10 = pnand %p8382_p8, %p8761_p7  ;;  %p8391_p13 = por %p8390_p12, %p8389_p11 }
  0x7f   : > { %7428 = dma.hbm_to_vmem [thread:$0]  (!%p8755_p6), %s9318_s14, 16384, %s616_s4, [#allocation19], %s8599_s19, %s8599_s19, %s8600_s6  }
  0x80   : > { %p8385_p9 = pneg %p8384_p10 }
  0x82   : > { %p8392_p0 = pnand %p8391_p13, %p8385_p9 }
  0x84   : > { %8395 = shalt.err (!%p8392_p0)
}
  0x85   : > { %s9319_s16 = sld [smem:[#allocation52_spill]]  ;;  %s6294_s3 = sadd.s32 4294967294, %s8586_s22  }
  0x86   : > { %s58_s28 = sadd.s32 1, %s8582_s1  ;;  %s65_s4 = sadd.s32 1, %s8574_s20 }
  0x87   : > { %p60_p7 = scmp.ge.s32.totalorder %s58_s28, 2  ;;  %p72_p4 = scmp.ne.s32.totalorder %s8574_s20, %s8570_s30 }
  0x88   : > { %p73_p2 = scmp.eq.s32.totalorder %s8586_s22, 0  ;;  %p78_p8 = scmp.ne.s32.totalorder %s8570_s30, %s8566_s0 }
  0x89   : > { %s9347_s28 = smov (%p60_p7, %s58_s28), 0  ;;  %p472_p12 = scmp.eq.s32.totalorder %s6294_s3, 1 }
  0x8a   : > { %9320 = sst [smem:[#allocation38_spill]] %s9347_s28  ;;  %p8850_p5 = por %p73_p2, %p72_p4 }
  0x8b   : > { %7431 = dma.hbm_to_vmem [thread:$0]  (!%p8755_p6), %s9319_s16, 16384, %s632_s25, [#allocation22], %s9311_s27, %s9311_s27, %s9310_s17  }
  0x8c   : > { %s62_s19 = ssub.s32 %s8582_s1, %s9347_s28  ;;  %p466_p6 = scmp.eq.s32.totalorder %s8741_s2, 1 }
  0x8d   : > { %p63_p10 = scmp.eq.s32.totalorder %s62_s19, 0  ;;  %p8861_p9 = por %p79_p1, %p78_p8 }
  0x8e   : > { %p8865_p11 = por %p466_p6, %p72_p4  ;;  %p8872_p13 = por %p472_p12, %p78_p8 }
  0x8f   : > { %s8870_s24 = scalar_select %p63_p10, %s8574_s20, %s65_s4  }
  0x90   : > { %s9325_s25 = scalar_select %p8872_p13, 1, 0 }
  0x91   : > { %9324 = sst [smem:[#allocation39_spill]] %s8870_s24  ;;  %p7454_p0 = scmp.lt.s32.totalorder %s8586_s22, 2 }
  0x92   : > { %9326 = sst [smem:[#allocation40_spill]] %s9325_s25  ;;  %s648_s26 = sand.u32 1, %s8574_s20  }
  0x93   : > { %s6958_s18 = sshll.u32 %s8582_s1, 8  ;;  %s6305_s6 = sshll.u32 %s648_s26, 4 }
  0x94   : > { %s9327_s10 = sld [smem:[#allocation41_spill]]  ;;  %s652_s14 = scalar_lea.vmem [#allocation6], %s6305_s6 }
  0x95   : > { %s660_s16 = sshll.u32 %s652_s14, 4  ;;  %p8884_p7 = pnand %p7454_p0, %p8850_p5  ;;  %s661_s16 = int_to_ptr.vmem [resolvable:$true] %s660_s16 }
  0x96   : > { %s6308_s3 = sshll.u32 %s648_s26, 7  ;;  %s649_s4 = scalar_lea.sflag [#allocation7], %s648_s26 }
  0x97   : > { %p8398_p4 = pneg %p8884_p7  ;;  %s8409_s24 = scalar_lea.vmem %s661_s16, 256 }
  0x98   : > { %p8410_p2 = scmp.ne.s32.totalorder %s661_s16, %s8409_s24  ;;  %s8602_s9 = smov [#allocation6]  }
  0x9a   : > { %s658_s11 = scalar_lea.hbm %s9327_s10, %s6958_s18  ;;  %p8412_p8 = pnand %p8410_p2, %p8398_p4 }
  0x9b   : > { %s8414_s10 = sshll.u32 %s8602_s9, 4  ;;  %s8415_s10 = int_to_ptr.vmem [resolvable:$false] %s8414_s10 }
  0x9c   : > { %p8413_p6 = pneg %p8412_p8  ;;  %s8416_s14 = scalar_lea.vmem %s8415_s10, 512 }
  0x9d   : > { %p8417_p5 = scmp.lt.s32.totalorder %s661_s16, %s8415_s10  ;;  %p8418_p10 = scmp.lt.s32.totalorder %s8416_s14, %s8409_s24 }
  0x9f   : > { %p8419_p12 = por %p8418_p10, %p8417_p5 }
  0xa1   : > { %p8420_p0 = pnand %p8419_p12, %p8413_p6 }
  0xa3   : > { %8423 = shalt.err (!%p8420_p0)
}
  0xa4   : > { %7435 = dma.hbm_to_vmem [thread:$0]  (!%p8884_p7), %s658_s11, 256, %s661_s16, %s649_s4  }
  0xa5   : > { %s6959_s29 = sshll.u32 %s8582_s1, 11  ;;  %s671_s26 = scalar_lea.vmem [#allocation9], %s6308_s3 }
  0xa6   : > { %s678_s18 = sshll.u32 %s671_s26, 4  ;;  %s667_s6 = sand.u32 1, %s8586_s22   ;;  %s679_s18 = int_to_ptr.vmem [resolvable:$true] %s678_s18 }
  0xa7   : > { %s9329_s20 = sld [smem:[#allocation42_spill]]  ;;  %s668_s10 = scalar_lea.sflag [#allocation10], %s667_s6 }
  0xa8   : > { %s8437_s24 = scalar_lea.vmem %s679_s18, 2048  ;;  %s8603_s14 = smov [#allocation9]  }
  0xa9   : > { %p8438_p2 = scmp.ne.s32.totalorder %s679_s18, %s8437_s24  ;;  %s8442_s0 = sshll.u32 %s8603_s14, 4  ;;  %s8443_s0 = int_to_ptr.vmem [resolvable:$false] %s8442_s0 }
  0xaa   : > { %s8444_s11 = scalar_lea.vmem %s8443_s0, 4096  ;;  %p8445_p5 = scmp.lt.s32.totalorder %s679_s18, %s8443_s0 }
  0xab   : > { %p8440_p8 = pnand %p8438_p2, %p8398_p4  ;;  %p8446_p10 = scmp.lt.s32.totalorder %s8444_s11, %s8437_s24 }
  0xad   : > { %s677_s25 = scalar_lea.hbm %s9329_s20, %s6959_s29  ;;  %p8441_p6 = pneg %p8440_p8 }
  0xae   : > { %p8447_p12 = por %p8446_p10, %p8445_p5 }
  0xb0   : > { %p8448_p0 = pnand %p8447_p12, %p8441_p6 }
  0xb2   : > { %8451 = shalt.err (!%p8448_p0)
}
  0xb3   : > { %7438 = dma.hbm_to_vmem [thread:$0]  (!%p8884_p7), %s677_s25, 2048, %s679_s18, %s668_s10, %s9311_s27, %s9311_s27, %s9310_s17  }
  0xb4   : > { %690 = sbr.rel (%p8746_p3) target bundleno = 3970 (0xf82), region = 92  ;;  %s8911_s16 = sand.u32 (!%p8746_p3), 1, %s8570_s30  }
  0xb5   : > { %s6312_s0 = sshll.u32 (!%p8746_p3), %s8911_s16, 4  ;;  %s693_s20 = scalar_lea.sflag (!%p8746_p3), [#allocation7], %s8911_s16 }
  0xb6   : > { %s8917_s3 = scalar_lea.vmem (!%p8746_p3), [#allocation6], %s6312_s0 }
  0xb9   : > { %8529 = dma.done.wait (%p8861_p9), %s693_s20, 256  }
  0xba   : > { %8531 = vsyncadd (%p8861_p9), %s693_s20, 4294967040  ;;  %s701_s23 = sand.u32 1, %s8741_s2   ;;  %s6313_s17 = sshll.u32 %s8911_s16, 7 }
  0xbb   : > { %s702_s27 = scalar_lea.sflag [#allocation10], %s701_s23  ;;  %s8925_s28 = scalar_lea.vmem [#allocation9], %s6313_s17 }
  0xbc   : > { %8533 = dma.done.wait (%p8861_p9), %s702_s27, 2048  }
  0xbd   : > { %8535 = vsyncadd (%p8861_p9), %s702_s27, 4294965248 }
  0xbe   : > { %8537 = dma.done.wait (%p79_p1), [#allocation10], 4096  }
  0xbf   : > { %8539 = vsyncadd (%p79_p1), [#allocation10], 4294963200 }
  0xc0   : > { %8541 = dma.done.wait (%p79_p1), [#allocation13], 12288  }
  0xc1   : > { %8543 = vsyncadd (%p79_p1), [#allocation13], 4294955008 }
  0xc2   : > { %8545 = dma.done.wait (%p79_p1), [#allocation16], 12288  }
  0xc3   : > { %8547 = vsyncadd (%p79_p1), [#allocation16], 4294955008 }
  0xc4   : > { %8549 = dma.done.wait (%p79_p1), [#allocation19], 20480  }
  0xc5   : > { %8551 = vsyncadd (%p79_p1), [#allocation19], 4294946816 }
  0xc6   : > { %8553 = dma.done.wait (%p79_p1), [#allocation22], 16384  }
  0xc7   : > { %8555 = vsyncadd (%p79_p1), [#allocation22], 4294950912  ;;  %v8952_v0 = vld [vmem:[%s8917_s3] sm:$0xff]  ;;  %v8955_v1 = vld [vmem:[%s8917_s3 + $0x8] sm:$0xff]  ;;  %s9330_s25 = sld [smem:[#allocation43_spill]]  ;;  %vm8605_vm0 = vmmov 0  }
  0xc8   : > { %v2370_v2 = vadd.f32 %v8955_v1, %v8952_v0  ;;  %v7530_v3 = vld [vmem:[#allocation12 + $0xe4] ss:$16 sps:$4 sm:$0xff]   ;;  %v7532_v4 = vld [vmem:[#allocation12 + $0xe0] ss:$16 sps:$4 sm:$0xff]   ;;  %v7533_v5 = vld [vmem:[#allocation12 + $0xec] ss:$16 sps:$4 sm:$0xff]  }
  0xc9   : > { %v7535_v6 = vld [vmem:[#allocation12 + $0xe8] ss:$16 sps:$4 sm:$0xff]   ;;  %v7536_v7 = vld [vmem:[#allocation12 + $0xc4] ss:$16 sps:$4 sm:$0xff]   ;;  %1240 = vmatprep.subr.bf16.mxu0 %v7530_v3  ;;  %1281 = vmatprep.subr.bf16.mxu1 %v7533_v5  ;;  %v7539_v8 = vld [vmem:[#allocation12 + $0xcc] ss:$16 sps:$4 sm:$0xff]  }
  0xca   : > { %2371 = vadd.xlane.f32.xlu1 %v2370_v2  ;;  %812 = vadd.xlane.f32.xlu0 %v2370_v2  ;;  %v7538_v9 = vld [vmem:[#allocation12 + $0xc0] ss:$16 sps:$4 sm:$0xff]   ;;  %v7541_v10 = vld [vmem:[#allocation12 + $0xc8] ss:$16 sps:$4 sm:$0xff]   ;;  %v7542_v11 = vld [vmem:[#allocation12 + $0xa4] ss:$16 sps:$4 sm:$0xff]  }
  0xcb   : > { %1241 = vmatpush1.bf16.msra.mxu0 %v7532_v4  ;;  %1282 = vmatpush1.bf16.msra.mxu1 %v7535_v6  ;;  %v7545_v12 = vld [vmem:[#allocation12 + $0xac] ss:$16 sps:$4 sm:$0xff]   ;;  %v7544_v13 = vld [vmem:[#allocation12 + $0xa0] ss:$16 sps:$4 sm:$0xff]   ;;  %v7547_v14 = vld [vmem:[#allocation12 + $0xa8] ss:$16 sps:$4 sm:$0xff]  }
  0xcc   : > { %1242 = vmatprep.subr.bf16.mxu0 %v7536_v7  ;;  %1283 = vmatprep.subr.bf16.mxu1 %v7539_v8  ;;  %v7548_v15 = vld [vmem:[#allocation12 + $0x84] ss:$16 sps:$4 sm:$0xff]   ;;  %v7551_v16 = vld [vmem:[#allocation12 + $0x8c] ss:$16 sps:$4 sm:$0xff]   ;;  %v7550_v17 = vld [vmem:[#allocation12 + $0x80] ss:$16 sps:$4 sm:$0xff]  }
  0xcd   : > { %v7553_v18 = vld [vmem:[#allocation12 + $0x88] ss:$16 sps:$4 sm:$0xff]   ;;  %v7554_v19 = vld [vmem:[#allocation12 + $0x64] ss:$16 sps:$4 sm:$0xff]   ;;  %v7557_v20 = vld [vmem:[#allocation12 + $0x6c] ss:$16 sps:$4 sm:$0xff]  }
  0xce   : > { %v7556_v21 = vld [vmem:[#allocation12 + $0x60] ss:$16 sps:$4 sm:$0xff]   ;;  %v7559_v22 = vld [vmem:[#allocation12 + $0x68] ss:$16 sps:$4 sm:$0xff]   ;;  %v7560_v23 = vld [vmem:[#allocation12 + $0x44] ss:$16 sps:$4 sm:$0xff]  }
  0xcf   : > { %1243 = vmatpush1.bf16.msra.mxu0 %v7538_v9  ;;  %1284 = vmatpush1.bf16.msra.mxu1 %v7541_v10  ;;  %v7563_v24 = vld [vmem:[#allocation12 + $0x4c] ss:$16 sps:$4 sm:$0xff]   ;;  %v7562_v25 = vld [vmem:[#allocation12 + $0x40] ss:$16 sps:$4 sm:$0xff]   ;;  %v7565_v26 = vld [vmem:[#allocation12 + $0x48] ss:$16 sps:$4 sm:$0xff]  }
  0xd0   : > { %1244 = vmatprep.subr.bf16.mxu0 %v7542_v11  ;;  %1285 = vmatprep.subr.bf16.mxu1 %v7545_v12  ;;  %v7566_v27 = vld [vmem:[#allocation12 + $0x24] ss:$16 sps:$4 sm:$0xff]   ;;  %v7569_v28 = vld [vmem:[#allocation12 + $0x2c] ss:$16 sps:$4 sm:$0xff]   ;;  %v7568_v29 = vld [vmem:[#allocation12 + $0x20] ss:$16 sps:$4 sm:$0xff]  }
  0xd1   : > { %v7571_v30 = vld [vmem:[#allocation12 + $0x28] ss:$16 sps:$4 sm:$0xff]   ;;  %v7572_v31 = vld [vmem:[#allocation12 + $0x4] ss:$16 sps:$4 sm:$0xff]   ;;  %v7575_v32 = vld [vmem:[#allocation12 + $0xc] ss:$16 sps:$4 sm:$0xff]  }
  0xd2   : > { %v7574_v33 = vld [vmem:[#allocation12] ss:$16 sps:$4 sm:$0xff]   ;;  %v7577_v34 = vld [vmem:[#allocation12 + $0x8] ss:$16 sps:$4 sm:$0xff]   ;;  %v7578_v35 = vld [vmem:[#allocation12 + $0x1e4] ss:$16 sps:$4 sm:$0xff]  }
  0xd3   : > { %1245 = vmatpush1.bf16.msra.mxu0 %v7544_v13  ;;  %1286 = vmatpush1.bf16.msra.mxu1 %v7547_v14  ;;  %v7581_v36 = vld [vmem:[#allocation12 + $0x1ec] ss:$16 sps:$4 sm:$0xff]   ;;  %v7580_v37 = vld [vmem:[#allocation12 + $0x1e0] ss:$16 sps:$4 sm:$0xff]   ;;  %v7583_v38 = vld [vmem:[#allocation12 + $0x1e8] ss:$16 sps:$4 sm:$0xff]  }
  0xd4   : > { %1246 = vmatprep.subr.bf16.mxu0 %v7548_v15  ;;  %1287 = vmatprep.subr.bf16.mxu1 %v7551_v16  ;;  %v7584_v39 = vld [vmem:[#allocation12 + $0x1c4] ss:$16 sps:$4 sm:$0xff]   ;;  %v7586_v54 = vld [vmem:[#allocation12 + $0x1c0] ss:$16 sps:$4 sm:$0xff]   ;;  %v7587_v55 = vld [vmem:[#allocation12 + $0x1cc] ss:$16 sps:$4 sm:$0xff]  }
  0xd5   : > { %v7589_v56 = vld [vmem:[#allocation12 + $0x1c8] ss:$16 sps:$4 sm:$0xff]   ;;  %v7590_v57 = vld [vmem:[#allocation12 + $0x1a4] ss:$16 sps:$4 sm:$0xff]   ;;  %v7592_v58 = vld [vmem:[#allocation12 + $0x1a0] ss:$16 sps:$4 sm:$0xff]  }
  0xd6   : > { %v7593_v59 = vld [vmem:[#allocation12 + $0x1ac] ss:$16 sps:$4 sm:$0xff]   ;;  %v7595_v60 = vld [vmem:[#allocation12 + $0x1a8] ss:$16 sps:$4 sm:$0xff]   ;;  %v7596_v61 = vld [vmem:[#allocation12 + $0x184] ss:$16 sps:$4 sm:$0xff]  }
  0xd7   : > { %1247 = vmatpush1.bf16.msra.mxu0 %v7550_v17  ;;  %1288 = vmatpush1.bf16.msra.mxu1 %v7553_v18  ;;  %v7598_v62 = vld [vmem:[#allocation12 + $0x180] ss:$16 sps:$4 sm:$0xff]   ;;  %v7599_v63 = vld [vmem:[#allocation12 + $0x18c] ss:$16 sps:$4 sm:$0xff]   ;;  %v7607_v4 = vld [vmem:[#allocation12 + $0x168] ss:$16 sps:$4 sm:$0xff]  }
  0xd8   : > { %1248 = vmatprep.subr.bf16.mxu0 %v7554_v19  ;;  %1289 = vmatprep.subr.bf16.mxu1 %v7557_v20  ;;  %v7605_v2 = vld [vmem:[#allocation12 + $0x16c] ss:$16 sps:$4 sm:$0xff]   ;;  %v7604_v3 = vld [vmem:[#allocation12 + $0x160] ss:$16 sps:$4 sm:$0xff]   ;;  %v7608_v5 = vld [vmem:[#allocation12 + $0x144] ss:$16 sps:$4 sm:$0xff]  }
  0xd9   : > { %v7611_v6 = vld [vmem:[#allocation12 + $0x14c] ss:$16 sps:$4 sm:$0xff]   ;;  %v7610_v7 = vld [vmem:[#allocation12 + $0x140] ss:$16 sps:$4 sm:$0xff]   ;;  %v7613_v8 = vld [vmem:[#allocation12 + $0x148] ss:$16 sps:$4 sm:$0xff]  }
  0xda   : > { %v7614_v9 = vld [vmem:[#allocation12 + $0x124] ss:$16 sps:$4 sm:$0xff]   ;;  %v7617_v10 = vld [vmem:[#allocation12 + $0x12c] ss:$16 sps:$4 sm:$0xff]   ;;  %v7616_v11 = vld [vmem:[#allocation12 + $0x120] ss:$16 sps:$4 sm:$0xff]  }
  0xdb   : > { %1249 = vmatpush1.bf16.msra.mxu0 %v7556_v21  ;;  %1290 = vmatpush1.bf16.msra.mxu1 %v7559_v22  ;;  %v7619_v12 = vld [vmem:[#allocation12 + $0x128] ss:$16 sps:$4 sm:$0xff]   ;;  %v7620_v13 = vld [vmem:[#allocation12 + $0x104] ss:$16 sps:$4 sm:$0xff]   ;;  %v7623_v14 = vld [vmem:[#allocation12 + $0x10c] ss:$16 sps:$4 sm:$0xff]   ;;  %v829_v21 = vlaneseq }
  0xdc   : > { %1250 = vmatprep.subr.bf16.mxu0 %v7560_v23  ;;  %1291 = vmatprep.subr.bf16.mxu1 %v7563_v24  ;;  %v7622_v15 = vld [vmem:[#allocation12 + $0x100] ss:$16 sps:$4 sm:$0xff]   ;;  %v7625_v16 = vld [vmem:[#allocation12 + $0x108] ss:$16 sps:$4 sm:$0xff]   ;;  %v7628_v17 = vld [vmem:[#allocation17 + $0xe4] ss:$16 sps:$4 sm:$0xff]  }
  0xdd   : > { %v8980_v22 = vshrl.u32 %v829_v21, 7  ;;  %s9331_s26 = sld [smem:[#allocation44_spill]]  ;;  %vm2803_vm1 = vcmask 1043456   ;;  %vm2775_vm3 = vcmask 64512   ;;  %s6323_s20 = sshll.u32 %s8911_s16, 3 }
  0xde   : > { %s9332_s4 = sld [smem:[#allocation37_spill]]  ;;  %s6044_s24 = scalar_lea.sflag [#allocation25], %s8911_s16 }
  0xdf   : > { %1251 = vmatpush1.bf16.msra.mxu0 %v7562_v25  ;;  %1292 = vmatpush1.bf16.msra.mxu1 %v7565_v26  ;;  %v8983_v23 = vsub.s32 0, %v8980_v22  ;;  %v8986_v24 = vsub.s32 1, %v8980_v22  ;;  %v809_v25 = vld [vmem:[%s9330_s25] sm:$0x3]  ;;  %s9333_s9 = sld [smem:[#allocation55_spill]]  ;;  %s8606_s11 = smov [#allocation24]  }
  0xe0   : > { %1252 = vmatprep.subr.bf16.mxu0 %v7566_v27  ;;  %1293 = vmatprep.subr.bf16.mxu1 %v7569_v28 }
  0xe1   : > { %v832_v27 = vrot.slane %v809_v25, %v8983_v23  ;;  %v836_v28 = vrot.slane %v809_v25, %v8986_v24  ;;  %v7661_v25 = vld [vmem:[#allocation17 + $0x184] ss:$16 sps:$4 sm:$0xff]  }
  0xe3   : > { %1253 = vmatpush1.bf16.msra.mxu0 %v7568_v29  ;;  %1294 = vmatpush1.bf16.msra.mxu1 %v7571_v30  ;;  %v810_v26 = vld [vmem:[%s9331_s26] sm:$0x3] }
  0xe4   : > { %1254 = vmatprep.subr.bf16.mxu0 %v7572_v31  ;;  %1295 = vmatprep.subr.bf16.mxu1 %v7575_v32  ;;  %v845_v31 = vrot.slane %v810_v26, %v8983_v23  ;;  %v849_v32 = vrot.slane %v810_v26, %v8986_v24  ;;  %v7776_v26 = vld [vmem:[#allocation17 + $0x1a8] ss:$16 sps:$4 sm:$0xff]   ;;  %s7025_s29 = sshll.u32 %s9332_s4, 7 }
  0xe5   : > { %s9176_s10 = scalar_lea.hbm %s9333_s9, %s7025_s29 }
  0xe7   : > { %1255 = vmatpush1.bf16.msra.mxu0 %v7574_v33  ;;  %1296 = vmatpush1.bf16.msra.mxu1 %v7577_v34 }
  0xe8   : > { %1256 = vmatprep.subr.bf16.mxu0 %v7578_v35  ;;  %1297 = vmatprep.subr.bf16.mxu1 %v7581_v36 }
  0xeb   : > { %1257 = vmatpush2.bf16.msra.mxu0 %v7580_v37  ;;  %1298 = vmatpush2.bf16.msra.mxu1 %v7583_v38 }
  0xec   : > { %1258 = vmatprep.subr.bf16.mxu0 %v7584_v39  ;;  %1299 = vmatprep.subr.bf16.mxu1 %v7587_v55  ;;  %v7626_v39 = vld [vmem:[#allocation17 + $0xe0] ss:$16 sps:$4 sm:$0xff]   ;;  %v7757_v55 = vld [vmem:[#allocation17 + $0x8c] ss:$16 sps:$4 sm:$0xff]  }
  0xef   : > { %1259 = vmatpush2.bf16.msra.mxu0 %v7586_v54  ;;  %1300 = vmatpush2.bf16.msra.mxu1 %v7589_v56  ;;  %v7752_v54 = vld [vmem:[#allocation17 + $0xa8] ss:$16 sps:$4 sm:$0xff]   ;;  %v7635_v56 = vld [vmem:[#allocation17 + $0x80] ss:$16 sps:$4 sm:$0xff]  }
  0xf0   : > { %1260 = vmatprep.subr.bf16.mxu0 %v7590_v57  ;;  %1301 = vmatprep.subr.bf16.mxu1 %v7593_v59  ;;  %v7640_v57 = vld [vmem:[#allocation17 + $0x64] ss:$16 sps:$4 sm:$0xff]   ;;  %v7760_v59 = vld [vmem:[#allocation17 + $0x6c] ss:$16 sps:$4 sm:$0xff]  }
  0xf3   : > { %1261 = vmatpush2.bf16.msra.mxu0 %v7592_v58  ;;  %1302 = vmatpush2.bf16.msra.mxu1 %v7595_v60  ;;  %v7755_v58 = vld [vmem:[#allocation17 + $0x88] ss:$16 sps:$4 sm:$0xff]   ;;  %v7638_v60 = vld [vmem:[#allocation17 + $0x60] ss:$16 sps:$4 sm:$0xff]  }
  0xf4   : > { %1262 = vmatprep.subr.bf16.mxu0 %v7596_v61  ;;  %1303 = vmatprep.subr.bf16.mxu1 %v7599_v63  ;;  %v7643_v61 = vld [vmem:[#allocation17 + $0x44] ss:$16 sps:$4 sm:$0xff]   ;;  %v7763_v63 = vld [vmem:[#allocation17 + $0x4c] ss:$16 sps:$4 sm:$0xff]  }
  0xf7   : > { %1263 = vmatpush2.bf16.msra.mxu0 %v7598_v62  ;;  %v7758_v62 = vld [vmem:[#allocation17 + $0x68] ss:$16 sps:$4 sm:$0xff]  }
 0x153   : > { %v2372_v40 = vpop.xlane.xlu1 %2371  ;;  %v813_v41 = vpop.xlane.xlu0 %812 }
 0x154   : > { %v2374_v42 = vmul.f32 0.00390625, %v2372_v40  ;;  %v815_v43 = vmul.f32 0.00390625, %v813_v41  ;;  %v7676_v41 = vld [vmem:[%s8925_s28 + $0x4] ss:$8 sps:$4 sm:$0xff]  }
 0x156   : > { %v8960_v44 = vsub.f32 %v8952_v0, %v2374_v42  ;;  %v8963_v45 = vsub.f32 %v8955_v1, %v2374_v42  ;;  %v8966_v46 = vsub.f32 %v8952_v0, %v815_v43  ;;  %v8969_v47 = vsub.f32 %v8955_v1, %v815_v43  ;;  %v7601_v0 = vld [vmem:[#allocation12 + $0x188] ss:$16 sps:$4 sm:$0xff]   ;;  %v7602_v1 = vld [vmem:[#allocation12 + $0x164] ss:$16 sps:$4 sm:$0xff]  }
 0x157   : > { %1304 = vmatpush2.bf16.msra.mxu1 %v7601_v0  ;;  %1264 = vmatprep.subr.bf16.mxu0 %v7602_v1  ;;  %v7631_v42 = vld [vmem:[#allocation17 + $0xc4] ss:$16 sps:$4 sm:$0xff]   ;;  %v7746_v43 = vld [vmem:[#allocation17 + $0xe8] ss:$16 sps:$4 sm:$0xff]   ;;  %v7641_v0 = vld [vmem:[#allocation17 + $0x40] ss:$16 sps:$4 sm:$0xff]  }
 0x158   : > { %v2377_v48 = vmul.f32 %v8960_v44, %v8960_v44  ;;  %v2378_v49 = vmul.f32 %v8963_v45, %v8963_v45  ;;  %v818_v50 = vmul.f32 %v8966_v46, %v8966_v46  ;;  %v819_v51 = vmul.f32 %v8969_v47, %v8969_v47  ;;  %1305 = vmatprep.subr.bf16.mxu1 %v7605_v2  ;;  %v7646_v1 = vld [vmem:[#allocation17 + $0x24] ss:$16 sps:$4 sm:$0xff]   ;;  %v7761_v2 = vld [vmem:[#allocation17 + $0x48] ss:$16 sps:$4 sm:$0xff]  }
 0x159   : > { %1265 = vmatpush2.bf16.msra.mxu0 %v7604_v3  ;;  %v7766_v3 = vld [vmem:[#allocation17 + $0x2c] ss:$16 sps:$4 sm:$0xff]  }
 0x15a   : > { %v2379_v52 = vadd.f32 %v2378_v49, %v2377_v48  ;;  %v820_v53 = vadd.f32 %v819_v51, %v818_v50  ;;  %1266 = vmatprep.subr.bf16.mxu0 %v7608_v5  ;;  %v7629_v48 = vld [vmem:[#allocation17 + $0xc0] ss:$16 sps:$4 sm:$0xff]   ;;  %v7751_v49 = vld [vmem:[#allocation17 + $0xcc] ss:$16 sps:$4 sm:$0xff]   ;;  %v7749_v50 = vld [vmem:[#allocation17 + $0xc8] ss:$16 sps:$4 sm:$0xff]  }
 0x15b   : > { %1306 = vmatpush2.bf16.msra.mxu1 %v7607_v4  ;;  %v7754_v51 = vld [vmem:[#allocation17 + $0xac] ss:$16 sps:$4 sm:$0xff]   ;;  %v7644_v4 = vld [vmem:[#allocation17 + $0x20] ss:$16 sps:$4 sm:$0xff]   ;;  %v7649_v5 = vld [vmem:[#allocation17 + $0x4] ss:$16 sps:$4 sm:$0xff]  }
 0x15c   : > { %2380 = vadd.xlane.f32.xlu1 %v2379_v52  ;;  %821 = vadd.xlane.f32.xlu0 %v820_v53  ;;  %v7632_v52 = vld [vmem:[#allocation17 + $0xa0] ss:$16 sps:$4 sm:$0xff]   ;;  %v7637_v53 = vld [vmem:[#allocation17 + $0x84] ss:$16 sps:$4 sm:$0xff]  }
 0x15d   : > { %1307 = vmatprep.subr.bf16.mxu1 %v7611_v6  ;;  %1267 = vmatpush2.bf16.msra.mxu0 %v7610_v7  ;;  %v7764_v6 = vld [vmem:[#allocation17 + $0x28] ss:$16 sps:$4 sm:$0xff]   ;;  %v7769_v7 = vld [vmem:[#allocation17 + $0xc] ss:$16 sps:$4 sm:$0xff]  }
 0x15e   : > { %1268 = vmatprep.subr.bf16.mxu0 %v7614_v9  ;;  %v7652_v9 = vld [vmem:[#allocation17 + $0x1e4] ss:$16 sps:$4 sm:$0xff]  }
 0x15f   : > { %1308 = vmatpush2.bf16.msra.mxu1 %v7613_v8  ;;  %v7647_v8 = vld [vmem:[#allocation17] ss:$16 sps:$4 sm:$0xff]  }
 0x160   : > { %1309 = vmatprep.subr.bf16.mxu1 %v7617_v10  ;;  %v7767_v10 = vld [vmem:[#allocation17 + $0x8] ss:$16 sps:$4 sm:$0xff]  }
 0x161   : > { %1269 = vmatpush2.bf16.msra.mxu0 %v7616_v11  ;;  %v7772_v11 = vld [vmem:[#allocation17 + $0x1ec] ss:$16 sps:$4 sm:$0xff]  }
 0x162   : > { %1270 = vmatprep.subr.bf16.mxu0 %v7620_v13  ;;  %v7655_v13 = vld [vmem:[#allocation17 + $0x1c4] ss:$16 sps:$4 sm:$0xff]  }
 0x163   : > { %1310 = vmatpush2.bf16.msra.mxu1 %v7619_v12  ;;  %v7650_v12 = vld [vmem:[#allocation17 + $0x1e0] ss:$16 sps:$4 sm:$0xff]  }
 0x164   : > { %1311 = vmatprep.subr.bf16.mxu1 %v7623_v14  ;;  %v7770_v14 = vld [vmem:[#allocation17 + $0x1e8] ss:$16 sps:$4 sm:$0xff]  }
 0x165   : > { %1271 = vmatpush2.bf16.msra.mxu0 %v7622_v15  ;;  %v7775_v15 = vld [vmem:[#allocation17 + $0x1cc] ss:$16 sps:$4 sm:$0xff]  }
 0x166   : > { %1802 = vmatprep.subr.bf16.mxu0 %v7628_v17  ;;  %v7658_v17 = vld [vmem:[#allocation17 + $0x1a4] ss:$16 sps:$4 sm:$0xff]  }
 0x167   : > { %1312 = vmatpush2.bf16.msra.mxu1 %v7625_v16  ;;  %v7653_v16 = vld [vmem:[#allocation17 + $0x1c0] ss:$16 sps:$4 sm:$0xff]  }
 0x1e5   : > { %v822_v18 = vpop.xlane.xlu0 %821 }
 0x1e6   : > { %v823_v19 = vmul.f32 0.00390625, %v822_v18  ;;  %v7773_v18 = vld [vmem:[#allocation17 + $0x1c8] ss:$16 sps:$4 sm:$0xff]  }
 0x1e8   : > { %v824_v20 = vadd.f32 1e-05, %v823_v19  ;;  %v7778_v19 = vld [vmem:[#allocation17 + $0x1ac] ss:$16 sps:$4 sm:$0xff]  }
 0x1ea   : > { %8162 = vrsqrt.f32 %v824_v20  ;;  %v7656_v20 = vld [vmem:[#allocation17 + $0x1a0] ss:$16 sps:$4 sm:$0xff]  }
 0x1f7   : > { %v8163_v29 = vpop.eup %8162 }
 0x1f8   : > { %v827_v30 = vmul.f32 %v8163_v29, %v8969_v47  ;;  %v826_v33 = vmul.f32 %v8163_v29, %v8966_v46  ;;  %v7748_v47 = vld [vmem:[#allocation17 + $0xec] ss:$16 sps:$4 sm:$0xff]   ;;  %v7634_v46 = vld [vmem:[#allocation17 + $0xa4] ss:$16 sps:$4 sm:$0xff]  }
 0x1f9   : > { %1915 = vmatprep.subr.bf16.mxu1 %v7748_v47  ;;  %v7664_v29 = vld [vmem:[#allocation17 + $0x164] ss:$16 sps:$4 sm:$0xff]   ;;  %v7677_v47 = vld [vmem:[#allocation11 + $0x70] ss:$8 sps:$4 sm:$0xff]  }
 0x1fa   : > { %v840_v34 = vmul.f32 %v836_v28, %v827_v30  ;;  %v839_v35 = vmul.f32 %v832_v27, %v826_v33  ;;  %v7781_v27 = vld [vmem:[#allocation17 + $0x18c] ss:$16 sps:$4 sm:$0xff]   ;;  %v7659_v28 = vld [vmem:[#allocation17 + $0x180] ss:$16 sps:$4 sm:$0xff]   ;;  %v7779_v30 = vld [vmem:[#allocation17 + $0x188] ss:$16 sps:$4 sm:$0xff]  }
 0x1fb   : > { %v7667_v33 = vld [vmem:[#allocation17 + $0x144] ss:$16 sps:$4 sm:$0xff]  }
 0x1fc   : > { %v853_v36 = vadd.f32 %v849_v32, %v840_v34  ;;  %v852_v37 = vadd.f32 %v845_v31, %v839_v35  ;;  %v7784_v31 = vld [vmem:[#allocation17 + $0x16c] ss:$16 sps:$4 sm:$0xff]   ;;  %v7662_v32 = vld [vmem:[#allocation17 + $0x160] ss:$16 sps:$4 sm:$0xff]   ;;  %v7782_v34 = vld [vmem:[#allocation17 + $0x168] ss:$16 sps:$4 sm:$0xff]  }
 0x1fd   : > { %v7787_v35 = vld [vmem:[#allocation17 + $0x14c] ss:$16 sps:$4 sm:$0xff]  }
 0x1fe   : > { %v855_v38 = vpack.c.bf16 %v853_v36, %v853_v36  ;;  %v854_v40 = vpack.c.bf16 %v852_v37, %v852_v37  ;;  %v7665_v36 = vld [vmem:[#allocation17 + $0x140] ss:$16 sps:$4 sm:$0xff]   ;;  %v7670_v37 = vld [vmem:[#allocation17 + $0x124] ss:$16 sps:$4 sm:$0xff]  }
 0x200   : > { %1272 = vmatprep.mubr.bf16.mxu0 %v855_v38  ;;  %1313 = vmatprep.mubr.bf16.mxu1 %v855_v38  ;;  %v7785_v38 = vld [vmem:[#allocation17 + $0x148] ss:$16 sps:$4 sm:$0xff]  }
 0x201   : > { %1273 = vmatmul.mubr.bf16.vlgmr.msra.gmra.mxu0 %v854_v40  ;;  %1314 = vmatmul.mubr.bf16.vlgmr.msra.gmra.mxu1 %v854_v40  ;;  %v7673_v40 = vld [vmem:[#allocation17 + $0x104] ss:$16 sps:$4 sm:$0xff]  }
 0x202   : > { %1803 = vmatpush1.bf16.msra.mxu0 %v7626_v39  ;;  %1834 = vmatprep.mubr.bf16.mxu0 %v7676_v41  ;;  %v7668_v39 = vld [vmem:[#allocation17 + $0x120] ss:$16 sps:$4 sm:$0xff]  }
 0x203   : > { %1804 = vmatprep.subr.bf16.mxu0 %v7631_v42  ;;  %1916 = vmatpush1.bf16.msra.mxu1 %v7746_v43  ;;  %v7679_v42 = vld [vmem:[#allocation11 + $0x74] ss:$8 sps:$4 sm:$0xff]   ;;  %v7674_v43 = vld [vmem:[%s8925_s28] ss:$8 sps:$4 sm:$0xff]  }
 0x204   : > { %1947 = vmatprep.mubr.bf16.mxu1 %v7676_v41  ;;  %1917 = vmatprep.subr.bf16.mxu1 %v7751_v49  ;;  %v7671_v41 = vld [vmem:[#allocation17 + $0x100] ss:$16 sps:$4 sm:$0xff]   ;;  %v7682_v49 = vld [vmem:[#allocation11 + $0x64] ss:$8 sps:$4 sm:$0xff]  }
 0x206   : > { %1805 = vmatpush1.bf16.msra.mxu0 %v7629_v48  ;;  %v7683_v48 = vld [vmem:[%s8925_s28 + $0x14] ss:$8 sps:$4 sm:$0xff]  }
 0x207   : > { %1806 = vmatprep.subr.bf16.mxu0 %v7634_v46  ;;  %1918 = vmatpush1.bf16.msra.mxu1 %v7749_v50  ;;  %v7680_v46 = vld [vmem:[#allocation11 + $0x60] ss:$8 sps:$4 sm:$0xff]   ;;  %v7790_v50 = vld [vmem:[#allocation17 + $0x12c] ss:$16 sps:$4 sm:$0xff]  }
 0x208   : > { %1919 = vmatprep.subr.bf16.mxu1 %v7754_v51  ;;  %v7688_v51 = vld [vmem:[#allocation11 + $0x54] ss:$8 sps:$4 sm:$0xff]  }
 0x20a   : > { %1807 = vmatpush1.bf16.msra.mxu0 %v7632_v52  ;;  %v7788_v52 = vld [vmem:[#allocation17 + $0x128] ss:$16 sps:$4 sm:$0xff]  }
 0x20b   : > { %1808 = vmatprep.subr.bf16.mxu0 %v7637_v53  ;;  %1920 = vmatpush1.bf16.msra.mxu1 %v7752_v54  ;;  %v7685_v53 = vld [vmem:[%s8925_s28 + $0x10] ss:$8 sps:$4 sm:$0xff]  }
 0x20c   : > { %1921 = vmatprep.subr.bf16.mxu1 %v7757_v55  ;;  %v7686_v54 = vld [vmem:[#allocation11 + $0x50] ss:$8 sps:$4 sm:$0xff]   ;;  %v7692_v55 = vld [vmem:[%s8925_s28 + $0x24] ss:$8 sps:$4 sm:$0xff]  }
 0x20e   : > { %1809 = vmatpush1.bf16.msra.mxu0 %v7635_v56  ;;  %v7793_v56 = vld [vmem:[#allocation17 + $0x10c] ss:$16 sps:$4 sm:$0xff]  }
 0x20f   : > { %1810 = vmatprep.subr.bf16.mxu0 %v7640_v57  ;;  %1922 = vmatpush1.bf16.msra.mxu1 %v7755_v58  ;;  %v7691_v57 = vld [vmem:[#allocation11 + $0x44] ss:$8 sps:$4 sm:$0xff]   ;;  %v7791_v58 = vld [vmem:[#allocation17 + $0x108] ss:$16 sps:$4 sm:$0xff]  }
 0x210   : > { %1923 = vmatprep.subr.bf16.mxu1 %v7760_v59  ;;  %v7689_v59 = vld [vmem:[#allocation11 + $0x40] ss:$8 sps:$4 sm:$0xff]  }
 0x212   : > { %1811 = vmatpush1.bf16.msra.mxu0 %v7638_v60  ;;  %v7697_v60 = vld [vmem:[#allocation11 + $0x34] ss:$8 sps:$4 sm:$0xff]  }
 0x213   : > { %1812 = vmatprep.subr.bf16.mxu0 %v7643_v61  ;;  %1924 = vmatpush1.bf16.msra.mxu1 %v7758_v62  ;;  %v8604_v61 = vmov 0.0   ;;  %v7694_v62 = vld [vmem:[%s8925_s28 + $0x20] ss:$8 sps:$4 sm:$0xff]  }
 0x214   : > { %1925 = vmatprep.subr.bf16.mxu1 %v7763_v63  ;;  %v7695_v63 = vld [vmem:[#allocation11 + $0x30] ss:$8 sps:$4 sm:$0xff]  }
 0x216   : > { %1813 = vmatpush1.bf16.msra.mxu0 %v7641_v0  ;;  %v7701_v0 = vld [vmem:[%s8925_s28 + $0x34] ss:$8 sps:$4 sm:$0xff]  }
 0x217   : > { %1814 = vmatprep.subr.bf16.mxu0 %v7646_v1  ;;  %1926 = vmatpush1.bf16.msra.mxu1 %v7761_v2  ;;  %v7700_v1 = vld [vmem:[#allocation11 + $0x24] ss:$8 sps:$4 sm:$0xff]   ;;  %v2381_v2 = vpop.xlane.xlu1 %2380 }
 0x218   : > { %1927 = vmatprep.subr.bf16.mxu1 %v7766_v3  ;;  %v7698_v3 = vld [vmem:[#allocation11 + $0x20] ss:$8 sps:$4 sm:$0xff]  }
 0x21a   : > { %1815 = vmatpush1.bf16.msra.mxu0 %v7644_v4  ;;  %v7706_v4 = vld [vmem:[#allocation11 + $0x14] ss:$8 sps:$4 sm:$0xff]  }
 0x21b   : > { %1816 = vmatprep.subr.bf16.mxu0 %v7649_v5  ;;  %1928 = vmatpush1.bf16.msra.mxu1 %v7764_v6  ;;  %v2382_v5 = vmul.f32 0.00390625, %v2381_v2  ;;  %v7703_v6 = vld [vmem:[%s8925_s28 + $0x30] ss:$8 sps:$4 sm:$0xff]  }
 0x21c   : > { %1929 = vmatprep.subr.bf16.mxu1 %v7769_v7  ;;  %v7704_v7 = vld [vmem:[#allocation11 + $0x10] ss:$8 sps:$4 sm:$0xff]  }
 0x21e   : > { %1817 = vmatpush1.bf16.msra.mxu0 %v7647_v8  ;;  %v7710_v8 = vld [vmem:[%s8925_s28 + $0x44] ss:$8 sps:$4 sm:$0xff]  }
 0x21f   : > { %1818 = vmatprep.subr.bf16.mxu0 %v7652_v9  ;;  %1930 = vmatpush1.bf16.msra.mxu1 %v7767_v10  ;;  %v7709_v9 = vld [vmem:[#allocation11 + $0x4] ss:$8 sps:$4 sm:$0xff]   ;;  %v2383_v10 = vadd.f32 1e-05, %v2382_v5 }
 0x220   : > { %1931 = vmatprep.subr.bf16.mxu1 %v7772_v11  ;;  %v7707_v11 = vld [vmem:[#allocation11] ss:$8 sps:$4 sm:$0xff]  }
 0x221   : > { %8164 = vrsqrt.f32 %v2383_v10 }
 0x222   : > { %1819 = vmatpush2.bf16.msra.mxu0 %v7650_v12  ;;  %v7715_v12 = vld [vmem:[#allocation11 + $0xf4] ss:$8 sps:$4 sm:$0xff]  }
 0x223   : > { %1820 = vmatprep.subr.bf16.mxu0 %v7655_v13  ;;  %1932 = vmatpush2.bf16.msra.mxu1 %v7770_v14  ;;  %v7712_v13 = vld [vmem:[%s8925_s28 + $0x40] ss:$8 sps:$4 sm:$0xff]   ;;  %v7713_v14 = vld [vmem:[#allocation11 + $0xf0] ss:$8 sps:$4 sm:$0xff]  }
 0x224   : > { %1933 = vmatprep.subr.bf16.mxu1 %v7775_v15  ;;  %v7719_v15 = vld [vmem:[%s8925_s28 + $0x54] ss:$8 sps:$4 sm:$0xff]  }
 0x226   : > { %1821 = vmatpush2.bf16.msra.mxu0 %v7653_v16  ;;  %v7718_v16 = vld [vmem:[#allocation11 + $0xe4] ss:$8 sps:$4 sm:$0xff]  }
 0x227   : > { %1822 = vmatprep.subr.bf16.mxu0 %v7658_v17  ;;  %1934 = vmatpush2.bf16.msra.mxu1 %v7773_v18  ;;  %v7716_v17 = vld [vmem:[#allocation11 + $0xe0] ss:$8 sps:$4 sm:$0xff]   ;;  %v7724_v18 = vld [vmem:[#allocation11 + $0xd4] ss:$8 sps:$4 sm:$0xff]  }
 0x228   : > { %1935 = vmatprep.subr.bf16.mxu1 %v7778_v19  ;;  %v7721_v19 = vld [vmem:[%s8925_s28 + $0x50] ss:$8 sps:$4 sm:$0xff]  }
 0x22a   : > { %1823 = vmatpush2.bf16.msra.mxu0 %v7656_v20  ;;  %v7722_v20 = vld [vmem:[#allocation11 + $0xd0] ss:$8 sps:$4 sm:$0xff]  }
 0x22b   : > { %1824 = vmatprep.subr.bf16.mxu0 %v7661_v25  ;;  %1936 = vmatpush2.bf16.msra.mxu1 %v7776_v26  ;;  %v7728_v25 = vld [vmem:[%s8925_s28 + $0x64] ss:$8 sps:$4 sm:$0xff]  }
 0x22c   : > { %1937 = vmatprep.subr.bf16.mxu1 %v7781_v27  ;;  %v7727_v26 = vld [vmem:[#allocation11 + $0xc4] ss:$8 sps:$4 sm:$0xff]  }
 0x22e   : > { %1825 = vmatpush2.bf16.msra.mxu0 %v7659_v28  ;;  %v8165_v27 = vpop.eup %8164  ;;  %v2368_v28 = vld [vmem:[%s9330_s25] sm:$0x3] }
 0x22f   : > { %1826 = vmatprep.subr.bf16.mxu0 %v7664_v29  ;;  %1938 = vmatpush2.bf16.msra.mxu1 %v7779_v30  ;;  %v7725_v29 = vld [vmem:[#allocation11 + $0xc0] ss:$8 sps:$4 sm:$0xff]   ;;  %v7733_v30 = vld [vmem:[#allocation11 + $0xb4] ss:$8 sps:$4 sm:$0xff]  }
 0x230   : > { %1939 = vmatprep.subr.bf16.mxu1 %v7784_v31  ;;  %v2386_v31 = vmul.f32 %v8165_v27, %v8963_v45  ;;  %v7734_v45 = vld [vmem:[#allocation11 + $0xa0] ss:$8 sps:$4 sm:$0xff]  }
 0x232   : > { %1827 = vmatpush2.bf16.msra.mxu0 %v7662_v32  ;;  %v2395_v32 = vrot.slane %v2368_v28, %v8986_v24 }
 0x233   : > { %1828 = vmatprep.subr.bf16.mxu0 %v7667_v33  ;;  %1940 = vmatpush2.bf16.msra.mxu1 %v7782_v34  ;;  %v7730_v33 = vld [vmem:[%s8925_s28 + $0x60] ss:$8 sps:$4 sm:$0xff]   ;;  %v2369_v34 = vld [vmem:[%s9331_s26] sm:$0x3] }
 0x234   : > { %1941 = vmatprep.subr.bf16.mxu1 %v7787_v35  ;;  %v7731_v35 = vld [vmem:[#allocation11 + $0xb0] ss:$8 sps:$4 sm:$0xff]  }
 0x236   : > { %1829 = vmatpush2.bf16.msra.mxu0 %v7665_v36  ;;  %v7737_v36 = vld [vmem:[%s8925_s28 + $0x74] ss:$8 sps:$4 sm:$0xff]  }
 0x237   : > { %1830 = vmatprep.subr.bf16.mxu0 %v7670_v37  ;;  %1942 = vmatpush2.bf16.msra.mxu1 %v7785_v38  ;;  %v7736_v37 = vld [vmem:[#allocation11 + $0xa4] ss:$8 sps:$4 sm:$0xff]   ;;  %v2399_v38 = vmul.f32 %v2395_v32, %v2386_v31 }
 0x238   : > { %1943 = vmatprep.subr.bf16.mxu1 %v7790_v50  ;;  %v7745_v50 = vld [vmem:[#allocation11 + $0x84] ss:$8 sps:$4 sm:$0xff]  }
 0x23a   : > { %1831 = vmatpush2.bf16.msra.mxu0 %v7668_v39  ;;  %v2408_v39 = vrot.slane %v2369_v34, %v8986_v24 }
 0x23b   : > { %1832 = vmatprep.subr.bf16.mxu0 %v7673_v40  ;;  %1944 = vmatpush2.bf16.msra.mxu1 %v7788_v52  ;;  %v7742_v40 = vld [vmem:[#allocation11 + $0x94] ss:$8 sps:$4 sm:$0xff]   ;;  %v7743_v52 = vld [vmem:[#allocation11 + $0x80] ss:$8 sps:$4 sm:$0xff]  }
 0x23c   : > { %1945 = vmatprep.subr.bf16.mxu1 %v7793_v56 }
 0x23e   : > { %1833 = vmatpush2.bf16.msra.mxu0 %v7671_v41  ;;  %v2385_v41 = vmul.f32 %v8165_v27, %v8960_v44 }
 0x23f   : > { %2607 = vmatprep.subr.bf16.mxu0 %v7679_v42  ;;  %1946 = vmatpush2.bf16.msra.mxu1 %v7791_v58  ;;  %v2391_v42 = vrot.slane %v2368_v28, %v8983_v23 }
 0x240   : > { %7263 = vmatprep.subr.bf16.mxu1 %v8604_v61 }
 0x241   : > { %1835 = vmatmul.mubr.bf16.vlgmr.msra.gmra.mxu0 %v7674_v43 }
 0x242   : > { %2608 = vmatpush1.bf16.msra.mxu0 %v7677_v47  ;;  %1844 = vmatprep.mubr.bf16.mxu0 %v7683_v48  ;;  %v7739_v47 = vld [vmem:[%s8925_s28 + $0x70] ss:$8 sps:$4 sm:$0xff]  }
 0x243   : > { %2609 = vmatprep.subr.bf16.mxu0 %v7682_v49  ;;  %1948 = vmatmul.mubr.bf16.vlgmr.msra.gmra.mxu1 %v7674_v43  ;;  %v2412_v43 = vadd.f32 %v2408_v39, %v2399_v38  ;;  %v2398_v49 = vmul.f32 %v2391_v42, %v2385_v41 }
 0x244   : > { %1957 = vmatprep.mubr.bf16.mxu1 %v7683_v48  ;;  %v7740_v48 = vld [vmem:[#allocation11 + $0x90] ss:$8 sps:$4 sm:$0xff]  }
 0x246   : > { %2610 = vmatpush1.bf16.msra.mxu0 %v7680_v46  ;;  %v2404_v46 = vrot.slane %v2369_v34, %v8983_v23 }
 0x247   : > { %2611 = vmatprep.subr.bf16.mxu0 %v7688_v51  ;;  %v2414_v51 = vpack.c.bf16 %v2412_v43, %v2412_v43 }
 0x249   : > { %1845 = vmatmul.mubr.bf16.gmra.mxu0 %v7685_v53 }
 0x24a   : > { %2612 = vmatpush1.bf16.msra.mxu0 %v7686_v54  ;;  %1854 = vmatprep.mubr.bf16.mxu0 %v7692_v55 }
 0x24b   : > { %2613 = vmatprep.subr.bf16.mxu0 %v7691_v57  ;;  %1958 = vmatmul.mubr.bf16.gmra.mxu1 %v7685_v53  ;;  %v2411_v53 = vadd.f32 %v2404_v46, %v2398_v49 }
 0x24c   : > { %1967 = vmatprep.mubr.bf16.mxu1 %v7692_v55 }
 0x24d   : > { %v2413_v44 = vpack.c.bf16 %v2411_v53, %v2411_v53 }
 0x24e   : > { %2614 = vmatpush1.bf16.msra.mxu0 %v7689_v59 }
 0x24f   : > { %2615 = vmatprep.subr.bf16.mxu0 %v7697_v60 }
 0x251   : > { %1855 = vmatmul.mubr.bf16.gmra.mxu0 %v7694_v62 }
 0x252   : > { %2616 = vmatpush1.bf16.msra.mxu0 %v7695_v63  ;;  %1864 = vmatprep.mubr.bf16.mxu0 %v7701_v0 }
 0x253   : > { %2617 = vmatprep.subr.bf16.mxu0 %v7700_v1  ;;  %1968 = vmatmul.mubr.bf16.gmra.mxu1 %v7694_v62 }
 0x254   : > { %1977 = vmatprep.mubr.bf16.mxu1 %v7701_v0 }
 0x256   : > { %2618 = vmatpush1.bf16.msra.mxu0 %v7698_v3 }
 0x257   : > { %2619 = vmatprep.subr.bf16.mxu0 %v7706_v4 }
 0x259   : > { %1865 = vmatmul.mubr.bf16.gmra.mxu0 %v7703_v6 }
 0x25a   : > { %2620 = vmatpush1.bf16.msra.mxu0 %v7704_v7  ;;  %1874 = vmatprep.mubr.bf16.mxu0 %v7710_v8 }
 0x25b   : > { %2621 = vmatprep.subr.bf16.mxu0 %v7709_v9  ;;  %1978 = vmatmul.mubr.bf16.gmra.mxu1 %v7703_v6 }
 0x25c   : > { %1987 = vmatprep.mubr.bf16.mxu1 %v7710_v8 }
 0x25e   : > { %2622 = vmatpush1.bf16.msra.mxu0 %v7707_v11 }
 0x25f   : > { %2623 = vmatprep.subr.bf16.mxu0 %v7715_v12 }
 0x261   : > { %1875 = vmatmul.mubr.bf16.gmra.mxu0 %v7712_v13 }
 0x262   : > { %2624 = vmatpush2.bf16.msra.mxu0 %v7713_v14  ;;  %1884 = vmatprep.mubr.bf16.mxu0 %v7719_v15 }
 0x263   : > { %2625 = vmatprep.subr.bf16.mxu0 %v7718_v16  ;;  %1988 = vmatmul.mubr.bf16.gmra.mxu1 %v7712_v13 }
 0x264   : > { %1997 = vmatprep.mubr.bf16.mxu1 %v7719_v15 }
 0x266   : > { %2626 = vmatpush2.bf16.msra.mxu0 %v7716_v17 }
 0x267   : > { %2627 = vmatprep.subr.bf16.mxu0 %v7724_v18 }
 0x269   : > { %1885 = vmatmul.mubr.bf16.gmra.mxu0 %v7721_v19 }
 0x26a   : > { %2628 = vmatpush2.bf16.msra.mxu0 %v7722_v20  ;;  %1894 = vmatprep.mubr.bf16.mxu0 %v7728_v25 }
 0x26b   : > { %2629 = vmatprep.subr.bf16.mxu0 %v7727_v26  ;;  %1998 = vmatmul.mubr.bf16.gmra.mxu1 %v7721_v19 }
 0x26c   : > { %2007 = vmatprep.mubr.bf16.mxu1 %v7728_v25 }
 0x26e   : > { %2630 = vmatpush2.bf16.msra.mxu0 %v7725_v29 }
 0x26f   : > { %2631 = vmatprep.subr.bf16.mxu0 %v7733_v30 }
 0x271   : > { %1895 = vmatmul.mubr.bf16.gmra.mxu0 %v7730_v33 }
 0x272   : > { %2632 = vmatpush2.bf16.msra.mxu0 %v7731_v35  ;;  %1904 = vmatprep.mubr.bf16.mxu0 %v7737_v36 }
 0x273   : > { %2633 = vmatprep.subr.bf16.mxu0 %v7736_v37  ;;  %2008 = vmatmul.mubr.bf16.gmra.mxu1 %v7730_v33 }
 0x274   : > { %2017 = vmatprep.mubr.bf16.mxu1 %v7737_v36 }
 0x276   : > { %2634 = vmatpush2.bf16.msra.mxu0 %v7734_v45 }
 0x277   : > { %2635 = vmatprep.subr.bf16.mxu0 %v7742_v40 }
 0x279   : > { %1905 = vmatmul.mubr.bf16.gmra.mxu0 %v7739_v47 }
 0x27a   : > { %2636 = vmatpush2.bf16.msra.mxu0 %v7740_v48  ;;  %2639 = vmatprep.mubr.bf16.mxu0 %v2414_v51 }
 0x27b   : > { %2637 = vmatprep.subr.bf16.mxu0 %v7745_v50  ;;  %2018 = vmatmul.mubr.bf16.gmra.mxu1 %v7739_v47 }
 0x27c   : > { %7265 = vmatprep.mubr.msk.bf16.mxu1 %vm8605_vm0, %v8604_v61 }
 0x27e   : > { %2638 = vmatpush2.bf16.msra.mxu0 %v7743_v52 }
 0x27f   : > { %7269 = vmatprep.subr.bf16.mxu0 %v8604_v61 }
 0x281   : > { %2640 = vmatmul.mubr.bf16.vlgmr.msra.gmra.mxu0 %v2413_v44 }
 0x282   : > { %7271 = vmatprep.mubr.msk.bf16.mxu0 %vm8605_vm0, %v8604_v61 }
 0x2c1   : > { %v1274_v54 = vpop.f32.mrf.mxu0  ;;  %v1315_v55 = vpop.f32.mrf.mxu1 }
 0x2c2   : > { %v2028_v56 = vpack.c.bf16 %v1274_v54, %v1274_v54  ;;  %v2030_v57 = vpack.c.bf16 %v1315_v55, %v1315_v55 }
 0x2c3   : > { %v1276_v58 = vpop.f32.mrf.mxu0  ;;  %v1317_v59 = vpop.f32.mrf.mxu1 }
 0x2c4   : > { %2029 = vst [vmem:[#allocation2] sm:$0xf] %v2028_v56  ;;  %2031 = vst [vmem:[#allocation3] sm:$0xf] %v2030_v57  ;;  %v2192_v60 = vpack.c.bf16 %v1276_v58, %v1276_v58  ;;  %v2195_v62 = vpack.c.bf16 %v1317_v59, %v1317_v59 }
 0x2c5   : > { %v1278_v63 = vpop.f32.mrf.mxu0  ;;  %v1319_v0 = vpop.f32.mrf.mxu1 }
 0x2c6   : > { %2194 = vst [vmem:[#allocation2 + $0x4] sm:$0xf] %v2192_v60  ;;  %2197 = vst [vmem:[#allocation3 + $0x4] sm:$0xf] %v2195_v62 }
 0x2c7   : > { %v1279_v1 = vpop.f32.mrf.mxu0  ;;  %v1320_v2 = vpop.f32.mrf.mxu1 }
 0x2cb   : > { %v2655_v3 = vld [vmem:[#allocation2] sm:$0xf] }
 0x2cc   : > { %7264 = vmatpush3.bf16.xpose.msra.mxu1 %v2655_v3 }
 0x2cd   : > { %v2656_v4 = vld [vmem:[#allocation2 + $0x4] sm:$0xf]  ;;  %7275 = vmatprep.subr.bf16.mxu1 %v8604_v61 }
 0x2ce   : > { %7270 = vmatpush3.bf16.xpose.msra.mxu0 %v2656_v4 }
 0x2cf   : > { %7281 = vmatprep.subr.bf16.mxu0 %v8604_v61 }
 0x301   : > { %v1836_v5 = vpop.f32.mrf.mxu0 }
 0x303   : > { %v1838_v6 = vpop.f32.mrf.mxu0  ;;  %v1949_v13 = vpop.f32.mrf.mxu1 }
 0x305   : > { %v1840_v7 = vpop.f32.mrf.mxu0  ;;  %v1951_v16 = vpop.f32.mrf.mxu1 }
 0x306   : > { %v7029_v8 = vpack.c.bf16 %v1840_v7, %v1836_v5 }
 0x307   : > { %v1842_v9 = vpop.f32.mrf.mxu0  ;;  %v1953_v19 = vpop.f32.mrf.mxu1 }
 0x308   : > { %7030 = vst [vmem:[#allocation4] sm:$0xff] %v7029_v8   ;;  %v7109_v10 = vpack.c.bf16 %v1842_v9, %v1838_v6  ;;  %v7069_v25 = vpack.c.bf16 %v1953_v19, %v1949_v13 }
 0x309   : > { %v1846_v11 = vpop.f32.mrf.mxu0  ;;  %v1955_v26 = vpop.f32.mrf.mxu1 }
 0x30a   : > { %7110 = vst [vmem:[#allocation4 + $0x40] sm:$0xff] %v7109_v10   ;;  %7070 = vst [vmem:[#allocation5] sm:$0xff] %v7069_v25   ;;  %v7149_v28 = vpack.c.bf16 %v1955_v26, %v1951_v16 }
 0x30b   : > { %v1848_v12 = vpop.f32.mrf.mxu0  ;;  %v1959_v29 = vpop.f32.mrf.mxu1 }
 0x30c   : > { %7150 = vst [vmem:[#allocation5 + $0x40] sm:$0xff] %v7149_v28  }
 0x30d   : > { %v1850_v14 = vpop.f32.mrf.mxu0  ;;  %v1961_v32 = vpop.f32.mrf.mxu1 }
 0x30e   : > { %v7034_v15 = vpack.c.bf16 %v1850_v14, %v1846_v11 }
 0x30f   : > { %v1852_v17 = vpop.f32.mrf.mxu0  ;;  %v1963_v35 = vpop.f32.mrf.mxu1 }
 0x310   : > { %7191 = vst [vmem:[#allocation4 + $0x8] sm:$0xff] %v7034_v15   ;;  %v7114_v18 = vpack.c.bf16 %v1852_v17, %v1848_v12  ;;  %v7074_v37 = vpack.c.bf16 %v1963_v35, %v1959_v29 }
 0x311   : > { %v1856_v20 = vpop.f32.mrf.mxu0  ;;  %v1965_v38 = vpop.f32.mrf.mxu1 }
 0x312   : > { %7205 = vst [vmem:[#allocation4 + $0x48] sm:$0xff] %v7114_v18   ;;  %7198 = vst [vmem:[#allocation5 + $0x8] sm:$0xff] %v7074_v37   ;;  %v7154_v45 = vpack.c.bf16 %v1965_v38, %v1961_v32  ;;  %v2657_v38 = vld [vmem:[#allocation3] sm:$0xf] }
 0x313   : > { %v1858_v27 = vpop.f32.mrf.mxu0  ;;  %v1969_v40 = vpop.f32.mrf.mxu1 }
 0x314   : > { %7212 = vst [vmem:[#allocation5 + $0x48] sm:$0xff] %v7154_v45  }
 0x315   : > { %v1860_v30 = vpop.f32.mrf.mxu0  ;;  %v1971_v43 = vpop.f32.mrf.mxu1 }
 0x316   : > { %v7039_v31 = vpack.c.bf16 %v1860_v30, %v1856_v20 }
 0x317   : > { %v1862_v33 = vpop.f32.mrf.mxu0  ;;  %v1973_v49 = vpop.f32.mrf.mxu1 }
 0x318   : > { %7192 = vst [vmem:[#allocation4 + $0x10] sm:$0xff] %v7039_v31   ;;  %v7119_v34 = vpack.c.bf16 %v1862_v33, %v1858_v27  ;;  %v7079_v50 = vpack.c.bf16 %v1973_v49, %v1969_v40 }
 0x319   : > { %v1866_v36 = vpop.f32.mrf.mxu0  ;;  %v1975_v51 = vpop.f32.mrf.mxu1 }
 0x31a   : > { %7206 = vst [vmem:[#allocation4 + $0x50] sm:$0xff] %v7119_v34   ;;  %7199 = vst [vmem:[#allocation5 + $0x10] sm:$0xff] %v7079_v50   ;;  %v7159_v53 = vpack.c.bf16 %v1975_v51, %v1971_v43 }
 0x31b   : > { %v1868_v39 = vpop.f32.mrf.mxu0  ;;  %v1979_v44 = vpop.f32.mrf.mxu1 }
 0x31c   : > { %7213 = vst [vmem:[#allocation5 + $0x50] sm:$0xff] %v7159_v53  }
 0x31d   : > { %v1870_v41 = vpop.f32.mrf.mxu0  ;;  %v1981_v56 = vpop.f32.mrf.mxu1 }
 0x31e   : > { %v7044_v42 = vpack.c.bf16 %v1870_v41, %v1866_v36 }
 0x31f   : > { %v1872_v47 = vpop.f32.mrf.mxu0  ;;  %v1983_v59 = vpop.f32.mrf.mxu1 }
 0x320   : > { %7193 = vst [vmem:[#allocation4 + $0x18] sm:$0xff] %v7044_v42   ;;  %v7124_v48 = vpack.c.bf16 %v1872_v47, %v1868_v39  ;;  %v7084_v62 = vpack.c.bf16 %v1983_v59, %v1979_v44  ;;  %v2658_v42 = vld [vmem:[#allocation3 + $0x4] sm:$0xf] }
 0x321   : > { %v1876_v46 = vpop.f32.mrf.mxu0  ;;  %v1985_v63 = vpop.f32.mrf.mxu1  ;;  %v2851_v50 = vsel %vm2803_vm1, %v2658_v42, 0  ;;  %v7820_v42 = vld [vmem:[#allocation14 + $0xf4] ss:$8 sps:$4 sm:$0xff]  }
 0x322   : > { %7207 = vst [vmem:[#allocation4 + $0x58] sm:$0xff] %v7124_v48   ;;  %7200 = vst [vmem:[#allocation5 + $0x18] sm:$0xff] %v7084_v62   ;;  %v7164_v1 = vpack.c.bf16 %v1985_v63, %v1981_v56  ;;  %v2805_v48 = vsel %vm2803_vm1, %v2657_v38, 0  ;;  %v2653_v56 = vand.u32 127, %v829_v21  ;;  %v7809_v38 = vld [vmem:[#allocation14 + $0x20] ss:$8 sps:$4 sm:$0xff]  }
 0x323   : > { %v1878_v52 = vpop.f32.mrf.mxu0  ;;  %v1989_v2 = vpop.f32.mrf.mxu1 }
 0x324   : > { %7214 = vst [vmem:[#allocation5 + $0x58] sm:$0xff] %v7164_v1   ;;  %vm2654_vm2 = vcmp.gt.s32.totalorder %v2653_v56, %v8980_v22  ;;  %v7836_v56 = vld [vmem:[#allocation14 + $0x90] ss:$8 sps:$4 sm:$0xff]  }
 0x325   : > { %v1880_v54 = vpop.f32.mrf.mxu0  ;;  %v1991_v5 = vpop.f32.mrf.mxu1 }
 0x326   : > { %v7049_v55 = vpack.c.bf16 %v1880_v54, %v1876_v46 }
 0x327   : > { %v1882_v57 = vpop.f32.mrf.mxu0  ;;  %v1993_v8 = vpop.f32.mrf.mxu1 }
 0x328   : > { %7194 = vst [vmem:[#allocation4 + $0x20] sm:$0xff] %v7049_v55   ;;  %v7129_v58 = vpack.c.bf16 %v1882_v57, %v1878_v52  ;;  %v7089_v10 = vpack.c.bf16 %v1993_v8, %v1989_v2 }
 0x329   : > { %v1886_v60 = vpop.f32.mrf.mxu0  ;;  %v1995_v11 = vpop.f32.mrf.mxu1 }
 0x32a   : > { %7208 = vst [vmem:[#allocation4 + $0x60] sm:$0xff] %v7129_v58   ;;  %7201 = vst [vmem:[#allocation5 + $0x20] sm:$0xff] %v7089_v10   ;;  %v7169_v13 = vpack.c.bf16 %v1995_v11, %v1991_v5 }
 0x32b   : > { %v1888_v0 = vpop.f32.mrf.mxu0  ;;  %v1999_v14 = vpop.f32.mrf.mxu1 }
 0x32c   : > { %7215 = vst [vmem:[#allocation5 + $0x60] sm:$0xff] %v7169_v13  }
 0x32d   : > { %v1890_v3 = vpop.f32.mrf.mxu0  ;;  %v2001_v17 = vpop.f32.mrf.mxu1 }
 0x32e   : > { %v7054_v4 = vpack.c.bf16 %v1890_v3, %v1886_v60 }
 0x32f   : > { %v1892_v6 = vpop.f32.mrf.mxu0  ;;  %v2003_v20 = vpop.f32.mrf.mxu1 }
 0x330   : > { %7195 = vst [vmem:[#allocation4 + $0x28] sm:$0xff] %v7054_v4   ;;  %v7134_v7 = vpack.c.bf16 %v1892_v6, %v1888_v0  ;;  %v7094_v26 = vpack.c.bf16 %v2003_v20, %v1999_v14 }
 0x331   : > { %v1896_v9 = vpop.f32.mrf.mxu0  ;;  %v2005_v27 = vpop.f32.mrf.mxu1 }
 0x332   : > { %7209 = vst [vmem:[#allocation4 + $0x68] sm:$0xff] %v7134_v7   ;;  %7202 = vst [vmem:[#allocation5 + $0x28] sm:$0xff] %v7094_v26   ;;  %v7174_v29 = vpack.c.bf16 %v2005_v27, %v2001_v17 }
 0x333   : > { %v1898_v12 = vpop.f32.mrf.mxu0  ;;  %v2009_v30 = vpop.f32.mrf.mxu1 }
 0x334   : > { %7216 = vst [vmem:[#allocation5 + $0x68] sm:$0xff] %v7174_v29  }
 0x335   : > { %v1900_v15 = vpop.f32.mrf.mxu0  ;;  %v2011_v33 = vpop.f32.mrf.mxu1 }
 0x336   : > { %v7059_v16 = vpack.c.bf16 %v1900_v15, %v1896_v9  ;;  %v7796_v15 = vld [vmem:[#allocation14 + $0x74] ss:$8 sps:$4 sm:$0xff]  }
 0x337   : > { %v1902_v18 = vpop.f32.mrf.mxu0  ;;  %v2013_v36 = vpop.f32.mrf.mxu1 }
 0x338   : > { %7196 = vst [vmem:[#allocation4 + $0x30] sm:$0xff] %v7059_v16   ;;  %v7139_v19 = vpack.c.bf16 %v1902_v18, %v1898_v12  ;;  %v7099_v39 = vpack.c.bf16 %v2013_v36, %v2009_v30  ;;  %v7797_v30 = vld [vmem:[#allocation14 + $0x60] ss:$8 sps:$4 sm:$0xff]   ;;  %v7806_v36 = vld [vmem:[#allocation14 + $0x30] ss:$8 sps:$4 sm:$0xff]  }
 0x339   : > { %v1906_v25 = vpop.f32.mrf.mxu0  ;;  %v2015_v40 = vpop.f32.mrf.mxu1 }
 0x33a   : > { %7210 = vst [vmem:[#allocation4 + $0x70] sm:$0xff] %v7139_v19   ;;  %7203 = vst [vmem:[#allocation5 + $0x30] sm:$0xff] %v7099_v39   ;;  %v7179_v43 = vpack.c.bf16 %v2015_v40, %v2011_v33  ;;  %v7805_v33 = vld [vmem:[#allocation14 + $0x44] ss:$8 sps:$4 sm:$0xff]   ;;  %v7814_v39 = vld [vmem:[#allocation14 + $0x14] ss:$8 sps:$4 sm:$0xff]  }
 0x33b   : > { %v1908_v28 = vpop.f32.mrf.mxu0  ;;  %v2019_v49 = vpop.f32.mrf.mxu1  ;;  %v7817_v40 = vld [vmem:[#allocation14 + $0x4] ss:$8 sps:$4 sm:$0xff]  }
 0x33c   : > { %7217 = vst [vmem:[#allocation5 + $0x70] sm:$0xff] %v7179_v43   ;;  %v7818_v43 = vld [vmem:[#allocation14 + $0xf0] ss:$8 sps:$4 sm:$0xff]  }
 0x33d   : > { %v1910_v31 = vpop.f32.mrf.mxu0  ;;  %v2021_v51 = vpop.f32.mrf.mxu1 }
 0x33e   : > { %v7064_v32 = vpack.c.bf16 %v1910_v31, %v1906_v25  ;;  %v7794_v25 = vld [vmem:[#allocation14 + $0x70] ss:$8 sps:$4 sm:$0xff]   ;;  %v7802_v31 = vld [vmem:[#allocation14 + $0x54] ss:$8 sps:$4 sm:$0xff]  }
 0x33f   : > { %v1912_v34 = vpop.f32.mrf.mxu0  ;;  %v2023_v53 = vpop.f32.mrf.mxu1 }
 0x340   : > { %7197 = vst [vmem:[#allocation4 + $0x38] sm:$0xff] %v7064_v32   ;;  %v7144_v35 = vpack.c.bf16 %v1912_v34, %v1908_v28  ;;  %v7104_v44 = vpack.c.bf16 %v2023_v53, %v2019_v49  ;;  %v7799_v28 = vld [vmem:[#allocation14 + $0x64] ss:$8 sps:$4 sm:$0xff]   ;;  %v7800_v32 = vld [vmem:[#allocation14 + $0x50] ss:$8 sps:$4 sm:$0xff]  }
 0x341   : > { %v2641_v37 = vpop.f32.mrf.mxu0  ;;  %v2025_v54 = vpop.f32.mrf.mxu1  ;;  %v7803_v34 = vld [vmem:[#allocation14 + $0x40] ss:$8 sps:$4 sm:$0xff]   ;;  %v7826_v49 = vld [vmem:[#allocation14 + $0xd4] ss:$8 sps:$4 sm:$0xff]   ;;  %v7830_v53 = vld [vmem:[#allocation14 + $0xb0] ss:$8 sps:$4 sm:$0xff]  }
 0x342   : > { %7211 = vst [vmem:[#allocation4 + $0x78] sm:$0xff] %v7144_v35   ;;  %v2691_v45 = vpack.c.bf16 %v2641_v37, %v2641_v37  ;;  %7204 = vst [vmem:[#allocation5 + $0x38] sm:$0xff] %v7104_v44   ;;  %v7184_v55 = vpack.c.bf16 %v2025_v54, %v2021_v51  ;;  %v7808_v35 = vld [vmem:[#allocation14 + $0x34] ss:$8 sps:$4 sm:$0xff]   ;;  %v7811_v37 = vld [vmem:[#allocation14 + $0x24] ss:$8 sps:$4 sm:$0xff]  }
 0x343   : > { %v2643_v41 = vpop.f32.mrf.mxu0  ;;  %v7827_v51 = vld [vmem:[#allocation14 + $0xc0] ss:$8 sps:$4 sm:$0xff]   ;;  %v7835_v44 = vld [vmem:[#allocation14 + $0xa4] ss:$8 sps:$4 sm:$0xff]  }
 0x344   : > { %v2692_v47 = vpack.c.bf16 %v2643_v41, %v2643_v41  ;;  %7266 = vmatmul.mubr.bf16.vlgmr.msra.gmra.mxu1 %v2691_v45  ;;  %7218 = vst [vmem:[#allocation5 + $0x78] sm:$0xff] %v7184_v55   ;;  %v7812_v45 = vld [vmem:[#allocation14 + $0x10] ss:$8 sps:$4 sm:$0xff]   ;;  %v7815_v41 = vld [vmem:[#allocation14] ss:$8 sps:$4 sm:$0xff]  }
 0x345   : > { %7276 = vmatpush3.bf16.msra.mxu1 %v2805_v48  ;;  %v2645_v46 = vpop.f32.mrf.mxu0  ;;  %7277 = vmatprep.mubr.msk.bf16.mxu1 %vm8605_vm0, %v8604_v61  ;;  %v7821_v48 = vld [vmem:[#allocation14 + $0xe0] ss:$8 sps:$4 sm:$0xff]   ;;  %v7838_v55 = vld [vmem:[#allocation14 + $0x94] ss:$8 sps:$4 sm:$0xff]  }
 0x346   : > { %7272 = vmatmul.mubr.bf16.vlgmr.msra.gmra.mxu0 %v2692_v47  ;;  %3055 = vmatprep.subr.bf16.mxu1 %v7796_v15  ;;  %v7823_v47 = vld [vmem:[#allocation14 + $0xe4] ss:$8 sps:$4 sm:$0xff]   ;;  %v7824_v46 = vld [vmem:[#allocation14 + $0xd0] ss:$8 sps:$4 sm:$0xff]   ;;  %v7833_v54 = vld [vmem:[#allocation14 + $0xa0] ss:$8 sps:$4 sm:$0xff]  }
 0x347   : > { %7282 = vmatpush3.bf16.msra.mxu0 %v2851_v50  ;;  %v2646_v52 = vpop.f32.mrf.mxu0  ;;  %7283 = vmatprep.mubr.msk.bf16.mxu0 %vm8605_vm0, %v8604_v61  ;;  %v7829_v50 = vld [vmem:[#allocation14 + $0xc4] ss:$8 sps:$4 sm:$0xff]  }
 0x348   : > { %v7832_v52 = vld [vmem:[#allocation14 + $0xb4] ss:$8 sps:$4 sm:$0xff]  }
 0x349   : > { %v8186_v15 = vld [vmem:[%s8917_s3] sm:$0xff] }
 0x404   : > { %v2727_v57 = vpop.f32.mrf.mxu1 }
 0x405   : > { %v2773_v58 = vsel %vm2654_vm2, -1e+30, %v2727_v57  ;;  %v7841_v57 = vld [vmem:[#allocation14 + $0x84] ss:$8 sps:$4 sm:$0xff]  }
 0x406   : > { %v7267_v59 = vpop.f32.mrf.mxu1  ;;  %v2767_v60 = vpop.f32.mrf.mxu0  ;;  %v2776_v62 = vsel %vm2775_vm3, %v2773_v58, -inf }
 0x407   : > { %v2774_v63 = vsel %vm2654_vm2, -1e+30, %v2767_v60  ;;  %2777 = vmax.xlane.f32.xlu1 %v2776_v62 }
 0x408   : > { %v2730_v0 = vpop.f32.mrf.mxu1  ;;  %v7273_v1 = vpop.f32.mrf.mxu0  ;;  %v2779_v2 = vsel %vm2775_vm3, %v2774_v63, -inf }
 0x409   : > { %2780 = vmax.xlane.f32.xlu0 %v2779_v2 }
 0x40a   : > { %v7268_v3 = vpop.f32.mrf.mxu1  ;;  %v2770_v4 = vpop.f32.mrf.mxu0 }
 0x40b   : > { %v7842_v3 = vld [vmem:[#allocation4 + $0x38] sm:$0xff]  }
 0x40c   : > { %v7274_v5 = vpop.f32.mrf.mxu0 }
 0x490   : > { %v2778_v21 = vpop.xlane.xlu1 %2777 }
 0x491   : > { %v2782_v6 = vsub.f32 %v2773_v58, %v2778_v21  ;;  %v7839_v58 = vld [vmem:[#allocation14 + $0x80] ss:$8 sps:$4 sm:$0xff]  }
 0x492   : > { %v2781_v7 = vpop.xlane.xlu0 %2780 }
 0x493   : > { %v2784_v8 = vmul.f32 1.442695, %v2782_v6  ;;  %v2783_v9 = vsub.f32 %v2774_v63, %v2781_v7  ;;  %v7843_v6 = vld [vmem:[#allocation4 + $0x30] sm:$0xff]   ;;  %v7844_v7 = vld [vmem:[#allocation4 + $0x28] sm:$0xff]  }
 0x495   : > { %8166 = vpow2.f32 %v2784_v8  ;;  %v2786_v10 = vmul.f32 1.442695, %v2783_v9  ;;  %v7845_v8 = vld [vmem:[#allocation4 + $0x20] sm:$0xff]   ;;  %v7846_v9 = vld [vmem:[#allocation4 + $0x18] sm:$0xff]  }
 0x497   : > { %8168 = vpow2.f32 %v2786_v10  ;;  %v7847_v10 = vld [vmem:[#allocation4 + $0x10] sm:$0xff]  }
 0x4a2   : > { %v8167_v11 = vpop.eup %8166 }
 0x4a3   : > { %v2788_v12 = vsel %vm2775_vm3, %v8167_v11, 0.0 }
 0x4a4   : > { %v8169_v13 = vpop.eup %8168  ;;  %2789 = vadd.xlane.f32.xlu1 %v2788_v12  ;;  %v7849_v12 = vld [vmem:[#allocation4] sm:$0xff]  }
 0x4a5   : > { %v2791_v14 = vsel %vm2775_vm3, %v8169_v13, 0.0 }
 0x4a6   : > { %2792 = vadd.xlane.f32.xlu0 %v2791_v14 }
 0x52d   : > { %v2790_v16 = vpop.xlane.xlu1 %2789 }
 0x52e   : > { %8170 = vrcp.f32 %v2790_v16 }
 0x52f   : > { %v2793_v17 = vpop.xlane.xlu0 %2792 }
 0x530   : > { %8172 = vrcp.f32 %v2793_v17  ;;  %v8187_v17 = vld [vmem:[%s8917_s3 + $0x8] sm:$0xff]  ;;  %s9105_s3 = scalar_lea.vmem [#allocation24], %s6323_s20  ;;  %s8456_s20 = sshll.u32 %s8606_s11, 4  ;;  %s8457_s20 = int_to_ptr.vmem [resolvable:$false] %s8456_s20 }
 0x531   : > { %s6074_s18 = sshll.u32 %s9105_s3, 4  ;;  %s9178_s18 = int_to_ptr.vmem [resolvable:$true] %s6074_s18 }
 0x532   : > { %s8452_s14 = scalar_lea.vmem %s9178_s18, 128  ;;  %p8459_p7 = scmp.lt.s32.totalorder %s9178_s18, %s8457_s20 }
 0x533   : > { %p8453_p1 = scmp.ne.s32.totalorder %s9178_s18, %s8452_s14 }
 0x535   : > { %p8454_p3 = pnand %p8453_p1, %p8865_p11 }
 0x537   : > { %p8455_p9 = pneg %p8454_p3 }
 0x53b   : > { %v8171_v18 = vpop.eup %8170 }
 0x53c   : > { %v2796_v19 = vmul.f32 %v8171_v18, %v8167_v11  ;;  %v7848_v11 = vld [vmem:[#allocation4 + $0x8] sm:$0xff]  }
 0x53d   : > { %v8173_v20 = vpop.eup %8172 }
 0x53e   : > { %v2798_v26 = vpack.c.bf16 %v2796_v19, %v2796_v19  ;;  %v2797_v27 = vmul.f32 %v8173_v20, %v8169_v13 }
 0x540   : > { %7278 = vmatmul.mubr.msk.bf16.vlgmr.msra.gmra.mxu1 %vm2775_vm3, %v2798_v26  ;;  %v2799_v29 = vpack.c.bf16 %v2797_v27, %v2797_v27  ;;  %v7850_v26 = vld [vmem:[#allocation15 + $0x70] ss:$8 sps:$4 sm:$0xff]   ;;  %v7852_v27 = vld [vmem:[#allocation15 + $0x74] ss:$8 sps:$4 sm:$0xff]  }
 0x541   : > { %3056 = vmatpush1.bf16.msra.mxu1 %v7794_v25  ;;  %3336 = vmatprep.subr.bf16.mxu0 %v7852_v27  ;;  %v7900_v27 = vld [vmem:[#allocation4 + $0x68] sm:$0xff]  }
 0x542   : > { %7284 = vmatmul.mubr.msk.bf16.vlgmr.msra.gmra.mxu0 %vm2775_vm3, %v2799_v29  ;;  %3057 = vmatprep.subr.bf16.mxu1 %v7799_v28  ;;  %v7855_v28 = vld [vmem:[#allocation15 + $0x64] ss:$8 sps:$4 sm:$0xff]   ;;  %v7853_v29 = vld [vmem:[#allocation15 + $0x60] ss:$8 sps:$4 sm:$0xff]  }
 0x543   : > { %3337 = vmatpush1.bf16.msra.mxu0 %v7850_v26  ;;  %v7899_v26 = vld [vmem:[#allocation4 + $0x70] sm:$0xff]  }
 0x544   : > { %3338 = vmatprep.subr.bf16.mxu0 %v7855_v28  ;;  %v7901_v28 = vld [vmem:[#allocation4 + $0x60] sm:$0xff]  }
 0x545   : > { %3058 = vmatpush1.bf16.msra.mxu1 %v7797_v30  ;;  %v7858_v30 = vld [vmem:[#allocation15 + $0x54] ss:$8 sps:$4 sm:$0xff]  }
 0x546   : > { %3059 = vmatprep.subr.bf16.mxu1 %v7802_v31  ;;  %v7856_v31 = vld [vmem:[#allocation15 + $0x50] ss:$8 sps:$4 sm:$0xff]  }
 0x547   : > { %3339 = vmatpush1.bf16.msra.mxu0 %v7853_v29  ;;  %v7902_v29 = vld [vmem:[#allocation4 + $0x58] sm:$0xff]  }
 0x548   : > { %3340 = vmatprep.subr.bf16.mxu0 %v7858_v30  ;;  %v7903_v30 = vld [vmem:[#allocation4 + $0x50] sm:$0xff]  }
 0x549   : > { %3060 = vmatpush1.bf16.msra.mxu1 %v7800_v32  ;;  %v7861_v32 = vld [vmem:[#allocation15 + $0x44] ss:$8 sps:$4 sm:$0xff]  }
 0x54a   : > { %3061 = vmatprep.subr.bf16.mxu1 %v7805_v33  ;;  %v7859_v33 = vld [vmem:[#allocation15 + $0x40] ss:$8 sps:$4 sm:$0xff]  }
 0x54b   : > { %3341 = vmatpush1.bf16.msra.mxu0 %v7856_v31  ;;  %v7904_v31 = vld [vmem:[#allocation4 + $0x48] sm:$0xff]  }
 0x54c   : > { %3342 = vmatprep.subr.bf16.mxu0 %v7861_v32  ;;  %v7905_v32 = vld [vmem:[#allocation4 + $0x40] sm:$0xff]  }
 0x54d   : > { %3062 = vmatpush1.bf16.msra.mxu1 %v7803_v34  ;;  %v7864_v34 = vld [vmem:[#allocation15 + $0x34] ss:$8 sps:$4 sm:$0xff]  }
 0x54e   : > { %3063 = vmatprep.subr.bf16.mxu1 %v7808_v35  ;;  %v7862_v35 = vld [vmem:[#allocation15 + $0x30] ss:$8 sps:$4 sm:$0xff]  }
 0x54f   : > { %3343 = vmatpush1.bf16.msra.mxu0 %v7859_v33 }
 0x550   : > { %3344 = vmatprep.subr.bf16.mxu0 %v7864_v34 }
 0x551   : > { %3064 = vmatpush1.bf16.msra.mxu1 %v7806_v36  ;;  %v7867_v36 = vld [vmem:[#allocation15 + $0x24] ss:$8 sps:$4 sm:$0xff]  }
 0x552   : > { %3065 = vmatprep.subr.bf16.mxu1 %v7811_v37  ;;  %v7865_v37 = vld [vmem:[#allocation15 + $0x20] ss:$8 sps:$4 sm:$0xff]  }
 0x553   : > { %3345 = vmatpush1.bf16.msra.mxu0 %v7862_v35 }
 0x554   : > { %3346 = vmatprep.subr.bf16.mxu0 %v7867_v36 }
 0x555   : > { %3066 = vmatpush1.bf16.msra.mxu1 %v7809_v38  ;;  %v7870_v38 = vld [vmem:[#allocation15 + $0x14] ss:$8 sps:$4 sm:$0xff]  }
 0x556   : > { %3067 = vmatprep.subr.bf16.mxu1 %v7814_v39  ;;  %v7868_v39 = vld [vmem:[#allocation15 + $0x10] ss:$8 sps:$4 sm:$0xff]  }
 0x557   : > { %3347 = vmatpush1.bf16.msra.mxu0 %v7865_v37 }
 0x558   : > { %3348 = vmatprep.subr.bf16.mxu0 %v7870_v38  ;;  %v7906_v38 = vld [vmem:[#allocation5 + $0x38] sm:$0xff]  }
 0x559   : > { %3068 = vmatpush1.bf16.msra.mxu1 %v7812_v45  ;;  %v7873_v45 = vld [vmem:[#allocation15 + $0x4] ss:$8 sps:$4 sm:$0xff]  }
 0x55a   : > { %3069 = vmatprep.subr.bf16.mxu1 %v7817_v40  ;;  %v7871_v40 = vld [vmem:[#allocation15] ss:$8 sps:$4 sm:$0xff]  }
 0x55b   : > { %3349 = vmatpush1.bf16.msra.mxu0 %v7868_v39 }
 0x55c   : > { %3350 = vmatprep.subr.bf16.mxu0 %v7873_v45  ;;  %v7907_v45 = vld [vmem:[#allocation5 + $0x30] sm:$0xff]  }
 0x55d   : > { %3070 = vmatpush1.bf16.msra.mxu1 %v7815_v41  ;;  %v7876_v41 = vld [vmem:[#allocation15 + $0xf4] ss:$8 sps:$4 sm:$0xff]  }
 0x55e   : > { %3071 = vmatprep.subr.bf16.mxu1 %v7820_v42  ;;  %v7874_v42 = vld [vmem:[#allocation15 + $0xf0] ss:$8 sps:$4 sm:$0xff]  }
 0x55f   : > { %3351 = vmatpush1.bf16.msra.mxu0 %v7871_v40  ;;  %v7908_v40 = vld [vmem:[#allocation5 + $0x28] sm:$0xff]  }
 0x560   : > { %3352 = vmatprep.subr.bf16.mxu0 %v7876_v41  ;;  %v7909_v41 = vld [vmem:[#allocation5 + $0x20] sm:$0xff]  }
 0x561   : > { %3072 = vmatpush2.bf16.msra.mxu1 %v7818_v43  ;;  %v7879_v43 = vld [vmem:[#allocation15 + $0xe4] ss:$8 sps:$4 sm:$0xff]  }
 0x562   : > { %3073 = vmatprep.subr.bf16.mxu1 %v7823_v47  ;;  %v7877_v47 = vld [vmem:[#allocation15 + $0xe0] ss:$8 sps:$4 sm:$0xff]  }
 0x563   : > { %3353 = vmatpush2.bf16.msra.mxu0 %v7874_v42  ;;  %v7910_v42 = vld [vmem:[#allocation5 + $0x18] sm:$0xff]  }
 0x564   : > { %3354 = vmatprep.subr.bf16.mxu0 %v7879_v43  ;;  %v7911_v43 = vld [vmem:[#allocation5 + $0x10] sm:$0xff]  }
 0x565   : > { %3074 = vmatpush2.bf16.msra.mxu1 %v7821_v48 }
 0x566   : > { %3075 = vmatprep.subr.bf16.mxu1 %v7826_v49 }
 0x567   : > { %3355 = vmatpush2.bf16.msra.mxu0 %v7877_v47  ;;  %v7912_v47 = vld [vmem:[#allocation5 + $0x8] sm:$0xff]  }
 0x569   : > { %3076 = vmatpush2.bf16.msra.mxu1 %v7824_v46 }
 0x56a   : > { %3077 = vmatprep.subr.bf16.mxu1 %v7829_v50 }
 0x56d   : > { %3078 = vmatpush2.bf16.msra.mxu1 %v7827_v51 }
 0x56e   : > { %3079 = vmatprep.subr.bf16.mxu1 %v7832_v52 }
 0x571   : > { %3080 = vmatpush2.bf16.msra.mxu1 %v7830_v53 }
 0x572   : > { %3081 = vmatprep.subr.bf16.mxu1 %v7835_v44  ;;  %v7882_v44 = vld [vmem:[#allocation15 + $0xd4] ss:$8 sps:$4 sm:$0xff]  }
 0x573   : > { %3356 = vmatprep.subr.bf16.mxu0 %v7882_v44 }
 0x575   : > { %3082 = vmatpush2.bf16.msra.mxu1 %v7833_v54  ;;  %v7880_v54 = vld [vmem:[#allocation15 + $0xd0] ss:$8 sps:$4 sm:$0xff]  }
 0x576   : > { %3083 = vmatprep.subr.bf16.mxu1 %v7838_v55  ;;  %3357 = vmatpush2.bf16.msra.mxu0 %v7880_v54  ;;  %v7883_v55 = vld [vmem:[#allocation15 + $0xc0] ss:$8 sps:$4 sm:$0xff]  }
 0x579   : > { %3084 = vmatpush2.bf16.msra.mxu1 %v7836_v56  ;;  %v7885_v56 = vld [vmem:[#allocation15 + $0xc4] ss:$8 sps:$4 sm:$0xff]  }
 0x57a   : > { %3085 = vmatprep.subr.bf16.mxu1 %v7841_v57  ;;  %v7888_v57 = vld [vmem:[#allocation15 + $0xb4] ss:$8 sps:$4 sm:$0xff]   ;;  %3358 = vmatprep.subr.bf16.mxu0 %v7885_v56 }
 0x57b   : > { %3359 = vmatpush2.bf16.msra.mxu0 %v7883_v55 }
 0x57c   : > { %3360 = vmatprep.subr.bf16.mxu0 %v7888_v57 }
 0x57d   : > { %3086 = vmatpush2.bf16.msra.mxu1 %v7839_v58  ;;  %v7886_v58 = vld [vmem:[#allocation15 + $0xb0] ss:$8 sps:$4 sm:$0xff]  }
 0x57e   : > { %7287 = vmatprep.subr.bf16.mxu1 %v8604_v61 }
 0x57f   : > { %3361 = vmatpush2.bf16.msra.mxu0 %v7886_v58 }
 0x600   : > { %v2841_v59 = vpop.f32.mrf.mxu1 }
 0x601   : > { %v2893_v0 = vpack.c.bf16 %v2841_v59, %v2841_v59  ;;  %v7891_v59 = vld [vmem:[#allocation15 + $0xa4] ss:$8 sps:$4 sm:$0xff]  }
 0x602   : > { %v7279_v60 = vpop.f32.mrf.mxu1  ;;  %v2887_v62 = vpop.f32.mrf.mxu0  ;;  %3362 = vmatprep.subr.bf16.mxu0 %v7891_v59 }
 0x603   : > { %v2894_v63 = vpack.c.bf16 %v2887_v62, %v2887_v62  ;;  %v7889_v60 = vld [vmem:[#allocation15 + $0xa0] ss:$8 sps:$4 sm:$0xff]   ;;  %v7894_v62 = vld [vmem:[#allocation15 + $0x94] ss:$8 sps:$4 sm:$0xff]  }
 0x604   : > { %v2844_v1 = vpop.f32.mrf.mxu1  ;;  %v7285_v2 = vpop.f32.mrf.mxu0  ;;  %3363 = vmatpush2.bf16.msra.mxu0 %v7889_v60 }
 0x605   : > { %3087 = vmatprep.mubr.bf16.mxu1 %v2894_v63  ;;  %v7892_v63 = vld [vmem:[#allocation15 + $0x90] ss:$8 sps:$4 sm:$0xff]   ;;  %3364 = vmatprep.subr.bf16.mxu0 %v7894_v62  ;;  %v7895_v1 = vld [vmem:[#allocation15 + $0x80] ss:$8 sps:$4 sm:$0xff]  }
 0x606   : > { %v7280_v4 = vpop.f32.mrf.mxu1  ;;  %v2890_v5 = vpop.f32.mrf.mxu0  ;;  %3088 = vmatmul.mubr.bf16.vlgmr.msra.gmra.mxu1 %v2893_v0  ;;  %v7897_v0 = vld [vmem:[#allocation15 + $0x84] ss:$8 sps:$4 sm:$0xff]  }
 0x607   : > { %7288 = vmatpush3.bf16.xpose.msra.mxu1 %v7842_v3  ;;  %7303 = vmatprep.mubr.msk.bf16.mxu1 %vm8605_vm0, %v8604_v61  ;;  %v3098_v5 = vld [vmem:[%s9259_s7] sm:$0x3] }
 0x608   : > { %v7286_v21 = vpop.f32.mrf.mxu0  ;;  %7289 = vmatprep.subr.bf16.mxu1 %v8604_v61  ;;  %3365 = vmatpush2.bf16.msra.mxu0 %v7892_v63 }
 0x609   : > { %3366 = vmatprep.subr.bf16.mxu0 %v7897_v0  ;;  %v3099_v21 = vld [vmem:[%s9260_s8] sm:$0x3] }
 0x60a   : > { %v7922_v0 = vld [vmem:[#allocation18 + $0x70] ss:$8 sps:$4 sm:$0xff]  }
 0x60c   : > { %3367 = vmatpush2.bf16.msra.mxu0 %v7895_v1  ;;  %v7924_v1 = vld [vmem:[#allocation18 + $0x74] ss:$8 sps:$4 sm:$0xff]  }
 0x60d   : > { %7307 = vmatprep.subr.bf16.mxu0 %v8604_v61 }
 0x60f   : > { %7290 = vmatpush3.bf16.xpose.msra.mxu1 %v7843_v6  ;;  %v3120_v6 = vrot.slane %v3098_v5, %v8983_v23 }
 0x610   : > { %7291 = vmatprep.subr.bf16.mxu1 %v8604_v61 }
 0x617   : > { %7292 = vmatpush3.bf16.xpose.msra.mxu1 %v7844_v7  ;;  %v3124_v7 = vrot.slane %v3098_v5, %v8986_v24  ;;  %v7928_v5 = vld [vmem:[#allocation18 + $0x50] ss:$8 sps:$4 sm:$0xff]  }
 0x618   : > { %7293 = vmatprep.subr.bf16.mxu1 %v8604_v61 }
 0x61f   : > { %7294 = vmatpush3.bf16.xpose.msra.mxu1 %v7845_v8 }
 0x620   : > { %7295 = vmatprep.subr.bf16.mxu1 %v8604_v61 }
 0x627   : > { %7296 = vmatpush3.bf16.xpose.msra.mxu1 %v7846_v9 }
 0x628   : > { %7297 = vmatprep.subr.bf16.mxu1 %v8604_v61 }
 0x62f   : > { %7298 = vmatpush3.bf16.xpose.msra.mxu1 %v7847_v10  ;;  %v3133_v10 = vrot.slane %v3099_v21, %v8983_v23 }
 0x630   : > { %7299 = vmatprep.subr.bf16.mxu1 %v8604_v61 }
 0x637   : > { %7300 = vmatpush3.bf16.xpose.msra.mxu1 %v7848_v11  ;;  %v3137_v11 = vrot.slane %v3099_v21, %v8986_v24  ;;  %v7933_v21 = vld [vmem:[#allocation18 + $0x44] ss:$8 sps:$4 sm:$0xff]  }
 0x638   : > { %7301 = vmatprep.subr.bf16.mxu1 %v8604_v61 }
 0x63f   : > { %7302 = vmatpush3.bf16.xpose.msra.mxu1 %v7849_v12 }
 0x640   : > { %4009 = vmatprep.subr.bf16.mxu1 %v7924_v1 }
 0x6c6   : > { %v3089_v13 = vpop.f32.mrf.mxu1 }
 0x6c7   : > { %v9061_v16 = vadd.f32 %v8186_v15, %v3089_v13 }
 0x6c8   : > { %v3091_v14 = vpop.f32.mrf.mxu1 }
 0x6c9   : > { %v9064_v18 = vadd.f32 %v8187_v17, %v3091_v14 }
 0x6ca   : > { %v3093_v19 = vpop.f32.mrf.mxu1 }
 0x6cb   : > { %v3100_v20 = vadd.f32 %v9064_v18, %v9061_v16 }
 0x6cc   : > { %v3094_v25 = vpop.f32.mrf.mxu1 }
 0x6cd   : > { %3101 = vadd.xlane.f32.xlu0 %v3100_v20  ;;  %v7898_v25 = vld [vmem:[#allocation4 + $0x78] sm:$0xff]  }
 0x756   : > { %v3102_v48 = vpop.xlane.xlu0 %3101 }
 0x757   : > { %v3103_v49 = vmul.f32 0.00390625, %v3102_v48  ;;  %v7913_v48 = vld [vmem:[#allocation5] sm:$0xff]  }
 0x759   : > { %v3104_v46 = vsub.f32 %v9061_v16, %v3103_v49  ;;  %v3105_v50 = vsub.f32 %v9064_v18, %v3103_v49 }
 0x75b   : > { %v3106_v51 = vmul.f32 %v3104_v46, %v3104_v46  ;;  %v3107_v52 = vmul.f32 %v3105_v50, %v3105_v50 }
 0x75d   : > { %v3108_v53 = vadd.f32 %v3107_v52, %v3106_v51 }
 0x75f   : > { %3109 = vadd.xlane.f32.xlu1 %v3108_v53 }
 0x7e8   : > { %v3110_v2 = vpop.xlane.xlu1 %3109 }
 0x7e9   : > { %v3111_v3 = vmul.f32 0.00390625, %v3110_v2  ;;  %v7927_v2 = vld [vmem:[#allocation18 + $0x64] ss:$8 sps:$4 sm:$0xff]  }
 0x7eb   : > { %v3112_v4 = vadd.f32 1e-05, %v3111_v3  ;;  %v7925_v3 = vld [vmem:[#allocation18 + $0x60] ss:$8 sps:$4 sm:$0xff]  }
 0x7ed   : > { %8174 = vrsqrt.f32 %v3112_v4  ;;  %v7930_v4 = vld [vmem:[#allocation18 + $0x54] ss:$8 sps:$4 sm:$0xff]  }
 0x7fa   : > { %v8175_v8 = vpop.eup %8174 }
 0x7fb   : > { %v3115_v9 = vmul.f32 %v8175_v8, %v3105_v50  ;;  %v3114_v12 = vmul.f32 %v8175_v8, %v3104_v46  ;;  %v7934_v8 = vld [vmem:[#allocation18 + $0x30] ss:$8 sps:$4 sm:$0xff]  }
 0x7fd   : > { %v3128_v13 = vmul.f32 %v3124_v7, %v3115_v9  ;;  %v3127_v14 = vmul.f32 %v3120_v6, %v3114_v12  ;;  %v7931_v6 = vld [vmem:[#allocation18 + $0x40] ss:$8 sps:$4 sm:$0xff]   ;;  %v7936_v7 = vld [vmem:[#allocation18 + $0x34] ss:$8 sps:$4 sm:$0xff]   ;;  %v7939_v9 = vld [vmem:[#allocation18 + $0x24] ss:$8 sps:$4 sm:$0xff]  }
 0x7fe   : > { %v7940_v12 = vld [vmem:[#allocation18 + $0x10] ss:$8 sps:$4 sm:$0xff]  }
 0x7ff   : > { %v3141_v15 = vadd.f32 %v3137_v11, %v3128_v13  ;;  %v3140_v17 = vadd.f32 %v3133_v10, %v3127_v14  ;;  %v7937_v10 = vld [vmem:[#allocation18 + $0x20] ss:$8 sps:$4 sm:$0xff]   ;;  %v7942_v11 = vld [vmem:[#allocation18 + $0x14] ss:$8 sps:$4 sm:$0xff]   ;;  %v7945_v13 = vld [vmem:[#allocation18 + $0x4] ss:$8 sps:$4 sm:$0xff]  }
 0x800   : > { %v7943_v14 = vld [vmem:[#allocation18] ss:$8 sps:$4 sm:$0xff]  }
 0x801   : > { %v3143_v19 = vpack.c.bf16 %v3141_v15, %v3141_v15  ;;  %v3142_v20 = vpack.c.bf16 %v3140_v17, %v3140_v17 }
 0x803   : > { %3368 = vmatprep.mubr.bf16.mxu0 %v3143_v19 }
 0x804   : > { %3369 = vmatmul.mubr.bf16.vlgmr.msra.gmra.mxu0 %v3142_v20 }
 0x805   : > { %7308 = vmatpush3.bf16.xpose.msra.mxu0 %v7898_v25  ;;  %7323 = vmatprep.mubr.msk.bf16.mxu0 %vm8605_vm0, %v8604_v61 }
 0x806   : > { %7309 = vmatprep.subr.bf16.mxu0 %v8604_v61 }
 0x80d   : > { %7310 = vmatpush3.bf16.xpose.msra.mxu0 %v7899_v26 }
 0x80e   : > { %7311 = vmatprep.subr.bf16.mxu0 %v8604_v61 }
 0x815   : > { %7312 = vmatpush3.bf16.xpose.msra.mxu0 %v7900_v27 }
 0x816   : > { %7313 = vmatprep.subr.bf16.mxu0 %v8604_v61 }
 0x81d   : > { %7314 = vmatpush3.bf16.xpose.msra.mxu0 %v7901_v28  ;;  %v7914_v28 = vld [vmem:[#allocation5 + $0x78] sm:$0xff]  }
 0x81e   : > { %7315 = vmatprep.subr.bf16.mxu0 %v8604_v61 }
 0x825   : > { %7316 = vmatpush3.bf16.xpose.msra.mxu0 %v7902_v29 }
 0x826   : > { %7317 = vmatprep.subr.bf16.mxu0 %v8604_v61 }
 0x82d   : > { %7318 = vmatpush3.bf16.xpose.msra.mxu0 %v7903_v30  ;;  %v7915_v30 = vld [vmem:[#allocation5 + $0x70] sm:$0xff]  }
 0x82e   : > { %7319 = vmatprep.subr.bf16.mxu0 %v8604_v61 }
 0x835   : > { %7320 = vmatpush3.bf16.xpose.msra.mxu0 %v7904_v31  ;;  %v7916_v31 = vld [vmem:[#allocation5 + $0x68] sm:$0xff]  }
 0x836   : > { %7321 = vmatprep.subr.bf16.mxu0 %v8604_v61 }
 0x83d   : > { %7322 = vmatpush3.bf16.xpose.msra.mxu0 %v7905_v32  ;;  %v7917_v32 = vld [vmem:[#allocation5 + $0x60] sm:$0xff]  }
 0x83e   : > { %7327 = vmatprep.subr.bf16.mxu0 %v8604_v61 }
 0x8c4   : > { %v3370_v33 = vpop.f32.mrf.mxu0 }
 0x8c5   : > { %v3473_v34 = vpack.c.bf16 %v3370_v33, %v3370_v33  ;;  %v7918_v33 = vld [vmem:[#allocation5 + $0x58] sm:$0xff]  }
 0x8c6   : > { %v3372_v35 = vpop.f32.mrf.mxu0 }
 0x8c7   : > { %v3474_v36 = vpack.c.bf16 %v3372_v35, %v3372_v35  ;;  %7304 = vmatmul.mubr.bf16.vlgmr.msra.gmra.mxu1 %v3473_v34  ;;  %v7919_v34 = vld [vmem:[#allocation5 + $0x50] sm:$0xff]   ;;  %v7920_v35 = vld [vmem:[#allocation5 + $0x48] sm:$0xff]  }
 0x8c8   : > { %v3374_v37 = vpop.f32.mrf.mxu0  ;;  %4010 = vmatpush1.bf16.msra.mxu1 %v7922_v0 }
 0x8c9   : > { %7324 = vmatmul.mubr.bf16.vlgmr.msra.gmra.mxu0 %v3474_v36  ;;  %4011 = vmatprep.subr.bf16.mxu1 %v7927_v2  ;;  %v7921_v36 = vld [vmem:[#allocation5 + $0x40] sm:$0xff]  }
 0x8ca   : > { %7328 = vmatpush3.bf16.msra.mxu0 %v7906_v38  ;;  %v3375_v39 = vpop.f32.mrf.mxu0  ;;  %7343 = vmatprep.mubr.msk.bf16.mxu0 %vm8605_vm0, %v8604_v61  ;;  %v7946_v38 = vld [vmem:[#allocation18 + $0xf0] ss:$8 sps:$4 sm:$0xff]  }
 0x8cb   : > { %7329 = vmatprep.subr.bf16.mxu0 %v8604_v61  ;;  %v7948_v39 = vld [vmem:[#allocation18 + $0xf4] ss:$8 sps:$4 sm:$0xff]  }
 0x8cc   : > { %4012 = vmatpush1.bf16.msra.mxu1 %v7925_v3 }
 0x8cd   : > { %4013 = vmatprep.subr.bf16.mxu1 %v7930_v4 }
 0x8ce   : > { %7330 = vmatpush3.bf16.msra.mxu0 %v7907_v45  ;;  %v7949_v45 = vld [vmem:[#allocation18 + $0xe0] ss:$8 sps:$4 sm:$0xff]  }
 0x8cf   : > { %7331 = vmatprep.subr.bf16.mxu0 %v8604_v61 }
 0x8d0   : > { %4014 = vmatpush1.bf16.msra.mxu1 %v7928_v5 }
 0x8d1   : > { %4015 = vmatprep.subr.bf16.mxu1 %v7933_v21 }
 0x8d2   : > { %7332 = vmatpush3.bf16.msra.mxu0 %v7908_v40  ;;  %v7951_v40 = vld [vmem:[#allocation18 + $0xe4] ss:$8 sps:$4 sm:$0xff]  }
 0x8d3   : > { %7333 = vmatprep.subr.bf16.mxu0 %v8604_v61 }
 0x8d4   : > { %4016 = vmatpush1.bf16.msra.mxu1 %v7931_v6  ;;  %v4156_v6 = vld [vmem:[#allocation20 + $0x1c0] sm:$0xff] }
 0x8d5   : > { %4017 = vmatprep.subr.bf16.mxu1 %v7936_v7  ;;  %v4160_v7 = vld [vmem:[#allocation20 + $0x1e0] sm:$0xff] }
 0x8d6   : > { %7334 = vmatpush3.bf16.msra.mxu0 %v7909_v41  ;;  %v7954_v41 = vld [vmem:[#allocation18 + $0xd4] ss:$8 sps:$4 sm:$0xff]  }
 0x8d7   : > { %7335 = vmatprep.subr.bf16.mxu0 %v8604_v61 }
 0x8d8   : > { %4018 = vmatpush1.bf16.msra.mxu1 %v7934_v8  ;;  %v4157_v8 = vld [vmem:[#allocation20 + $0x1c8] sm:$0xff] }
 0x8d9   : > { %4019 = vmatprep.subr.bf16.mxu1 %v7939_v9  ;;  %v6750_v9 = vcombine.low %v4156_v6, %v4160_v7 }
 0x8da   : > { %7336 = vmatpush3.bf16.msra.mxu0 %v7910_v42  ;;  %v7952_v42 = vld [vmem:[#allocation18 + $0xd0] ss:$8 sps:$4 sm:$0xff]  }
 0x8db   : > { %7337 = vmatprep.subr.bf16.mxu0 %v8604_v61 }
 0x8dc   : > { %4020 = vmatpush1.bf16.msra.mxu1 %v7937_v10  ;;  %v6751_v10 = vcombine.high %v4156_v6, %v4160_v7 }
 0x8dd   : > { %4021 = vmatprep.subr.bf16.mxu1 %v7942_v11  ;;  %v4161_v11 = vld [vmem:[#allocation20 + $0x1e8] sm:$0xff] }
 0x8de   : > { %7338 = vmatpush3.bf16.msra.mxu0 %v7911_v43  ;;  %v7957_v43 = vld [vmem:[#allocation18 + $0xc4] ss:$8 sps:$4 sm:$0xff]  }
 0x8df   : > { %7339 = vmatprep.subr.bf16.mxu0 %v8604_v61 }
 0x8e0   : > { %4022 = vmatpush1.bf16.msra.mxu1 %v7940_v12  ;;  %v4148_v12 = vld [vmem:[#allocation20 + $0x180] sm:$0xff] }
 0x8e1   : > { %4023 = vmatprep.subr.bf16.mxu1 %v7945_v13  ;;  %v4152_v13 = vld [vmem:[#allocation20 + $0x1a0] sm:$0xff] }
 0x8e2   : > { %7340 = vmatpush3.bf16.msra.mxu0 %v7912_v47  ;;  %v7955_v47 = vld [vmem:[#allocation18 + $0xc0] ss:$8 sps:$4 sm:$0xff]  }
 0x8e3   : > { %7341 = vmatprep.subr.bf16.mxu0 %v8604_v61 }
 0x8e4   : > { %4024 = vmatpush1.bf16.msra.mxu1 %v7943_v14  ;;  %v6752_v14 = vcombine.low %v4157_v8, %v4161_v11 }
 0x8e5   : > { %4025 = vmatprep.subr.bf16.mxu1 %v7948_v39 }
 0x8e6   : > { %7342 = vmatpush3.bf16.msra.mxu0 %v7913_v48  ;;  %v7958_v48 = vld [vmem:[#allocation18 + $0xb0] ss:$8 sps:$4 sm:$0xff]  }
 0x8e7   : > { %7347 = vmatprep.subr.bf16.mxu0 %v8604_v61 }
 0x8e8   : > { %4026 = vmatpush2.bf16.msra.mxu1 %v7946_v38 }
 0x8e9   : > { %4027 = vmatprep.subr.bf16.mxu1 %v7951_v40  ;;  %v4128_v40 = vld [vmem:[#allocation20 + $0xe0] sm:$0xff] }
 0x8ec   : > { %4028 = vmatpush2.bf16.msra.mxu1 %v7949_v45  ;;  %v4124_v45 = vld [vmem:[#allocation20 + $0xc0] sm:$0xff] }
 0x8ed   : > { %4029 = vmatprep.subr.bf16.mxu1 %v7954_v41  ;;  %v4125_v41 = vld [vmem:[#allocation20 + $0xc8] sm:$0xff] }
 0x8f0   : > { %4030 = vmatpush2.bf16.msra.mxu1 %v7952_v42  ;;  %v4129_v42 = vld [vmem:[#allocation20 + $0xe8] sm:$0xff] }
 0x8f1   : > { %4031 = vmatprep.subr.bf16.mxu1 %v7957_v43 }
 0x8f4   : > { %4032 = vmatpush2.bf16.msra.mxu1 %v7955_v47 }
 0x987   : > { %v3557_v49 = vpop.f32.mrf.mxu1 }
 0x988   : > { %3651 = vmax.xlane.f32.xlu0 %v3557_v49 }
 0x989   : > { %v7305_v46 = vpop.f32.mrf.mxu1  ;;  %v3645_v50 = vpop.f32.mrf.mxu0 }
 0x98a   : > { %3653 = vmax.xlane.f32.xlu1 %v3645_v50  ;;  %v7961_v46 = vld [vmem:[#allocation18 + $0xa0] ss:$8 sps:$4 sm:$0xff]  }
 0x98b   : > { %v3560_v51 = vpop.f32.mrf.mxu1  ;;  %v7325_v52 = vpop.f32.mrf.mxu0 }
 0x98c   : > { %v7964_v51 = vld [vmem:[#allocation18 + $0x90] ss:$8 sps:$4 sm:$0xff]   ;;  %v7969_v52 = vld [vmem:[#allocation18 + $0x84] ss:$8 sps:$4 sm:$0xff]  }
 0x98d   : > { %v7306_v53 = vpop.f32.mrf.mxu1  ;;  %v3648_v44 = vpop.f32.mrf.mxu0 }
 0x98e   : > { %v7967_v53 = vld [vmem:[#allocation18 + $0x80] ss:$8 sps:$4 sm:$0xff]  }
 0x98f   : > { %v7326_v54 = vpop.f32.mrf.mxu0 }
 0xa11   : > { %v3652_v55 = vpop.xlane.xlu0 %3651 }
 0xa12   : > { %v3655_v56 = vsub.f32 %v3557_v49, %v3652_v55  ;;  %v7963_v49 = vld [vmem:[#allocation18 + $0xa4] ss:$8 sps:$4 sm:$0xff]  }
 0xa13   : > { %v3654_v57 = vpop.xlane.xlu1 %3653 }
 0xa14   : > { %v3657_v58 = vmul.f32 1.442695, %v3655_v56  ;;  %v3656_v59 = vsub.f32 %v3645_v50, %v3654_v57  ;;  %v7966_v50 = vld [vmem:[#allocation18 + $0x94] ss:$8 sps:$4 sm:$0xff]  }
 0xa16   : > { %8176 = vpow2.f32 %v3657_v58  ;;  %v3659_v60 = vmul.f32 1.442695, %v3656_v59 }
 0xa18   : > { %8178 = vpow2.f32 %v3659_v60 }
 0xa23   : > { %v8177_v62 = vpop.eup %8176 }
 0xa24   : > { %3661 = vadd.xlane.f32.xlu0 %v8177_v62 }
 0xa25   : > { %v8179_v63 = vpop.eup %8178 }
 0xa26   : > { %3663 = vadd.xlane.f32.xlu1 %v8179_v63 }
 0xaad   : > { %v3662_v15 = vpop.xlane.xlu0 %3661 }
 0xaae   : > { %8180 = vrcp.f32 %v3662_v15  ;;  %v6743_v15 = vcombine.high %v4148_v12, %v4152_v13 }
 0xaaf   : > { %v3664_v17 = vpop.xlane.xlu1 %3663 }
 0xab0   : > { %8182 = vrcp.f32 %v3664_v17  ;;  %v4149_v17 = vld [vmem:[#allocation20 + $0x188] sm:$0xff] }
 0xabb   : > { %v8181_v19 = vpop.eup %8180 }
 0xabc   : > { %v3667_v20 = vmul.f32 %v8181_v19, %v8177_v62  ;;  %v4140_v19 = vld [vmem:[#allocation20 + $0x140] sm:$0xff] }
 0xabd   : > { %v8183_v25 = vpop.eup %8182 }
 0xabe   : > { %v3669_v26 = vpack.c.bf16 %v3667_v20, %v3667_v20  ;;  %v3668_v27 = vmul.f32 %v8183_v25, %v8179_v63  ;;  %v4144_v25 = vld [vmem:[#allocation20 + $0x160] sm:$0xff] }
 0xac0   : > { %7344 = vmatmul.mubr.bf16.vlgmr.msra.gmra.mxu0 %v3669_v26  ;;  %v7189_v29 = vpack.c.bf16 %v3668_v27, %v3667_v20  ;;  %v3670_v37 = vpack.c.bf16 %v3668_v27, %v3668_v27  ;;  %v4141_v26 = vld [vmem:[#allocation20 + $0x148] sm:$0xff] }
 0xac1   : > { %7348 = vmatpush3.bf16.msra.mxu0 %v7914_v28  ;;  %7363 = vmatprep.mubr.msk.bf16.mxu0 %vm8605_vm0, %v8604_v61  ;;  %v4145_v27 = vld [vmem:[#allocation20 + $0x168] sm:$0xff]  ;;  %v6742_v28 = vcombine.low %v4148_v12, %v4152_v13 }
 0xac2   : > { %7349 = vmatprep.subr.bf16.mxu0 %v8604_v61  ;;  %7190 = vst [vmem:[%s9105_s3] sm:$0xff] %v7189_v29   ;;  %v4225_v12 = vld [vmem:[#allocation20 + $0x3e8] sm:$0xff]  ;;  %s8458_s3 = scalar_lea.vmem %s8457_s20, 256 }
 0xac3   : > { %p8460_p4 = scmp.lt.s32.totalorder %s8458_s3, %s8452_s14 }
 0xac5   : > { %7350 = vmatpush3.bf16.msra.mxu0 %v7915_v30  ;;  %v6735_v30 = vcombine.high %v4140_v19, %v4144_v25  ;;  %p8461_p2 = por %p8460_p4, %p8459_p7 }
 0xac6   : > { %7351 = vmatprep.subr.bf16.mxu0 %v8604_v61 }
 0xac7   : > { %p8462_p8 = pnand %p8461_p2, %p8455_p9 }
 0xac9   : > { %7352 = vmatpush3.bf16.msra.mxu0 %v7916_v31  ;;  %v6737_v31 = vcombine.high %v4141_v26, %v4145_v27 }
 0xaca   : > { %7353 = vmatprep.subr.bf16.mxu0 %v8604_v61 }
 0xacd   : > { %7354 = vmatpush3.bf16.msra.mxu0 %v7917_v32  ;;  %v4132_v32 = vld [vmem:[#allocation20 + $0x100] sm:$0xff] }
 0xace   : > { %7355 = vmatprep.subr.bf16.mxu0 %v8604_v61 }
 0xad1   : > { %7356 = vmatpush3.bf16.msra.mxu0 %v7918_v33  ;;  %v4136_v33 = vld [vmem:[#allocation20 + $0x120] sm:$0xff] }
 0xad2   : > { %7357 = vmatprep.subr.bf16.mxu0 %v8604_v61  ;;  %v6727_v38 = vcombine.high %v4132_v32, %v4136_v33  ;;  %v6726_v43 = vcombine.low %v4132_v32, %v4136_v33 }
 0xad5   : > { %7358 = vmatpush3.bf16.msra.mxu0 %v7919_v34  ;;  %v4133_v34 = vld [vmem:[#allocation20 + $0x108] sm:$0xff] }
 0xad6   : > { %7359 = vmatprep.subr.bf16.mxu0 %v8604_v61 }
 0xad9   : > { %7360 = vmatpush3.bf16.msra.mxu0 %v7920_v35  ;;  %v4137_v35 = vld [vmem:[#allocation20 + $0x128] sm:$0xff] }
 0xada   : > { %7361 = vmatprep.subr.bf16.mxu0 %v8604_v61  ;;  %v7960_v61 = vld [vmem:[#allocation18 + $0xb4] ss:$8 sps:$4 sm:$0xff]   ;;  %v6729_v39 = vcombine.high %v4133_v34, %v4137_v35  ;;  %v6728_v47 = vcombine.low %v4133_v34, %v4137_v35 }
 0xadb   : > { %4033 = vmatprep.subr.bf16.mxu1 %v7960_v61  ;;  %v6719_v61 = vcombine.high %v4124_v45, %v4128_v40 }
 0xadc   : > { %4034 = vmatpush2.bf16.msra.mxu1 %v7958_v48  ;;  %v6721_v48 = vcombine.high %v4125_v41, %v4129_v42 }
 0xadd   : > { %7362 = vmatpush3.bf16.msra.mxu0 %v7921_v36  ;;  %4035 = vmatprep.subr.bf16.mxu1 %v7963_v49  ;;  %v6734_v36 = vcombine.low %v4140_v19, %v4144_v25  ;;  %v4116_v49 = vld [vmem:[#allocation20 + $0x80] sm:$0xff]  ;;  %v4213_v19 = vld [vmem:[#allocation20 + $0x388] sm:$0xff] }
 0xade   : > { %4910 = vmatprep.subr.bf16.mxu0 %v6751_v10  ;;  %v4224_v10 = vld [vmem:[#allocation20 + $0x3e0] sm:$0xff] }
 0xae0   : > { %7364 = vmatmul.mubr.bf16.vlgmr.msra.gmra.mxu0 %v3670_v37  ;;  %4036 = vmatpush2.bf16.msra.mxu1 %v7961_v46  ;;  %v6736_v37 = vcombine.low %v4141_v26, %v4145_v27  ;;  %v4120_v46 = vld [vmem:[#allocation20 + $0xa0] sm:$0xff] }
 0xae1   : > { %4037 = vmatprep.subr.bf16.mxu1 %v7966_v50  ;;  %4911 = vmatpush1.bf16.msra.mxu0 %v6750_v9  ;;  %v4117_v50 = vld [vmem:[#allocation20 + $0x88] sm:$0xff]  ;;  %v4220_v9 = vld [vmem:[#allocation20 + $0x3c0] sm:$0xff] }
 0xae2   : > { %4912 = vmatprep.subr.bf16.mxu0 %v6743_v15  ;;  %v6814_v25 = vcombine.low %v4220_v9, %v4224_v10 }
 0xae4   : > { %4038 = vmatpush2.bf16.msra.mxu1 %v7964_v51  ;;  %v4121_v51 = vld [vmem:[#allocation20 + $0xa8] sm:$0xff] }
 0xae5   : > { %4039 = vmatprep.subr.bf16.mxu1 %v7969_v52  ;;  %4913 = vmatpush1.bf16.msra.mxu0 %v6742_v28  ;;  %v6718_v52 = vcombine.low %v4124_v45, %v4128_v40  ;;  %v4205_v45 = vld [vmem:[#allocation20 + $0x348] sm:$0xff] }
 0xae6   : > { %4914 = vmatprep.subr.bf16.mxu0 %v6735_v30 }
 0xae8   : > { %4040 = vmatpush2.bf16.msra.mxu1 %v7967_v53  ;;  %v6720_v53 = vcombine.low %v4125_v41, %v4129_v42  ;;  %v4209_v41 = vld [vmem:[#allocation20 + $0x368] sm:$0xff] }
 0xae9   : > { %4915 = vmatpush1.bf16.msra.mxu0 %v6734_v36 }
 0xaea   : > { %4916 = vmatprep.subr.bf16.mxu0 %v6727_v38  ;;  %v4204_v38 = vld [vmem:[#allocation20 + $0x340] sm:$0xff] }
 0xaed   : > { %4917 = vmatpush1.bf16.msra.mxu0 %v6726_v43  ;;  %v6800_v43 = vcombine.low %v4205_v45, %v4209_v41 }
 0xaee   : > { %4918 = vmatprep.subr.bf16.mxu0 %v6719_v61  ;;  %v4196_v61 = vld [vmem:[#allocation20 + $0x300] sm:$0xff] }
 0xaf1   : > { %4919 = vmatpush1.bf16.msra.mxu0 %v6718_v52  ;;  %v4188_v52 = vld [vmem:[#allocation20 + $0x2c0] sm:$0xff] }
 0xb80   : > { %v3753_v44 = vpop.f32.mrf.mxu0 }
 0xb81   : > { %v3847_v59 = vpack.c.bf16 %v3753_v44, %v3753_v44  ;;  %v6711_v44 = vcombine.high %v4116_v49, %v4120_v46 }
 0xb82   : > { %v7345_v54 = vpop.f32.mrf.mxu0 }
 0xb83   : > { %v6713_v54 = vcombine.high %v4117_v50, %v4121_v51  ;;  %4920 = vmatprep.subr.bf16.mxu0 %v6711_v44 }
 0xb84   : > { %v3756_v55 = vpop.f32.mrf.mxu0 }
 0xb85   : > { %v4108_v55 = vld [vmem:[#allocation20 + $0x40] sm:$0xff] }
 0xb86   : > { %v7346_v56 = vpop.f32.mrf.mxu0 }
 0xb87   : > { %v4112_v56 = vld [vmem:[#allocation20 + $0x60] sm:$0xff] }
 0xba0   : > { %v3841_v57 = vpop.f32.mrf.mxu0 }
 0xba1   : > { %v3848_v58 = vpack.c.bf16 %v3841_v57, %v3841_v57  ;;  %v4109_v57 = vld [vmem:[#allocation20 + $0x48] sm:$0xff] }
 0xba2   : > { %v7365_v60 = vpop.f32.mrf.mxu0 }
 0xba3   : > { %4041 = vmatprep.mubr.bf16.mxu1 %v3848_v58  ;;  %v4113_v58 = vld [vmem:[#allocation20 + $0x68] sm:$0xff]  ;;  %v6712_v60 = vcombine.low %v4117_v50, %v4121_v51 }
 0xba4   : > { %v3844_v62 = vpop.f32.mrf.mxu0  ;;  %4042 = vmatmul.mubr.bf16.vlgmr.msra.gmra.mxu1 %v3847_v59  ;;  %v6710_v59 = vcombine.low %v4116_v49, %v4120_v46  ;;  %v6704_v6 = vcombine.low %v4109_v57, %v4113_v58  ;;  %v4197_v49 = vld [vmem:[#allocation20 + $0x308] sm:$0xff] }
 0xba5   : > { %v6703_v62 = vcombine.high %v4108_v55, %v4112_v56  ;;  %v4201_v51 = vld [vmem:[#allocation20 + $0x328] sm:$0xff] }
 0xba6   : > { %v7366_v63 = vpop.f32.mrf.mxu0  ;;  %4921 = vmatpush1.bf16.msra.mxu0 %v6710_v59  ;;  %v6792_v44 = vcombine.low %v4197_v49, %v4201_v51 }
 0xba7   : > { %v6705_v63 = vcombine.high %v4109_v57, %v4113_v58  ;;  %4922 = vmatprep.subr.bf16.mxu0 %v6703_v62  ;;  %v4193_v57 = vld [vmem:[#allocation20 + $0x2e8] sm:$0xff]  ;;  %v4180_v58 = vld [vmem:[#allocation20 + $0x280] sm:$0xff] }
 0xba8   : > { %v4181_v62 = vld [vmem:[#allocation20 + $0x288] sm:$0xff] }
 0xc64   : > { %v4043_v0 = vpop.f32.mrf.mxu1 }
 0xc65   : > { %v9115_v2 = vadd.f32 %v4043_v0, %v9061_v16  ;;  %v6753_v16 = vcombine.high %v4157_v8, %v4161_v11  ;;  %v4100_v0 = vld [vmem:[#allocation20] sm:$0xff]  ;;  %v4221_v11 = vld [vmem:[#allocation20 + $0x3c8] sm:$0xff] }
 0xc66   : > { %v4045_v1 = vpop.f32.mrf.mxu1  ;;  %v6817_v15 = vcombine.high %v4221_v11, %v4225_v12  ;;  %v6816_v26 = vcombine.low %v4221_v11, %v4225_v12 }
 0xc67   : > { %v9118_v3 = vadd.f32 %v4045_v1, %v9064_v18  ;;  %v4153_v18 = vld [vmem:[#allocation20 + $0x1a8] sm:$0xff]  ;;  %4951 = vmatprep.subr.bf16.mxu1 %v6753_v16  ;;  %v4104_v1 = vld [vmem:[#allocation20 + $0x20] sm:$0xff]  ;;  %v6815_v16 = vcombine.high %v4220_v9, %v4224_v10 }
 0xc68   : > { %v4047_v4 = vpop.f32.mrf.mxu1  ;;  %v6745_v20 = vcombine.high %v4149_v17, %v4153_v18  ;;  %4952 = vmatpush1.bf16.msra.mxu1 %v6752_v14  ;;  %v6744_v29 = vcombine.low %v4149_v17, %v4153_v18  ;;  %v6695_v7 = vcombine.high %v4100_v0, %v4104_v1  ;;  %v6694_v13 = vcombine.low %v4100_v0, %v4104_v1  ;;  %v4212_v17 = vld [vmem:[#allocation20 + $0x380] sm:$0xff] }
 0xc69   : > { %v4056_v5 = vadd.f32 %v9118_v3, %v9115_v2  ;;  %v4101_v4 = vld [vmem:[#allocation20 + $0x8] sm:$0xff]  ;;  %v4216_v18 = vld [vmem:[#allocation20 + $0x3a0] sm:$0xff] }
 0xc6a   : > { %v4048_v21 = vpop.f32.mrf.mxu1  ;;  %4953 = vmatprep.subr.bf16.mxu1 %v6745_v20  ;;  %v4217_v20 = vld [vmem:[#allocation20 + $0x3a8] sm:$0xff]  ;;  %v6807_v27 = vcombine.high %v4212_v17, %v4216_v18 }
 0xc6b   : > { %4057 = vadd.xlane.f32.xlu0 %v4056_v5  ;;  %v4105_v5 = vld [vmem:[#allocation20 + $0x28] sm:$0xff]  ;;  %v6702_v21 = vcombine.low %v4108_v55, %v4112_v56  ;;  %v6809_v28 = vcombine.high %v4213_v19, %v4217_v20  ;;  %v6808_v30 = vcombine.low %v4213_v19, %v4217_v20 }
 0xc6c   : > { %4954 = vmatpush1.bf16.msra.mxu1 %v6744_v29  ;;  %v6697_v8 = vcombine.high %v4101_v4, %v4105_v5  ;;  %v6696_v14 = vcombine.low %v4101_v4, %v4105_v5  ;;  %v6806_v29 = vcombine.low %v4212_v17, %v4216_v18  ;;  %v4189_v56 = vld [vmem:[#allocation20 + $0x2c8] sm:$0xff] }
 0xc6d   : > { %4955 = vmatprep.subr.bf16.mxu1 %v6737_v31  ;;  %4923 = vmatpush1.bf16.msra.mxu0 %v6702_v21  ;;  %v6785_v59 = vcombine.high %v4189_v56, %v4193_v57  ;;  %v6784_v1 = vcombine.low %v4189_v56, %v4193_v57  ;;  %v4172_v21 = vld [vmem:[#allocation20 + $0x240] sm:$0xff] }
 0xc6e   : > { %4924 = vmatprep.subr.bf16.mxu0 %v6695_v7  ;;  %v4173_v7 = vld [vmem:[#allocation20 + $0x248] sm:$0xff] }
 0xc70   : > { %4956 = vmatpush1.bf16.msra.mxu1 %v6736_v37 }
 0xc71   : > { %4957 = vmatprep.subr.bf16.mxu1 %v6729_v39  ;;  %4925 = vmatpush1.bf16.msra.mxu0 %v6694_v13  ;;  %v4208_v39 = vld [vmem:[#allocation20 + $0x360] sm:$0xff] }
 0xc72   : > { %4926 = vmatprep.subr.bf16.mxu0 %v6815_v16  ;;  %v6799_v40 = vcombine.high %v4204_v38, %v4208_v39  ;;  %v6798_v42 = vcombine.low %v4204_v38, %v4208_v39  ;;  %v4164_v13 = vld [vmem:[#allocation20 + $0x200] sm:$0xff]  ;;  %v4165_v16 = vld [vmem:[#allocation20 + $0x208] sm:$0xff] }
 0xc74   : > { %4958 = vmatpush1.bf16.msra.mxu1 %v6728_v47  ;;  %v6801_v47 = vcombine.high %v4205_v45, %v4209_v41  ;;  %v4054_v45 = vld [vmem:[%s9264_s12] sm:$0x3] }
 0xc75   : > { %4959 = vmatprep.subr.bf16.mxu1 %v6721_v48  ;;  %4927 = vmatpush2.bf16.msra.mxu0 %v6814_v25  ;;  %v4200_v48 = vld [vmem:[#allocation20 + $0x320] sm:$0xff]  ;;  %v4080_v41 = vrot.slane %v4054_v45, %v8986_v24 }
 0xc76   : > { %4928 = vmatprep.subr.bf16.mxu0 %v6807_v27  ;;  %v6790_v46 = vcombine.low %v4196_v61, %v4200_v48  ;;  %v6791_v50 = vcombine.high %v4196_v61, %v4200_v48  ;;  %v4158_v27 = vld [vmem:[#allocation20 + $0x1d0] sm:$0xff] }
 0xc78   : > { %4960 = vmatpush1.bf16.msra.mxu1 %v6720_v53  ;;  %v4192_v53 = vld [vmem:[#allocation20 + $0x2e0] sm:$0xff] }
 0xc79   : > { %4961 = vmatprep.subr.bf16.mxu1 %v6713_v54  ;;  %4929 = vmatpush2.bf16.msra.mxu0 %v6806_v29  ;;  %v6793_v54 = vcombine.high %v4197_v49, %v4201_v51  ;;  %v6783_v55 = vcombine.high %v4188_v52, %v4192_v53  ;;  %v6782_v0 = vcombine.low %v4188_v52, %v4192_v53  ;;  %v4159_v29 = vld [vmem:[#allocation20 + $0x1d8] sm:$0xff]  ;;  %v4150_v53 = vld [vmem:[#allocation20 + $0x190] sm:$0xff] }
 0xc7a   : > { %4930 = vmatprep.subr.bf16.mxu0 %v6799_v40  ;;  %v4055_v40 = vld [vmem:[%s9265_s13] sm:$0x3] }
 0xc7b   : > { %v4093_v61 = vrot.slane %v4055_v40, %v8986_v24  ;;  %v4089_v49 = vrot.slane %v4055_v40, %v8983_v23 }
 0xc7c   : > { %4962 = vmatpush1.bf16.msra.mxu1 %v6712_v60  ;;  %v4184_v60 = vld [vmem:[#allocation20 + $0x2a0] sm:$0xff] }
 0xc7d   : > { %4963 = vmatprep.subr.bf16.mxu1 %v6705_v63  ;;  %4931 = vmatpush2.bf16.msra.mxu0 %v6798_v42  ;;  %v4185_v63 = vld [vmem:[#allocation20 + $0x2a8] sm:$0xff]  ;;  %v6775_v4 = vcombine.high %v4180_v58, %v4184_v60  ;;  %v6774_v9 = vcombine.low %v4180_v58, %v4184_v60  ;;  %v4076_v42 = vrot.slane %v4054_v45, %v8983_v23  ;;  %v4142_v58 = vld [vmem:[#allocation20 + $0x150] sm:$0xff] }
 0xc7e   : > { %4932 = vmatprep.subr.bf16.mxu0 %v6791_v50  ;;  %v6777_v5 = vcombine.high %v4181_v62, %v4185_v63  ;;  %v6776_v10 = vcombine.low %v4181_v62, %v4185_v63  ;;  %v4146_v60 = vld [vmem:[#allocation20 + $0x170] sm:$0xff]  ;;  %v4147_v62 = vld [vmem:[#allocation20 + $0x178] sm:$0xff] }
 0xc80   : > { %4964 = vmatpush1.bf16.msra.mxu1 %v6704_v6  ;;  %v4176_v6 = vld [vmem:[#allocation20 + $0x260] sm:$0xff] }
 0xc81   : > { %4965 = vmatprep.subr.bf16.mxu1 %v6697_v8  ;;  %4933 = vmatpush2.bf16.msra.mxu0 %v6790_v46  ;;  %v4177_v8 = vld [vmem:[#allocation20 + $0x268] sm:$0xff]  ;;  %v6767_v11 = vcombine.high %v4172_v21, %v4176_v6  ;;  %v6766_v17 = vcombine.low %v4172_v21, %v4176_v6  ;;  %v4138_v21 = vld [vmem:[#allocation20 + $0x130] sm:$0xff]  ;;  %v4135_v6 = vld [vmem:[#allocation20 + $0x118] sm:$0xff] }
 0xc82   : > { %4934 = vmatprep.subr.bf16.mxu0 %v6783_v55  ;;  %v6769_v12 = vcombine.high %v4173_v7, %v4177_v8  ;;  %v6768_v18 = vcombine.low %v4173_v7, %v4177_v8  ;;  %v4155_v55 = vld [vmem:[#allocation20 + $0x1b8] sm:$0xff]  ;;  %v6738_v8 = vcombine.low %v4142_v58, %v4146_v60 }
 0xc83   : > { %v4139_v7 = vld [vmem:[#allocation20 + $0x138] sm:$0xff] }
 0xc84   : > { %4966 = vmatpush1.bf16.msra.mxu1 %v6696_v14  ;;  %v4168_v14 = vld [vmem:[#allocation20 + $0x220] sm:$0xff] }
 0xc85   : > { %4967 = vmatprep.subr.bf16.mxu1 %v6817_v15  ;;  %4935 = vmatpush2.bf16.msra.mxu0 %v6782_v0  ;;  %v4169_v15 = vld [vmem:[#allocation20 + $0x228] sm:$0xff]  ;;  %v6759_v19 = vcombine.high %v4164_v13, %v4168_v14  ;;  %v6758_v25 = vcombine.low %v4164_v13, %v4168_v14  ;;  %v4130_v13 = vld [vmem:[#allocation20 + $0xf0] sm:$0xff]  ;;  %v4127_v14 = vld [vmem:[#allocation20 + $0xd8] sm:$0xff] }
 0xc86   : > { %4936 = vmatprep.subr.bf16.mxu0 %v6775_v4  ;;  %v6761_v20 = vcombine.high %v4165_v16, %v4169_v15 }
 0xc88   : > { %4968 = vmatpush2.bf16.msra.mxu1 %v6816_v26  ;;  %v6760_v26 = vcombine.low %v4165_v16, %v4169_v15  ;;  %v4131_v16 = vld [vmem:[#allocation20 + $0xf8] sm:$0xff] }
 0xc89   : > { %4969 = vmatprep.subr.bf16.mxu1 %v6809_v28  ;;  %4937 = vmatpush2.bf16.msra.mxu0 %v6774_v9  ;;  %v4162_v28 = vld [vmem:[#allocation20 + $0x1f0] sm:$0xff] }
 0xc8a   : > { %4938 = vmatprep.subr.bf16.mxu0 %v6767_v11  ;;  %v6733_v11 = vcombine.high %v4135_v6, %v4139_v7 }
 0xc8c   : > { %4970 = vmatpush2.bf16.msra.mxu1 %v6808_v30  ;;  %v6755_v30 = vcombine.high %v4158_v27, %v4162_v28 }
 0xc8d   : > { %4971 = vmatprep.subr.bf16.mxu1 %v6801_v47  ;;  %4939 = vmatpush2.bf16.msra.mxu0 %v6766_v17  ;;  %v6732_v17 = vcombine.low %v4135_v6, %v4139_v7 }
 0xc8e   : > { %4940 = vmatprep.subr.bf16.mxu0 %v6759_v19  ;;  %v6725_v19 = vcombine.high %v4127_v14, %v4131_v16 }
 0xc90   : > { %4972 = vmatpush2.bf16.msra.mxu1 %v6800_v43 }
 0xc91   : > { %4973 = vmatprep.subr.bf16.mxu1 %v6793_v54  ;;  %4941 = vmatpush2.bf16.msra.mxu0 %v6758_v25  ;;  %v4151_v54 = vld [vmem:[#allocation20 + $0x198] sm:$0xff]  ;;  %v4122_v25 = vld [vmem:[#allocation20 + $0xb0] sm:$0xff] }
 0xc92   : > { %4992 = vmatprep.subr.bf16.mxu0 %v6755_v30  ;;  %v6748_v0 = vcombine.low %v4151_v54, %v4155_v55 }
 0xc94   : > { %4974 = vmatpush2.bf16.msra.mxu1 %v6792_v44  ;;  %v4154_v44 = vld [vmem:[#allocation20 + $0x1b0] sm:$0xff] }
 0xc95   : > { %4975 = vmatprep.subr.bf16.mxu1 %v6785_v59  ;;  %v6749_v59 = vcombine.high %v4151_v54, %v4155_v55  ;;  %v6746_v63 = vcombine.low %v4150_v53, %v4154_v44 }
 0xc98   : > { %4976 = vmatpush2.bf16.msra.mxu1 %v6784_v1  ;;  %v6739_v1 = vcombine.high %v4142_v58, %v4146_v60  ;;  %v4214_v58 = vld [vmem:[#allocation20 + $0x390] sm:$0xff]  ;;  %v4219_v60 = vld [vmem:[#allocation20 + $0x3b8] sm:$0xff] }
 0xc99   : > { %4977 = vmatprep.subr.bf16.mxu1 %v6777_v5  ;;  %v4134_v5 = vld [vmem:[#allocation20 + $0x110] sm:$0xff] }
 0xc9a   : > { %v6730_v15 = vcombine.low %v4134_v5, %v4138_v21 }
 0xc9c   : > { %4978 = vmatpush2.bf16.msra.mxu1 %v6776_v10  ;;  %v6731_v10 = vcombine.high %v4134_v5, %v4138_v21  ;;  %v4207_v5 = vld [vmem:[#allocation20 + $0x358] sm:$0xff] }
 0xc9d   : > { %4979 = vmatprep.subr.bf16.mxu1 %v6769_v12  ;;  %v4126_v12 = vld [vmem:[#allocation20 + $0xd0] sm:$0xff]  ;;  %v4211_v21 = vld [vmem:[#allocation20 + $0x378] sm:$0xff] }
 0xca0   : > { %4980 = vmatpush2.bf16.msra.mxu1 %v6768_v18  ;;  %v6723_v18 = vcombine.high %v4126_v12, %v4130_v13 }
 0xca1   : > { %4981 = vmatprep.subr.bf16.mxu1 %v6761_v20  ;;  %v4118_v20 = vld [vmem:[#allocation20 + $0x90] sm:$0xff] }
 0xca2   : > { %v6715_v30 = vcombine.high %v4118_v20, %v4122_v25 }
 0xca4   : > { %4982 = vmatpush2.bf16.msra.mxu1 %v6760_v26  ;;  %v4119_v26 = vld [vmem:[#allocation20 + $0x98] sm:$0xff] }
 0xcf4   : > { %v4058_v31 = vpop.xlane.xlu0 %4057 }
 0xcf5   : > { %v4059_v32 = vmul.f32 0.00390625, %v4058_v31  ;;  %v4163_v31 = vld [vmem:[#allocation20 + $0x1f8] sm:$0xff] }
 0xcf7   : > { %v9123_v33 = vsub.f32 %v9115_v2, %v4059_v32  ;;  %v9126_v34 = vsub.f32 %v9118_v3, %v4059_v32  ;;  %v6754_v32 = vcombine.low %v4158_v27, %v4162_v28  ;;  %v4123_v27 = vld [vmem:[#allocation20 + $0xb8] sm:$0xff]  ;;  %v6722_v28 = vcombine.low %v4126_v12, %v4130_v13 }
 0xcf8   : > { %v4199_v12 = vld [vmem:[#allocation20 + $0x318] sm:$0xff] }
 0xcf9   : > { %v4062_v35 = vmul.f32 %v9123_v33, %v9123_v33  ;;  %v4063_v36 = vmul.f32 %v9126_v34, %v9126_v34  ;;  %v4203_v13 = vld [vmem:[#allocation20 + $0x338] sm:$0xff] }
 0xcfb   : > { %v4064_v37 = vadd.f32 %v4063_v36, %v4062_v35  ;;  %v6756_v35 = vcombine.low %v4159_v29, %v4163_v31  ;;  %v6757_v36 = vcombine.high %v4159_v29, %v4163_v31  ;;  %v6724_v29 = vcombine.low %v4127_v14, %v4131_v16 }
 0xcfc   : > { %v6717_v31 = vcombine.high %v4119_v26, %v4123_v27  ;;  %v6804_v16 = vcombine.low %v4207_v5, %v4211_v21 }
 0xcfd   : > { %4065 = vadd.xlane.f32.xlu1 %v4064_v37  ;;  %5033 = vmatprep.subr.bf16.mxu1 %v6757_v36  ;;  %v4111_v36 = vld [vmem:[#allocation20 + $0x58] sm:$0xff] }
 0xd86   : > { %v4066_v37 = vpop.xlane.xlu1 %4065 }
 0xd87   : > { %v4067_v38 = vmul.f32 0.00390625, %v4066_v37  ;;  %v4115_v37 = vld [vmem:[#allocation20 + $0x78] sm:$0xff] }
 0xd88   : > { %v6709_v40 = vcombine.high %v4111_v36, %v4115_v37 }
 0xd89   : > { %v4068_v39 = vadd.f32 1e-05, %v4067_v38  ;;  %v6714_v38 = vcombine.low %v4118_v20, %v4122_v25  ;;  %v4191_v20 = vld [vmem:[#allocation20 + $0x2d8] sm:$0xff] }
 0xd8a   : > { %v4195_v25 = vld [vmem:[#allocation20 + $0x2f8] sm:$0xff] }
 0xd8b   : > { %8184 = vrsqrt.f32 %v4068_v39  ;;  %v6716_v39 = vcombine.low %v4119_v26, %v4123_v27  ;;  %v6796_v27 = vcombine.low %v4199_v12, %v4203_v13 }
 0xd98   : > { %v8185_v43 = vpop.eup %8184 }
 0xd99   : > { %v4071_v47 = vmul.f32 %v8185_v43, %v9126_v34  ;;  %v4070_v48 = vmul.f32 %v8185_v43, %v9123_v33  ;;  %v6747_v34 = vcombine.high %v4150_v53, %v4154_v44  ;;  %v4143_v33 = vld [vmem:[#allocation20 + $0x158] sm:$0xff] }
 0xd9a   : > { %v6741_v4 = vcombine.high %v4143_v33, %v4147_v62  ;;  %v6740_v9 = vcombine.low %v4143_v33, %v4147_v62  ;;  %v4103_v43 = vld [vmem:[#allocation20 + $0x18] sm:$0xff] }
 0xd9b   : > { %v4084_v46 = vmul.f32 %v4080_v41, %v4071_v47  ;;  %v4083_v50 = vmul.f32 %v4076_v42, %v4070_v48  ;;  %v4102_v41 = vld [vmem:[#allocation20 + $0x10] sm:$0xff]  ;;  %v4107_v47 = vld [vmem:[#allocation20 + $0x38] sm:$0xff]  ;;  %v6708_v48 = vcombine.low %v4111_v36, %v4115_v37  ;;  %v6788_v37 = vcombine.low %v4191_v20, %v4195_v25 }
 0xd9c   : > { %v4106_v42 = vld [vmem:[#allocation20 + $0x30] sm:$0xff]  ;;  %v4227_v53 = vld [vmem:[#allocation20 + $0x3f8] sm:$0xff]  ;;  %v6700_v54 = vcombine.low %v4103_v43, %v4107_v47 }
 0xd9d   : > { %v4097_v51 = vadd.f32 %v4093_v61, %v4084_v46  ;;  %v4096_v52 = vadd.f32 %v4089_v49, %v4083_v50  ;;  %v6699_v49 = vcombine.high %v4102_v41, %v4106_v42  ;;  %v6701_v46 = vcombine.high %v4103_v43, %v4107_v47  ;;  %v4222_v50 = vld [vmem:[#allocation20 + $0x3d0] sm:$0xff] }
 0xd9e   : > { %v6698_v44 = vcombine.low %v4102_v41, %v4106_v42  ;;  %v4175_v41 = vld [vmem:[#allocation20 + $0x258] sm:$0xff] }
 0xd9f   : > { %v4099_v56 = vpack.c.bf16 %v4097_v51, %v4097_v51  ;;  %v9144_v57 = vpack.c.bf16 %v4096_v52, %v4096_v52  ;;  %v4226_v51 = vld [vmem:[#allocation20 + $0x3f0] sm:$0xff]  ;;  %v4223_v52 = vld [vmem:[#allocation20 + $0x3d8] sm:$0xff] }
 0xda0   : > { %v6819_v55 = vcombine.high %v4222_v50, %v4226_v51  ;;  %v6818_v33 = vcombine.low %v4222_v50, %v4226_v51  ;;  %v6820_v62 = vcombine.low %v4223_v52, %v4227_v53  ;;  %v4179_v42 = vld [vmem:[#allocation20 + $0x278] sm:$0xff] }
 0xda1   : > { %4942 = vmatprep.mubr.bf16.mxu0 %v4099_v56  ;;  %4983 = vmatprep.mubr.bf16.mxu1 %v4099_v56  ;;  %v4167_v50 = vld [vmem:[#allocation20 + $0x218] sm:$0xff] }
 0xda2   : > { %4943 = vmatmul.mubr.bf16.vlgmr.msra.gmra.mxu0 %v9144_v57  ;;  %4984 = vmatmul.mubr.bf16.vlgmr.msra.gmra.mxu1 %v9144_v57  ;;  %v4171_v51 = vld [vmem:[#allocation20 + $0x238] sm:$0xff] }
 0xda3   : > { %4993 = vmatpush1.bf16.msra.mxu0 %v6754_v32  ;;  %5034 = vmatpush1.bf16.msra.mxu1 %v6756_v35  ;;  %v4110_v32 = vld [vmem:[#allocation20 + $0x50] sm:$0xff] }
 0xda4   : > { %5024 = vmatprep.mubr.bf16.mxu0 %v4099_v56  ;;  %5065 = vmatprep.mubr.bf16.mxu1 %v4099_v56  ;;  %v4114_v35 = vld [vmem:[#allocation20 + $0x70] sm:$0xff]  ;;  %v6821_v56 = vcombine.high %v4223_v52, %v4227_v53  ;;  %v6772_v53 = vcombine.low %v4175_v41, %v4179_v42 }
 0xda5   : > { %4994 = vmatprep.subr.bf16.mxu0 %v6747_v34  ;;  %5035 = vmatprep.subr.bf16.mxu1 %v6749_v59  ;;  %v6707_v45 = vcombine.high %v4110_v32, %v4114_v35  ;;  %v6706_v61 = vcombine.low %v4110_v32, %v4114_v35  ;;  %v4218_v34 = vld [vmem:[#allocation20 + $0x3b0] sm:$0xff]  ;;  %v4215_v59 = vld [vmem:[#allocation20 + $0x398] sm:$0xff] }
 0xda6   : > { %v6810_v6 = vcombine.low %v4214_v58, %v4218_v34  ;;  %v6812_v7 = vcombine.low %v4215_v59, %v4219_v60  ;;  %v4183_v32 = vld [vmem:[#allocation20 + $0x298] sm:$0xff] }
 0xda7   : > { %4995 = vmatpush1.bf16.msra.mxu0 %v6746_v63  ;;  %5036 = vmatpush1.bf16.msra.mxu1 %v6748_v0  ;;  %v6811_v63 = vcombine.high %v4214_v58, %v4218_v34  ;;  %v6813_v0 = vcombine.high %v4215_v59, %v4219_v60  ;;  %v4187_v35 = vld [vmem:[#allocation20 + $0x2b8] sm:$0xff] }
 0xda8   : > { %4996 = vmatprep.subr.bf16.mxu0 %v6739_v1  ;;  %5037 = vmatprep.subr.bf16.mxu1 %v6741_v4  ;;  %v4206_v1 = vld [vmem:[#allocation20 + $0x350] sm:$0xff]  ;;  %v6780_v47 = vcombine.low %v4183_v32, %v4187_v35 }
 0xda9   : > { %v4210_v4 = vld [vmem:[#allocation20 + $0x370] sm:$0xff] }
 0xdaa   : > { %v6802_v14 = vcombine.low %v4206_v1, %v4210_v4  ;;  %v7972_v58 = vld [vmem:[#allocation21 + $0x74] ss:$8 sps:$4 sm:$0xff]   ;;  %v7970_v59 = vld [vmem:[#allocation21 + $0x70] ss:$8 sps:$4 sm:$0xff]  }
 0xdab   : > { %4997 = vmatpush1.bf16.msra.mxu0 %v6738_v8  ;;  %5038 = vmatpush1.bf16.msra.mxu1 %v6740_v9  ;;  %v6803_v8 = vcombine.high %v4206_v1, %v4210_v4  ;;  %v6805_v9 = vcombine.high %v4207_v5, %v4211_v21  ;;  %v7975_v34 = vld [vmem:[#allocation21 + $0x174] ss:$8 sps:$4 sm:$0xff]   ;;  %v7973_v60 = vld [vmem:[#allocation21 + $0x170] ss:$8 sps:$4 sm:$0xff]  }
 0xdac   : > { %4998 = vmatprep.subr.bf16.mxu0 %v6731_v10  ;;  %5039 = vmatprep.subr.bf16.mxu1 %v6733_v11  ;;  %v4198_v10 = vld [vmem:[#allocation20 + $0x310] sm:$0xff] }
 0xdad   : > { %v4202_v11 = vld [vmem:[#allocation20 + $0x330] sm:$0xff] }
 0xdae   : > { %v6794_v26 = vcombine.low %v4198_v10, %v4202_v11  ;;  %v7984_v1 = vld [vmem:[#allocation21 + $0x54] ss:$8 sps:$4 sm:$0xff]   ;;  %v7982_v5 = vld [vmem:[#allocation21 + $0x50] ss:$8 sps:$4 sm:$0xff]  }
 0xdaf   : > { %4999 = vmatpush1.bf16.msra.mxu0 %v6730_v15  ;;  %5040 = vmatpush1.bf16.msra.mxu1 %v6732_v17  ;;  %v6795_v15 = vcombine.high %v4198_v10, %v4202_v11  ;;  %v6797_v17 = vcombine.high %v4199_v12, %v4203_v13  ;;  %v7987_v4 = vld [vmem:[#allocation21 + $0x154] ss:$8 sps:$4 sm:$0xff]   ;;  %v7985_v21 = vld [vmem:[#allocation21 + $0x150] ss:$8 sps:$4 sm:$0xff]   ;;  %v8002_v13 = vld [vmem:[#allocation21 + $0x24] ss:$8 sps:$4 sm:$0xff]  }
 0xdb0   : > { %5000 = vmatprep.subr.bf16.mxu0 %v6723_v18  ;;  %5041 = vmatprep.subr.bf16.mxu1 %v6725_v19  ;;  %v4190_v18 = vld [vmem:[#allocation20 + $0x2d0] sm:$0xff] }
 0xdb1   : > { %v4194_v19 = vld [vmem:[#allocation20 + $0x2f0] sm:$0xff] }
 0xdb2   : > { %v6786_v36 = vcombine.low %v4190_v18, %v4194_v19  ;;  %v7999_v10 = vld [vmem:[#allocation21 + $0x134] ss:$8 sps:$4 sm:$0xff]   ;;  %v7994_v11 = vld [vmem:[#allocation21 + $0x30] ss:$8 sps:$4 sm:$0xff]  }
 0xdb3   : > { %5001 = vmatpush1.bf16.msra.mxu0 %v6722_v28  ;;  %5042 = vmatpush1.bf16.msra.mxu1 %v6724_v29  ;;  %v6787_v28 = vcombine.high %v4190_v18, %v4194_v19  ;;  %v6789_v29 = vcombine.high %v4191_v20, %v4195_v25  ;;  %v7997_v12 = vld [vmem:[#allocation21 + $0x130] ss:$8 sps:$4 sm:$0xff]   ;;  %v8011_v18 = vld [vmem:[#allocation21 + $0x114] ss:$8 sps:$4 sm:$0xff]   ;;  %v8014_v25 = vld [vmem:[#allocation21 + $0x4] ss:$8 sps:$4 sm:$0xff]  }
 0xdb4   : > { %5002 = vmatprep.subr.bf16.mxu0 %v6715_v30  ;;  %5043 = vmatprep.subr.bf16.mxu1 %v6717_v31  ;;  %v4182_v30 = vld [vmem:[#allocation20 + $0x290] sm:$0xff] }
 0xdb5   : > { %v4186_v31 = vld [vmem:[#allocation20 + $0x2b0] sm:$0xff] }
 0xdb6   : > { %v6778_v43 = vcombine.low %v4182_v30, %v4186_v31  ;;  %v8006_v19 = vld [vmem:[#allocation21 + $0x10] ss:$8 sps:$4 sm:$0xff]  }
 0xdb7   : > { %5003 = vmatpush1.bf16.msra.mxu0 %v6714_v38  ;;  %5044 = vmatpush1.bf16.msra.mxu1 %v6716_v39  ;;  %v6779_v38 = vcombine.high %v4182_v30, %v4186_v31  ;;  %v6781_v39 = vcombine.high %v4183_v32, %v4187_v35  ;;  %v8009_v20 = vld [vmem:[#allocation21 + $0x110] ss:$8 sps:$4 sm:$0xff]   ;;  %v8023_v30 = vld [vmem:[#allocation21 + $0x1f4] ss:$8 sps:$4 sm:$0xff]   ;;  %v8026_v35 = vld [vmem:[#allocation21 + $0xe4] ss:$8 sps:$4 sm:$0xff]  }
 0xdb8   : > { %5004 = vmatprep.subr.bf16.mxu0 %v6707_v45  ;;  %5045 = vmatprep.subr.bf16.mxu1 %v6709_v40  ;;  %v4174_v45 = vld [vmem:[#allocation20 + $0x250] sm:$0xff] }
 0xdb9   : > { %v4178_v40 = vld [vmem:[#allocation20 + $0x270] sm:$0xff] }
 0xdba   : > { %v6770_v52 = vcombine.low %v4174_v45, %v4178_v40  ;;  %v8018_v31 = vld [vmem:[#allocation21 + $0xf0] ss:$8 sps:$4 sm:$0xff]  }
 0xdbb   : > { %5005 = vmatpush1.bf16.msra.mxu0 %v6706_v61  ;;  %5046 = vmatpush1.bf16.msra.mxu1 %v6708_v48  ;;  %v6771_v61 = vcombine.high %v4174_v45, %v4178_v40  ;;  %v6773_v48 = vcombine.high %v4175_v41, %v4179_v42  ;;  %v8021_v32 = vld [vmem:[#allocation21 + $0x1f0] ss:$8 sps:$4 sm:$0xff]   ;;  %v8035_v45 = vld [vmem:[#allocation21 + $0x1d4] ss:$8 sps:$4 sm:$0xff]   ;;  %v8038_v42 = vld [vmem:[#allocation21 + $0xc4] ss:$8 sps:$4 sm:$0xff]  }
 0xdbc   : > { %5006 = vmatprep.subr.bf16.mxu0 %v6699_v49  ;;  %5047 = vmatprep.subr.bf16.mxu1 %v6701_v46  ;;  %v4166_v49 = vld [vmem:[#allocation20 + $0x210] sm:$0xff] }
 0xdbd   : > { %v4170_v46 = vld [vmem:[#allocation20 + $0x230] sm:$0xff] }
 0xdbe   : > { %v8030_v40 = vld [vmem:[#allocation21 + $0xd0] ss:$8 sps:$4 sm:$0xff]  }
 0xdbf   : > { %5007 = vmatpush1.bf16.msra.mxu0 %v6698_v44  ;;  %5048 = vmatpush1.bf16.msra.mxu1 %v6700_v54  ;;  %v6763_v44 = vcombine.high %v4166_v49, %v4170_v46  ;;  %v6765_v54 = vcombine.high %v4167_v50, %v4171_v51  ;;  %v8033_v41 = vld [vmem:[#allocation21 + $0x1d0] ss:$8 sps:$4 sm:$0xff]  }
 0xdc0   : > { %5008 = vmatprep.subr.bf16.mxu0 %v6819_v55  ;;  %5049 = vmatprep.subr.bf16.mxu1 %v6821_v56  ;;  %v6762_v55 = vcombine.low %v4166_v49, %v4170_v46  ;;  %v6764_v56 = vcombine.low %v4167_v50, %v4171_v51  ;;  %v8047_v49 = vld [vmem:[#allocation21 + $0x1b4] ss:$8 sps:$4 sm:$0xff]   ;;  %v8042_v46 = vld [vmem:[#allocation21 + $0xb0] ss:$8 sps:$4 sm:$0xff]   ;;  %v8050_v51 = vld [vmem:[#allocation21 + $0xa4] ss:$8 sps:$4 sm:$0xff]  }
 0xdc1   : > { %v8045_v50 = vld [vmem:[#allocation21 + $0x1b0] ss:$8 sps:$4 sm:$0xff]  }
 0xdc3   : > { %5009 = vmatpush2.bf16.msra.mxu0 %v6818_v33  ;;  %5050 = vmatpush2.bf16.msra.mxu1 %v6820_v62  ;;  %v7978_v33 = vld [vmem:[#allocation21 + $0x64] ss:$8 sps:$4 sm:$0xff]  }
 0xdc4   : > { %5010 = vmatprep.subr.bf16.mxu0 %v6811_v63  ;;  %5051 = vmatprep.subr.bf16.mxu1 %v6813_v0  ;;  %v7981_v62 = vld [vmem:[#allocation21 + $0x164] ss:$8 sps:$4 sm:$0xff]   ;;  %v7976_v63 = vld [vmem:[#allocation21 + $0x60] ss:$8 sps:$4 sm:$0xff]  }
 0xdc5   : > { %v7979_v0 = vld [vmem:[#allocation21 + $0x160] ss:$8 sps:$4 sm:$0xff]  }
 0xdc7   : > { %5011 = vmatpush2.bf16.msra.mxu0 %v6810_v6  ;;  %5052 = vmatpush2.bf16.msra.mxu1 %v6812_v7  ;;  %v7990_v6 = vld [vmem:[#allocation21 + $0x44] ss:$8 sps:$4 sm:$0xff]  }
 0xdc8   : > { %5012 = vmatprep.subr.bf16.mxu0 %v6803_v8  ;;  %5053 = vmatprep.subr.bf16.mxu1 %v6805_v9  ;;  %v7993_v7 = vld [vmem:[#allocation21 + $0x144] ss:$8 sps:$4 sm:$0xff]   ;;  %v7988_v8 = vld [vmem:[#allocation21 + $0x40] ss:$8 sps:$4 sm:$0xff]   ;;  %v7996_v9 = vld [vmem:[#allocation21 + $0x34] ss:$8 sps:$4 sm:$0xff]  }
 0xdcb   : > { %5013 = vmatpush2.bf16.msra.mxu0 %v6802_v14  ;;  %5054 = vmatpush2.bf16.msra.mxu1 %v6804_v16  ;;  %v8005_v14 = vld [vmem:[#allocation21 + $0x124] ss:$8 sps:$4 sm:$0xff]   ;;  %v8000_v16 = vld [vmem:[#allocation21 + $0x20] ss:$8 sps:$4 sm:$0xff]  }
 0xdcc   : > { %5014 = vmatprep.subr.bf16.mxu0 %v6795_v15  ;;  %5055 = vmatprep.subr.bf16.mxu1 %v6797_v17  ;;  %v8003_v15 = vld [vmem:[#allocation21 + $0x120] ss:$8 sps:$4 sm:$0xff]   ;;  %v8008_v17 = vld [vmem:[#allocation21 + $0x14] ss:$8 sps:$4 sm:$0xff]  }
 0xdcf   : > { %5015 = vmatpush2.bf16.msra.mxu0 %v6794_v26  ;;  %5056 = vmatpush2.bf16.msra.mxu1 %v6796_v27  ;;  %v8017_v26 = vld [vmem:[#allocation21 + $0x104] ss:$8 sps:$4 sm:$0xff]   ;;  %v8012_v27 = vld [vmem:[#allocation21] ss:$8 sps:$4 sm:$0xff]  }
 0xdd0   : > { %5016 = vmatprep.subr.bf16.mxu0 %v6787_v28  ;;  %5057 = vmatprep.subr.bf16.mxu1 %v6789_v29  ;;  %v8015_v28 = vld [vmem:[#allocation21 + $0x100] ss:$8 sps:$4 sm:$0xff]   ;;  %v8020_v29 = vld [vmem:[#allocation21 + $0xf4] ss:$8 sps:$4 sm:$0xff]  }
 0xdd3   : > { %5017 = vmatpush2.bf16.msra.mxu0 %v6786_v36  ;;  %5058 = vmatpush2.bf16.msra.mxu1 %v6788_v37  ;;  %v8029_v36 = vld [vmem:[#allocation21 + $0x1e4] ss:$8 sps:$4 sm:$0xff]   ;;  %v8024_v37 = vld [vmem:[#allocation21 + $0xe0] ss:$8 sps:$4 sm:$0xff]  }
 0xdd4   : > { %5018 = vmatprep.subr.bf16.mxu0 %v6779_v38  ;;  %5059 = vmatprep.subr.bf16.mxu1 %v6781_v39  ;;  %v8027_v38 = vld [vmem:[#allocation21 + $0x1e0] ss:$8 sps:$4 sm:$0xff]   ;;  %v8032_v39 = vld [vmem:[#allocation21 + $0xd4] ss:$8 sps:$4 sm:$0xff]  }
 0xdd7   : > { %5019 = vmatpush2.bf16.msra.mxu0 %v6778_v43  ;;  %5060 = vmatpush2.bf16.msra.mxu1 %v6780_v47  ;;  %v8041_v43 = vld [vmem:[#allocation21 + $0x1c4] ss:$8 sps:$4 sm:$0xff]   ;;  %v8036_v47 = vld [vmem:[#allocation21 + $0xc0] ss:$8 sps:$4 sm:$0xff]  }
 0xdd8   : > { %5020 = vmatprep.subr.bf16.mxu0 %v6771_v61  ;;  %5061 = vmatprep.subr.bf16.mxu1 %v6773_v48  ;;  %v8039_v61 = vld [vmem:[#allocation21 + $0x1c0] ss:$8 sps:$4 sm:$0xff]   ;;  %v8044_v48 = vld [vmem:[#allocation21 + $0xb4] ss:$8 sps:$4 sm:$0xff]  }
 0xddb   : > { %5021 = vmatpush2.bf16.msra.mxu0 %v6770_v52  ;;  %5062 = vmatpush2.bf16.msra.mxu1 %v6772_v53  ;;  %v8053_v52 = vld [vmem:[#allocation21 + $0x1a4] ss:$8 sps:$4 sm:$0xff]   ;;  %v8048_v53 = vld [vmem:[#allocation21 + $0xa0] ss:$8 sps:$4 sm:$0xff]  }
 0xddc   : > { %5022 = vmatprep.subr.bf16.mxu0 %v6763_v44  ;;  %5063 = vmatprep.subr.bf16.mxu1 %v6765_v54  ;;  %v8051_v44 = vld [vmem:[#allocation21 + $0x1a0] ss:$8 sps:$4 sm:$0xff]   ;;  %v8056_v54 = vld [vmem:[#allocation21 + $0x94] ss:$8 sps:$4 sm:$0xff]  }
 0xddf   : > { %5023 = vmatpush2.bf16.msra.mxu0 %v6762_v55  ;;  %5064 = vmatpush2.bf16.msra.mxu1 %v6764_v56  ;;  %v8059_v55 = vld [vmem:[#allocation21 + $0x194] ss:$8 sps:$4 sm:$0xff]   ;;  %v8054_v56 = vld [vmem:[#allocation21 + $0x90] ss:$8 sps:$4 sm:$0xff]  }
 0xde0   : > { %5870 = vmatprep.subr.bf16.mxu0 %v7972_v58  ;;  %5911 = vmatprep.subr.bf16.mxu1 %v7975_v34  ;;  %v8057_v58 = vld [vmem:[#allocation21 + $0x190] ss:$8 sps:$4 sm:$0xff]   ;;  %v8062_v34 = vld [vmem:[#allocation21 + $0x84] ss:$8 sps:$4 sm:$0xff]  }
 0xde2   : > { %5025 = vmatmul.mubr.bf16.vlgmr.msra.gmra.mxu0 %v9144_v57  ;;  %5066 = vmatmul.mubr.bf16.vlgmr.msra.gmra.mxu1 %v9144_v57  ;;  %v7991_v57 = vld [vmem:[#allocation21 + $0x140] ss:$8 sps:$4 sm:$0xff]  }
 0xde3   : > { %5871 = vmatpush1.bf16.msra.mxu0 %v7970_v59  ;;  %5912 = vmatpush1.bf16.msra.mxu1 %v7973_v60  ;;  %v8065_v59 = vld [vmem:[#allocation21 + $0x184] ss:$8 sps:$4 sm:$0xff]   ;;  %v8060_v60 = vld [vmem:[#allocation21 + $0x80] ss:$8 sps:$4 sm:$0xff]  }
 0xde4   : > { %5872 = vmatprep.subr.bf16.mxu0 %v7978_v33  ;;  %5913 = vmatprep.subr.bf16.mxu1 %v7981_v62  ;;  %v8063_v33 = vld [vmem:[#allocation21 + $0x180] ss:$8 sps:$4 sm:$0xff]   ;;  %v8068_v62 = vld [vmem:[#allocation21 + $0x274] ss:$8 sps:$4 sm:$0xff]  }
 0xde7   : > { %5873 = vmatpush1.bf16.msra.mxu0 %v7976_v63  ;;  %5914 = vmatpush1.bf16.msra.mxu1 %v7979_v0  ;;  %v8071_v63 = vld [vmem:[#allocation21 + $0x374] ss:$8 sps:$4 sm:$0xff]   ;;  %v4240_v0 = vsub.s32 2, %v8980_v22 }
 0xde8   : > { %5874 = vmatprep.subr.bf16.mxu0 %v7984_v1  ;;  %5915 = vmatprep.subr.bf16.mxu1 %v7987_v4  ;;  %v9154_v1 = vld [vmem:[%s9267_s15] sm:$0xff]  ;;  %v4244_v4 = vsub.s32 3, %v8980_v22 }
 0xdeb   : > { %5875 = vmatpush1.bf16.msra.mxu0 %v7982_v5  ;;  %5916 = vmatpush1.bf16.msra.mxu1 %v7985_v21  ;;  %v4233_v5 = vrot.slane %v9154_v1, %v8983_v23  ;;  %v4241_v21 = vrot.slane %v9154_v1, %v4240_v0  ;;  %v8114_v0 = vld [vmem:[#allocation21 + $0x2f0] ss:$8 sps:$4 sm:$0xff]  }
 0xdec   : > { %5876 = vmatprep.subr.bf16.mxu0 %v7990_v6  ;;  %5917 = vmatprep.subr.bf16.mxu1 %v7993_v7  ;;  %v4237_v6 = vrot.slane %v9154_v1, %v8986_v24  ;;  %v4245_v7 = vrot.slane %v9154_v1, %v4244_v4  ;;  %v8117_v4 = vld [vmem:[#allocation21 + $0x3f0] ss:$8 sps:$4 sm:$0xff]  }
 0xdef   : > { %5877 = vmatpush1.bf16.msra.mxu0 %v7988_v8  ;;  %5918 = vmatpush1.bf16.msra.mxu1 %v7991_v57 }
 0xdf0   : > { %5878 = vmatprep.subr.bf16.mxu0 %v7996_v9  ;;  %5919 = vmatprep.subr.bf16.mxu1 %v7999_v10 }
 0xdf3   : > { %5879 = vmatpush1.bf16.msra.mxu0 %v7994_v11  ;;  %5920 = vmatpush1.bf16.msra.mxu1 %v7997_v12 }
 0xdf4   : > { %5880 = vmatprep.subr.bf16.mxu0 %v8002_v13  ;;  %5921 = vmatprep.subr.bf16.mxu1 %v8005_v14 }
 0xdf7   : > { %5881 = vmatpush1.bf16.msra.mxu0 %v8000_v16  ;;  %5922 = vmatpush1.bf16.msra.mxu1 %v8003_v15 }
 0xdf8   : > { %5882 = vmatprep.subr.bf16.mxu0 %v8008_v17  ;;  %5923 = vmatprep.subr.bf16.mxu1 %v8011_v18 }
 0xdfb   : > { %5883 = vmatpush1.bf16.msra.mxu0 %v8006_v19  ;;  %5924 = vmatpush1.bf16.msra.mxu1 %v8009_v20 }
 0xdfc   : > { %5884 = vmatprep.subr.bf16.mxu0 %v8014_v25  ;;  %5925 = vmatprep.subr.bf16.mxu1 %v8017_v26 }
 0xdff   : > { %5885 = vmatpush1.bf16.msra.mxu0 %v8012_v27  ;;  %5926 = vmatpush1.bf16.msra.mxu1 %v8015_v28 }
 0xe00   : > { %5886 = vmatprep.subr.bf16.mxu0 %v8020_v29  ;;  %5927 = vmatprep.subr.bf16.mxu1 %v8023_v30  ;;  %v8066_v29 = vld [vmem:[#allocation21 + $0x270] ss:$8 sps:$4 sm:$0xff]  }
 0xe01   : > { %v8069_v30 = vld [vmem:[#allocation21 + $0x370] ss:$8 sps:$4 sm:$0xff]  }
 0xe03   : > { %5887 = vmatpush2.bf16.msra.mxu0 %v8018_v31  ;;  %5928 = vmatpush2.bf16.msra.mxu1 %v8021_v32 }
 0xe04   : > { %5888 = vmatprep.subr.bf16.mxu0 %v8026_v35  ;;  %5929 = vmatprep.subr.bf16.mxu1 %v8029_v36  ;;  %v8074_v35 = vld [vmem:[#allocation21 + $0x264] ss:$8 sps:$4 sm:$0xff]  }
 0xe05   : > { %v8077_v36 = vld [vmem:[#allocation21 + $0x364] ss:$8 sps:$4 sm:$0xff]  }
 0xe07   : > { %5889 = vmatpush2.bf16.msra.mxu0 %v8024_v37  ;;  %5930 = vmatpush2.bf16.msra.mxu1 %v8027_v38  ;;  %v8072_v37 = vld [vmem:[#allocation21 + $0x260] ss:$8 sps:$4 sm:$0xff]  }
 0xe08   : > { %5890 = vmatprep.subr.bf16.mxu0 %v8032_v39  ;;  %5931 = vmatprep.subr.bf16.mxu1 %v8035_v45  ;;  %v8075_v38 = vld [vmem:[#allocation21 + $0x360] ss:$8 sps:$4 sm:$0xff]   ;;  %v8080_v39 = vld [vmem:[#allocation21 + $0x254] ss:$8 sps:$4 sm:$0xff]  }
 0xe09   : > { %v8083_v45 = vld [vmem:[#allocation21 + $0x354] ss:$8 sps:$4 sm:$0xff]  }
 0xe0b   : > { %5891 = vmatpush2.bf16.msra.mxu0 %v8030_v40  ;;  %5932 = vmatpush2.bf16.msra.mxu1 %v8033_v41  ;;  %v8078_v40 = vld [vmem:[#allocation21 + $0x250] ss:$8 sps:$4 sm:$0xff]  }
 0xe0c   : > { %5892 = vmatprep.subr.bf16.mxu0 %v8038_v42  ;;  %5933 = vmatprep.subr.bf16.mxu1 %v8041_v43  ;;  %v8081_v41 = vld [vmem:[#allocation21 + $0x350] ss:$8 sps:$4 sm:$0xff]   ;;  %v8086_v42 = vld [vmem:[#allocation21 + $0x244] ss:$8 sps:$4 sm:$0xff]  }
 0xe0d   : > { %v8089_v43 = vld [vmem:[#allocation21 + $0x344] ss:$8 sps:$4 sm:$0xff]  }
 0xe0f   : > { %5893 = vmatpush2.bf16.msra.mxu0 %v8036_v47  ;;  %5934 = vmatpush2.bf16.msra.mxu1 %v8039_v61  ;;  %v8084_v47 = vld [vmem:[#allocation21 + $0x240] ss:$8 sps:$4 sm:$0xff]  }
 0xe10   : > { %5894 = vmatprep.subr.bf16.mxu0 %v8044_v48  ;;  %5935 = vmatprep.subr.bf16.mxu1 %v8047_v49  ;;  %v8087_v61 = vld [vmem:[#allocation21 + $0x340] ss:$8 sps:$4 sm:$0xff]   ;;  %v8092_v48 = vld [vmem:[#allocation21 + $0x234] ss:$8 sps:$4 sm:$0xff]  }
 0xe11   : > { %v8095_v49 = vld [vmem:[#allocation21 + $0x334] ss:$8 sps:$4 sm:$0xff]  }
 0xe13   : > { %5895 = vmatpush2.bf16.msra.mxu0 %v8042_v46  ;;  %5936 = vmatpush2.bf16.msra.mxu1 %v8045_v50  ;;  %v8090_v46 = vld [vmem:[#allocation21 + $0x230] ss:$8 sps:$4 sm:$0xff]  }
 0xe14   : > { %5896 = vmatprep.subr.bf16.mxu0 %v8050_v51  ;;  %5937 = vmatprep.subr.bf16.mxu1 %v8053_v52  ;;  %v8093_v50 = vld [vmem:[#allocation21 + $0x330] ss:$8 sps:$4 sm:$0xff]   ;;  %v8098_v51 = vld [vmem:[#allocation21 + $0x224] ss:$8 sps:$4 sm:$0xff]  }
 0xe15   : > { %v8101_v52 = vld [vmem:[#allocation21 + $0x324] ss:$8 sps:$4 sm:$0xff]  }
 0xe17   : > { %5897 = vmatpush2.bf16.msra.mxu0 %v8048_v53  ;;  %5938 = vmatpush2.bf16.msra.mxu1 %v8051_v44  ;;  %v8096_v53 = vld [vmem:[#allocation21 + $0x220] ss:$8 sps:$4 sm:$0xff]  }
 0xe18   : > { %5898 = vmatprep.subr.bf16.mxu0 %v8056_v54  ;;  %5939 = vmatprep.subr.bf16.mxu1 %v8059_v55  ;;  %v8099_v44 = vld [vmem:[#allocation21 + $0x320] ss:$8 sps:$4 sm:$0xff]   ;;  %v8104_v54 = vld [vmem:[#allocation21 + $0x214] ss:$8 sps:$4 sm:$0xff]  }
 0xe19   : > { %v8107_v55 = vld [vmem:[#allocation21 + $0x314] ss:$8 sps:$4 sm:$0xff]  }
 0xe1b   : > { %5899 = vmatpush2.bf16.msra.mxu0 %v8054_v56  ;;  %5940 = vmatpush2.bf16.msra.mxu1 %v8057_v58  ;;  %v8102_v56 = vld [vmem:[#allocation21 + $0x210] ss:$8 sps:$4 sm:$0xff]  }
 0xe1c   : > { %5900 = vmatprep.subr.bf16.mxu0 %v8062_v34  ;;  %5941 = vmatprep.subr.bf16.mxu1 %v8065_v59  ;;  %v8105_v58 = vld [vmem:[#allocation21 + $0x310] ss:$8 sps:$4 sm:$0xff]   ;;  %v8110_v34 = vld [vmem:[#allocation21 + $0x204] ss:$8 sps:$4 sm:$0xff]  }
 0xe1d   : > { %v8113_v59 = vld [vmem:[#allocation21 + $0x304] ss:$8 sps:$4 sm:$0xff]  }
 0xe1f   : > { %5901 = vmatpush2.bf16.msra.mxu0 %v8060_v60  ;;  %5942 = vmatpush2.bf16.msra.mxu1 %v8063_v33  ;;  %v8108_v60 = vld [vmem:[#allocation21 + $0x200] ss:$8 sps:$4 sm:$0xff]  }
 0xe20   : > { %5952 = vmatprep.subr.bf16.mxu0 %v8068_v62  ;;  %5993 = vmatprep.subr.bf16.mxu1 %v8071_v63  ;;  %v8111_v33 = vld [vmem:[#allocation21 + $0x300] ss:$8 sps:$4 sm:$0xff]   ;;  %v8116_v62 = vld [vmem:[#allocation21 + $0x2f4] ss:$8 sps:$4 sm:$0xff]  }
 0xe21   : > { %v8119_v63 = vld [vmem:[#allocation21 + $0x3f4] ss:$8 sps:$4 sm:$0xff]  }
 0xe62   : > { %v4944_v8 = vpop.f32.mrf.mxu0  ;;  %v4985_v57 = vpop.f32.mrf.mxu1 }
 0xe63   : > { %v4945_v9 = vadd.f32 %v4944_v8, %v4233_v5  ;;  %v4986_v10 = vadd.f32 %v4985_v57, %v4241_v21  ;;  %v8122_v5 = vld [vmem:[#allocation21 + $0x2e4] ss:$8 sps:$4 sm:$0xff]   ;;  %v8128_v8 = vld [vmem:[#allocation21 + $0x2d4] ss:$8 sps:$4 sm:$0xff]  }
 0xe64   : > { %v4946_v11 = vpop.f32.mrf.mxu0  ;;  %v4987_v12 = vpop.f32.mrf.mxu1  ;;  %v8125_v21 = vld [vmem:[#allocation21 + $0x3e4] ss:$8 sps:$4 sm:$0xff]   ;;  %v8131_v57 = vld [vmem:[#allocation21 + $0x3d4] ss:$8 sps:$4 sm:$0xff]  }
 0xe65   : > { %v4947_v13 = vadd.f32 %v4946_v11, %v4237_v6  ;;  %v4988_v14 = vadd.f32 %v4987_v12, %v4245_v7  ;;  %v5074_v16 = vmax.f32 %v4945_v9, 0.0  ;;  %v5076_v15 = vmax.f32 %v4986_v10, 0.0  ;;  %v8120_v6 = vld [vmem:[#allocation21 + $0x2e0] ss:$8 sps:$4 sm:$0xff]   ;;  %v8126_v9 = vld [vmem:[#allocation21 + $0x2d0] ss:$8 sps:$4 sm:$0xff]  }
 0xe66   : > { %v4948_v17 = vpop.f32.mrf.mxu0  ;;  %v4989_v18 = vpop.f32.mrf.mxu1  ;;  %v8123_v7 = vld [vmem:[#allocation21 + $0x3e0] ss:$8 sps:$4 sm:$0xff]   ;;  %v8129_v10 = vld [vmem:[#allocation21 + $0x3d0] ss:$8 sps:$4 sm:$0xff]   ;;  %v8134_v11 = vld [vmem:[#allocation21 + $0x2c4] ss:$8 sps:$4 sm:$0xff]  }
 0xe67   : > { %v5075_v19 = vmax.f32 %v4947_v13, 0.0  ;;  %v5077_v20 = vmax.f32 %v4988_v14, 0.0  ;;  %v5082_v31 = vpack.c.bf16 %v5074_v16, %v5074_v16  ;;  %v5084_v32 = vpack.c.bf16 %v5076_v15, %v5076_v15  ;;  %v8137_v12 = vld [vmem:[#allocation21 + $0x3c4] ss:$8 sps:$4 sm:$0xff]   ;;  %v8132_v13 = vld [vmem:[#allocation21 + $0x2c0] ss:$8 sps:$4 sm:$0xff]  }
 0xe68   : > { %v4949_v25 = vpop.f32.mrf.mxu0  ;;  %v4990_v26 = vpop.f32.mrf.mxu1  ;;  %v8135_v14 = vld [vmem:[#allocation21 + $0x3c0] ss:$8 sps:$4 sm:$0xff]   ;;  %v8140_v16 = vld [vmem:[#allocation21 + $0x2b4] ss:$8 sps:$4 sm:$0xff]   ;;  %v8138_v17 = vld [vmem:[#allocation21 + $0x2b0] ss:$8 sps:$4 sm:$0xff]  }
 0xe69   : > { %v5083_v27 = vpack.c.bf16 %v5075_v19, %v5075_v19  ;;  %v5085_v28 = vpack.c.bf16 %v5077_v20, %v5077_v20  ;;  %v8143_v15 = vld [vmem:[#allocation21 + $0x3b4] ss:$8 sps:$4 sm:$0xff]   ;;  %v8141_v18 = vld [vmem:[#allocation21 + $0x3b0] ss:$8 sps:$4 sm:$0xff]   ;;  %v8146_v19 = vld [vmem:[#allocation21 + $0x2a4] ss:$8 sps:$4 sm:$0xff]  }
 0xe6a   : > { %v8149_v20 = vld [vmem:[#allocation21 + $0x3a4] ss:$8 sps:$4 sm:$0xff]   ;;  %v4248_v25 = vsub.s32 4, %v8980_v22  ;;  %v4256_v26 = vsub.s32 6, %v8980_v22 }
 0xe6b   : > { %5902 = vmatprep.mubr.bf16.mxu0 %v5083_v27  ;;  %5943 = vmatprep.mubr.bf16.mxu1 %v5085_v28  ;;  %v8144_v27 = vld [vmem:[#allocation21 + $0x2a0] ss:$8 sps:$4 sm:$0xff]  }
 0xe6c   : > { %5903 = vmatmul.mubr.bf16.vlgmr.msra.gmra.mxu0 %v5082_v31  ;;  %5944 = vmatmul.mubr.bf16.vlgmr.msra.gmra.mxu1 %v5084_v32  ;;  %v8147_v28 = vld [vmem:[#allocation21 + $0x3a0] ss:$8 sps:$4 sm:$0xff]   ;;  %v8152_v31 = vld [vmem:[#allocation21 + $0x294] ss:$8 sps:$4 sm:$0xff]  }
 0xe6d   : > { %5953 = vmatpush1.bf16.msra.mxu0 %v8066_v29  ;;  %5994 = vmatpush1.bf16.msra.mxu1 %v8069_v30  ;;  %v4252_v29 = vsub.s32 5, %v8980_v22  ;;  %v4260_v30 = vsub.s32 7, %v8980_v22  ;;  %v8155_v32 = vld [vmem:[#allocation21 + $0x394] ss:$8 sps:$4 sm:$0xff]   ;;  %v8158_v22 = vld [vmem:[#allocation21 + $0x284] ss:$8 sps:$4 sm:$0xff]  }
 0xe6e   : > { %5954 = vmatprep.subr.bf16.mxu0 %v8074_v35  ;;  %5995 = vmatprep.subr.bf16.mxu1 %v8077_v36  ;;  %v4249_v35 = vrot.slane %v9154_v1, %v4248_v25  ;;  %v4257_v36 = vrot.slane %v9154_v1, %v4256_v26 }
 0xe71   : > { %5955 = vmatpush1.bf16.msra.mxu0 %v8072_v37  ;;  %5996 = vmatpush1.bf16.msra.mxu1 %v8075_v38  ;;  %v4253_v37 = vrot.slane %v9154_v1, %v4252_v29  ;;  %v4261_v38 = vrot.slane %v9154_v1, %v4260_v30 }
 0xe72   : > { %5956 = vmatprep.subr.bf16.mxu0 %v8080_v39  ;;  %5997 = vmatprep.subr.bf16.mxu1 %v8083_v45  ;;  %v8150_v39 = vld [vmem:[#allocation21 + $0x290] ss:$8 sps:$4 sm:$0xff]  }
 0xe73   : > { %v8153_v45 = vld [vmem:[#allocation21 + $0x390] ss:$8 sps:$4 sm:$0xff]  }
 0xe75   : > { %5957 = vmatpush1.bf16.msra.mxu0 %v8078_v40  ;;  %5998 = vmatpush1.bf16.msra.mxu1 %v8081_v41 }
 0xe76   : > { %5958 = vmatprep.subr.bf16.mxu0 %v8086_v42  ;;  %5999 = vmatprep.subr.bf16.mxu1 %v8089_v43  ;;  %v8161_v42 = vld [vmem:[#allocation21 + $0x384] ss:$8 sps:$4 sm:$0xff]  }
 0xe79   : > { %5959 = vmatpush1.bf16.msra.mxu0 %v8084_v47  ;;  %6000 = vmatpush1.bf16.msra.mxu1 %v8087_v61 }
 0xe7a   : > { %5960 = vmatprep.subr.bf16.mxu0 %v8092_v48  ;;  %6001 = vmatprep.subr.bf16.mxu1 %v8095_v49 }
 0xe7d   : > { %5961 = vmatpush1.bf16.msra.mxu0 %v8090_v46  ;;  %6002 = vmatpush1.bf16.msra.mxu1 %v8093_v50  ;;  %v8156_v50 = vld [vmem:[#allocation21 + $0x280] ss:$8 sps:$4 sm:$0xff]  }
 0xe7e   : > { %5962 = vmatprep.subr.bf16.mxu0 %v8098_v51  ;;  %6003 = vmatprep.subr.bf16.mxu1 %v8101_v52  ;;  %v8159_v51 = vld [vmem:[#allocation21 + $0x380] ss:$8 sps:$4 sm:$0xff]  }
 0xe81   : > { %5963 = vmatpush1.bf16.msra.mxu0 %v8096_v53  ;;  %6004 = vmatpush1.bf16.msra.mxu1 %v8099_v44 }
 0xe82   : > { %5964 = vmatprep.subr.bf16.mxu0 %v8104_v54  ;;  %6005 = vmatprep.subr.bf16.mxu1 %v8107_v55 }
 0xe85   : > { %5965 = vmatpush1.bf16.msra.mxu0 %v8102_v56  ;;  %6006 = vmatpush1.bf16.msra.mxu1 %v8105_v58 }
 0xe86   : > { %5966 = vmatprep.subr.bf16.mxu0 %v8110_v34  ;;  %6007 = vmatprep.subr.bf16.mxu1 %v8113_v59 }
 0xe89   : > { %5967 = vmatpush1.bf16.msra.mxu0 %v8108_v60  ;;  %6008 = vmatpush1.bf16.msra.mxu1 %v8111_v33 }
 0xe8a   : > { %5968 = vmatprep.subr.bf16.mxu0 %v8116_v62  ;;  %6009 = vmatprep.subr.bf16.mxu1 %v8119_v63 }
 0xe8d   : > { %5969 = vmatpush2.bf16.msra.mxu0 %v8114_v0  ;;  %6010 = vmatpush2.bf16.msra.mxu1 %v8117_v4 }
 0xe8e   : > { %5970 = vmatprep.subr.bf16.mxu0 %v8122_v5  ;;  %6011 = vmatprep.subr.bf16.mxu1 %v8125_v21 }
 0xe91   : > { %5971 = vmatpush2.bf16.msra.mxu0 %v8120_v6  ;;  %6012 = vmatpush2.bf16.msra.mxu1 %v8123_v7 }
 0xe92   : > { %5972 = vmatprep.subr.bf16.mxu0 %v8128_v8  ;;  %6013 = vmatprep.subr.bf16.mxu1 %v8131_v57 }
 0xe95   : > { %5973 = vmatpush2.bf16.msra.mxu0 %v8126_v9  ;;  %6014 = vmatpush2.bf16.msra.mxu1 %v8129_v10 }
 0xe96   : > { %5974 = vmatprep.subr.bf16.mxu0 %v8134_v11  ;;  %6015 = vmatprep.subr.bf16.mxu1 %v8137_v12 }
 0xe99   : > { %5975 = vmatpush2.bf16.msra.mxu0 %v8132_v13  ;;  %6016 = vmatpush2.bf16.msra.mxu1 %v8135_v14 }
 0xe9a   : > { %5976 = vmatprep.subr.bf16.mxu0 %v8140_v16  ;;  %6017 = vmatprep.subr.bf16.mxu1 %v8143_v15 }
 0xe9d   : > { %5977 = vmatpush2.bf16.msra.mxu0 %v8138_v17  ;;  %6018 = vmatpush2.bf16.msra.mxu1 %v8141_v18 }
 0xe9e   : > { %5978 = vmatprep.subr.bf16.mxu0 %v8146_v19  ;;  %6019 = vmatprep.subr.bf16.mxu1 %v8149_v20 }
 0xea1   : > { %5979 = vmatpush2.bf16.msra.mxu0 %v8144_v27  ;;  %6020 = vmatpush2.bf16.msra.mxu1 %v8147_v28 }
 0xea2   : > { %v5026_v40 = vpop.f32.mrf.mxu0  ;;  %v5067_v41 = vpop.f32.mrf.mxu1  ;;  %5980 = vmatprep.subr.bf16.mxu0 %v8152_v31  ;;  %6021 = vmatprep.subr.bf16.mxu1 %v8155_v32 }
 0xea3   : > { %v5027_v43 = vadd.f32 %v5026_v40, %v4249_v35  ;;  %v5068_v47 = vadd.f32 %v5067_v41, %v4257_v36 }
 0xea4   : > { %v5028_v61 = vpop.f32.mrf.mxu0  ;;  %v5069_v48 = vpop.f32.mrf.mxu1 }
 0xea5   : > { %v5029_v49 = vadd.f32 %v5028_v61, %v4253_v37  ;;  %v5070_v46 = vadd.f32 %v5069_v48, %v4261_v38  ;;  %5981 = vmatpush2.bf16.msra.mxu0 %v8150_v39  ;;  %6022 = vmatpush2.bf16.msra.mxu1 %v8153_v45  ;;  %v5078_v52 = vmax.f32 %v5027_v43, 0.0  ;;  %v5080_v1 = vmax.f32 %v5068_v47, 0.0 }
 0xea6   : > { %v5030_v53 = vpop.f32.mrf.mxu0  ;;  %v5071_v44 = vpop.f32.mrf.mxu1  ;;  %5982 = vmatprep.subr.bf16.mxu0 %v8158_v22  ;;  %6023 = vmatprep.subr.bf16.mxu1 %v8161_v42 }
 0xea7   : > { %v5079_v54 = vmax.f32 %v5029_v49, 0.0  ;;  %v5081_v55 = vmax.f32 %v5070_v46, 0.0  ;;  %v5086_v60 = vpack.c.bf16 %v5078_v52, %v5078_v52  ;;  %v5088_v33 = vpack.c.bf16 %v5080_v1, %v5080_v1 }
 0xea8   : > { %v5031_v56 = vpop.f32.mrf.mxu0  ;;  %v5072_v58 = vpop.f32.mrf.mxu1 }
 0xea9   : > { %v5087_v34 = vpack.c.bf16 %v5079_v54, %v5079_v54  ;;  %v5089_v59 = vpack.c.bf16 %v5081_v55, %v5081_v55  ;;  %5983 = vmatpush2.bf16.msra.mxu0 %v8156_v50  ;;  %6024 = vmatpush2.bf16.msra.mxu1 %v8159_v51 }
 0xeab   : > { %5984 = vmatprep.mubr.bf16.mxu0 %v5087_v34  ;;  %6025 = vmatprep.mubr.bf16.mxu1 %v5089_v59 }
 0xeac   : > { %5985 = vmatmul.mubr.bf16.vlgmr.msra.gmra.mxu0 %v5086_v60  ;;  %6026 = vmatmul.mubr.bf16.vlgmr.msra.gmra.mxu1 %v5088_v33 }
 0xead   : > { %8465 = shalt.err (!%p8462_p8)
}
 0xeae   : > { %s8466_s23 = scalar_lea.hbm %s9176_s10, 128  ;;  %s8470_s28 = scalar_lea.hbm %s9333_s9, 256 }
 0xeaf   : > { %p8467_p6 = scmp.ne.s32.totalorder %s9176_s10, %s8466_s23  ;;  %p8471_p12 = scmp.lt.s32.totalorder %s9176_s10, %s9333_s9 }
 0xeb0   : > { %p8472_p0 = scmp.lt.s32.totalorder %s8470_s28, %s8466_s23 }
 0xeb1   : > { %p8468_p5 = pnand %p8467_p6, %p8865_p11 }
 0xeb2   : > { %p8473_p1 = por %p8472_p0, %p8471_p12 }
 0xeb3   : > { %p8469_p10 = pneg %p8468_p5 }
 0xeb5   : > { %p8474_p3 = pnand %p8473_p1, %p8469_p10 }
 0xeb7   : > { %8477 = shalt.err (!%p8474_p3)
}
 0xeb8   : > { %s8607_s29 = smov 64   ;;  %s8608_s6 = smov 4  }
 0xeb9   : > { %7404 = dma.vmem_to_hbm [thread:$0]  (%p8865_p11), %s9178_s18, 128, %s9176_s10, %s6044_s24, %s8607_s29, %s8607_s29, %s8608_s6  }
 0xeba   : > { %s9334_s11 = sld [smem:[#allocation53_spill]]  ;;  %s7024_s18 = sshll.u32 %s9332_s4, 8 }
 0xebb   : > { %s794_s10 = scalar_lea.vmem [#allocation23], %s6312_s0  ;;  %s9335_s23 = sld [smem:[#allocation54_spill]] }
 0xebc   : > { %s6060_s24 = sshll.u32 %s794_s10, 4  ;;  %s6039_s27 = scalar_lea.sflag [#allocation8], %s8911_s16  ;;  %s6061_s24 = int_to_ptr.vmem [resolvable:$true] %s6060_s24 }
 0xebd   : > { %s8478_s28 = scalar_lea.vmem %s6061_s24, 256  ;;  %s8609_s0 = smov [#allocation23]  }
 0xebe   : > { %p8479_p9 = scmp.ne.s32.totalorder %s6061_s24, %s8478_s28  ;;  %s8482_s4 = sshll.u32 %s8609_s0, 4  ;;  %s8483_s4 = int_to_ptr.vmem [resolvable:$false] %s8482_s4 }
 0xebf   : > { %s8484_s2 = scalar_lea.vmem %s8483_s4, 512  ;;  %p8485_p2 = scmp.lt.s32.totalorder %s6061_s24, %s8483_s4 }
 0xec0   : > { %v5218_v8 = vld [vmem:[%s9334_s11] sm:$0x3]  ;;  %p8480_p7 = pnand %p8479_p9, %p8865_p11  ;;  %p8486_p8 = scmp.lt.s32.totalorder %s8484_s2, %s8478_s28 }
 0xec1   : > { %v5223_v57 = vrot.slane %v5218_v8, %v8983_v23  ;;  %v5227_v9 = vrot.slane %v5218_v8, %v8986_v24  ;;  %s6058_s17 = scalar_lea.hbm %s9335_s23, %s7024_s18 }
 0xec2   : > { %p8481_p4 = pneg %p8480_p7  ;;  %p8487_p6 = por %p8486_p8, %p8485_p2 }
 0xec4   : > { %p8488_p5 = pnand %p8487_p6, %p8481_p4 }
 0xf2c   : > { %v5904_v62 = vpop.f32.mrf.mxu0  ;;  %v5945_v63 = vpop.f32.mrf.mxu1 }
 0xf2d   : > { %v5905_v10 = vadd.f32 %v5904_v62, %v5223_v57 }
 0xf2e   : > { %v5906_v0 = vpop.f32.mrf.mxu0  ;;  %v5947_v4 = vpop.f32.mrf.mxu1 }
 0xf2f   : > { %v5907_v11 = vadd.f32 %v5906_v0, %v5227_v9  ;;  %v5946_v12 = vadd.f32 %v5945_v63, %v5905_v10 }
 0xf30   : > { %v5908_v5 = vpop.f32.mrf.mxu0  ;;  %v5949_v21 = vpop.f32.mrf.mxu1 }
 0xf31   : > { %v5948_v16 = vadd.f32 %v5947_v4, %v5907_v11 }
 0xf32   : > { %v5909_v6 = vpop.f32.mrf.mxu0  ;;  %v5950_v7 = vpop.f32.mrf.mxu1 }
 0xf6c   : > { %v5986_v13 = vpop.f32.mrf.mxu0  ;;  %v6027_v14 = vpop.f32.mrf.mxu1 }
 0xf6d   : > { %v5987_v15 = vadd.f32 %v5986_v13, %v5946_v12 }
 0xf6e   : > { %v5988_v17 = vpop.f32.mrf.mxu0  ;;  %v6029_v18 = vpop.f32.mrf.mxu1 }
 0xf6f   : > { %v6028_v19 = vadd.f32 %v6027_v14, %v5987_v15  ;;  %v5989_v20 = vadd.f32 %v5988_v17, %v5948_v16 }
 0xf70   : > { %v5990_v25 = vpop.f32.mrf.mxu0  ;;  %v6031_v26 = vpop.f32.mrf.mxu1 }
 0xf71   : > { %v6034_v23 = vadd.f32 %v6028_v19, %v9115_v2  ;;  %v6030_v24 = vadd.f32 %v6029_v18, %v5989_v20 }
 0xf72   : > { %v5991_v27 = vpop.f32.mrf.mxu0  ;;  %v6032_v28 = vpop.f32.mrf.mxu1 }
 0xf73   : > { %6036 = vst [vmem:[%s794_s10] sm:$0xff] %v6034_v23  ;;  %v6035_v29 = vadd.f32 %v6030_v24, %v9118_v3 }
 0xf75   : > { %6037 = vst [vmem:[%s794_s10 + $0x8] sm:$0xff] %v6035_v29 }
 0xf76   : > { %8491 = shalt.err (!%p8488_p5)
}
 0xf77   : > { %s8492_s5 = scalar_lea.hbm %s6058_s17, 256  ;;  %s8496_s6 = scalar_lea.hbm %s9335_s23, 512 }
 0xf78   : > { %p8493_p10 = scmp.ne.s32.totalorder %s6058_s17, %s8492_s5  ;;  %p8497_p1 = scmp.lt.s32.totalorder %s6058_s17, %s9335_s23 }
 0xf79   : > { %p8498_p3 = scmp.lt.s32.totalorder %s8496_s6, %s8492_s5 }
 0xf7a   : > { %p8494_p12 = pnand %p8493_p10, %p8865_p11 }
 0xf7b   : > { %p8499_p9 = por %p8498_p3, %p8497_p1 }
 0xf7c   : > { %p8495_p0 = pneg %p8494_p12 }
 0xf7e   : > { %p8500_p7 = pnand %p8499_p9, %p8495_p0 }
 0xf80   : > { %8503 = shalt.err (!%p8500_p7)
}
 0xf81   : > { %7403 = dma.vmem_to_hbm [thread:$0]  (%p8865_p11), %s6061_s24, 256, %s6058_s17, %s6039_s27  }
 0xf82 PF: > { %s9336_s11 = sld [smem:[#allocation35_spill]]  ;;  %p9338_p4 = scmp.ge.s32.totalorder %s8586_s22, 2 }
 0xf84   : > { %p7440_p2 = pnand %p9338_p4, %p8872_p13 }
 0xf86   : > { %p7441_p8 = pneg %p7440_p2 }
 0xf88   : > { %s6089_s10 = sand.u32 1, %s9336_s11  }
 0xf89   : > { %s6090_s20 = scalar_lea.sflag [#allocation8], %s6089_s10 }
 0xf8a   : > { %8557 = dma.done.wait (%p7441_p8), %s6090_s20, 256  }
 0xf8b   : > { %8559 = vsyncadd (%p7441_p8), %s6090_s20, 4294967040  ;;  %s6099_s3 = scalar_lea.sflag [#allocation25], %s6089_s10 }
 0xf8c   : > { %8561 = dma.done.wait (%p7441_p8), %s6099_s3, 128  }
 0xf8d   : > { %8563 = vsyncadd (%p7441_p8), %s6099_s3, 4294967168  ;;  %s46_s22 = sadd.s32 1, %s8586_s22   ;;  %s9339_s21 = sld [smem:[#allocation36_spill]] }
 0xf8e   : > { %p43_p6 = scmp.ge.s32.totalorder %s46_s22, 4   ;;  %s9340_s20 = sld [smem:[#allocation39_spill]] }
 0xf8f   : > { %s9341_s24 = sld [smem:[#allocation38_spill]]  ;;  %s9342_s0 = smov %s8570_s30 }
 0xf91   :  { %45 = sbr.rel (!%p43_p6) target bundleno = 30 (0x1e), region = 208 }
 0xf93   : > { %s9343_s30 = smov %s9339_s21  ;;  %s9344_s21 = smov %s8582_s1 }
 0xf95   : > { %s9345_s1 = smov %s9341_s24 }
 0xf96   :  { %6104 = vsyncpa [#allocation7], 1 }
 0xf97   :  { %6106 = vsyncpa [#allocation7 + $0x1], 1 }
 0xf98   :  { %6107 = vsyncpa [#allocation10], 1 }
 0xf99   :  { %6109 = vsyncpa [#allocation10 + $0x1], 1 }
 0xf9a   :  { %6110 = vsyncpa [#allocation13], 1 }
 0xf9b   :  { %6111 = vsyncpa [#allocation16], 1 }
 0xf9c   :  { %6112 = vsyncpa [#allocation19], 1 }
 0xf9d   :  { %6113 = vsyncpa [#allocation22], 1 }
 0xf9e   :  { %6114 = vsyncpa [#allocation8], 1 }
 0xf9f   :  { %6116 = vsyncpa [#allocation8 + $0x1], 1 }
 0xfa0   :  { %6117 = vsyncpa [#allocation25], 1 }
 0xfa1   :  { %6119 = vsyncpa [#allocation25 + $0x1], 1 }

</bundles_post_ra>
